<compile_context>
chip_gen: v7x
topology: tpu7x:2x2x1
jax: 0.10.0
libtpu: 0.0.40
codegen_flags: <defaults>
</compile_context>

<pallas_src>
import math
from functools import partial

import jax
import jax.numpy as jnp
from jax.experimental import pallas as pl
from jax.experimental.pallas import tpu as pltpu

VMEM_LIMIT = 32 * 1024 * 1024   # safe scoped-VMEM limit on v5e / v6e / v7x


# ---------------------------------------------------------------------------
# Fully fused forward kernel (one grid step per batch element).
# ---------------------------------------------------------------------------
def _fused_hattn_kernel(x_ref, wqkv_ref, wout_ref, bout_ref, o_ref, qkv_scr, *,
                        heads, dim_head, block_size, pad, num_levels, eps):
    d = dim_head
    inner = heads * d
    lb = block_size.bit_length() - 1            # log2(block_size)
    neg = -jnp.finfo(jnp.float32).max           # NOT -inf (exp(-inf - -inf) = nan)

    # ---- qkv projection: one wide lane-dense bf16 MXU matmul, kept in VMEM. ----
    qkv_scr[...] = jnp.dot(x_ref[0], wqkv_ref[...],
                           preferred_element_type=jnp.float32)       # (pad, 3*inner) f32

    # ---- head-invariant constants: masks, pooling and selection matrices. ----
    ri = jax.lax.broadcasted_iota(jnp.int32, (pad, pad), 0)
    ci = jax.lax.broadcasted_iota(jnp.int32, (pad, pad), 1)
    # finest level: attend inside own block, causally.
    allowed0 = ((ri >> lb) == (ci >> lb)) & (ci <= ri)

    pool_mean, pool_sum, allowed_lvl, sel_lvl, ones_lvl = [], [], [], [], []
    for l in range(1, num_levels + 1):
        nl, nprev = pad >> l, pad >> (l - 1)

        # pair pooling: row c of level l = rows 2c, 2c+1 of level l-1.
        pr = jax.lax.broadcasted_iota(jnp.int32, (nl, nprev), 0)
        pc = jax.lax.broadcasted_iota(jnp.int32, (nl, nprev), 1)
        pair = (pc >> 1) == pr
        pool_mean.append(jnp.where(pair, 0.5, 0.0).astype(jnp.float32))
        pool_sum.append(pair.astype(jnp.float32))

        # coarse level: odd blocks attend the preceding even block
        # (rows of even blocks end up all-zero == the F.pad of the reference).
        ar = jax.lax.broadcasted_iota(jnp.int32, (nl, nl), 0)
        ac = jax.lax.broadcasted_iota(jnp.int32, (nl, nl), 1)
        rb, cb = ar >> lb, ac >> lb
        allowed_lvl.append(((rb & 1) == 1) & (cb == rb - 1))

        # sel_l[i, c] = 1  iff  (i >> l == c) and (i mod 2**l == 2**l - 1)
        # == "repeat coarse row c by 2**l" composed with the per-level keep mask.
        sr = jax.lax.broadcasted_iota(jnp.int32, (pad, nl), 0)
        sc = jax.lax.broadcasted_iota(jnp.int32, (pad, nl), 1)
        keep = (sr & ((1 << l) - 1)) == ((1 << l) - 1)
        sel_lvl.append((((sr >> l) == sc) & keep).astype(jnp.float32))

        ones_lvl.append(jnp.ones((1, nl), jnp.float32))

    def level_attn(q, k, v, allowed):
        """Masked block attention on one level; bf16 MXU, f32 softmax math."""
        s = jax.lax.dot_general(q.astype(jnp.bfloat16), k.astype(jnp.bfloat16),
                                (((1,), (1,)), ((), ())),
                                preferred_element_type=jnp.float32)   # (n, n) f32
        s = jnp.where(allowed, s, neg)
        p = jnp.where(allowed, jnp.exp(s - jnp.max(s, axis=-1, keepdims=True)), 0.0)
        y = jnp.dot(p.astype(jnp.bfloat16), v.astype(jnp.bfloat16),
                    preferred_element_type=jnp.float32)               # (n, d) f32
        return p, y

    proj = jnp.zeros((pad, wout_ref.shape[1]), jnp.float32)
    for h in range(heads):
        q = qkv_scr[:, h * d:(h + 1) * d]                             # (pad, d) f32
        k = qkv_scr[:, inner + h * d:inner + (h + 1) * d]
        v = qkv_scr[:, 2 * inner + h * d:2 * inner + (h + 1) * d]

        # level 0 (finest): causal block-diagonal attention.
        p0, y0 = level_attn(q, k, v, allowed0)
        acc_y = y0                                                    # (pad, d) f32
        acc_a = jnp.sum(p0, axis=-1, keepdims=True)                   # (pad, 1) f32

        # coarse levels: pool in f32 on the MXU, attend, scatter via sel matmul.
        ql, kl, vl = q, k, v
        for l in range(1, num_levels + 1):
            ql = jnp.dot(pool_mean[l - 1], ql, preferred_element_type=jnp.float32)
            kl = jnp.dot(pool_mean[l - 1], kl, preferred_element_type=jnp.float32)
            vl = jnp.dot(pool_sum[l - 1], vl, preferred_element_type=jnp.float32)

            probs, yl = level_attn(ql, kl, vl, allowed_lvl[l - 1])
            sel = sel_lvl[l - 1]
            acc_y = acc_y + jnp.dot(sel, yl, preferred_element_type=jnp.float32)

            # lane-dense row of softmax denominators via a (1, n) @ (n, n) matvec.
            a_row = jax.lax.dot_general(ones_lvl[l - 1], probs,
                                        (((1,), (1,)), ((), ())),
                                        preferred_element_type=jnp.float32)  # (1, nl)
            acc_a = acc_a + jnp.sum(sel * a_row, axis=-1, keepdims=True)

        out_h = acc_y * pl.reciprocal(acc_a + eps, approx=True)       # (pad, d) f32

        # fused output projection: accumulate this head's contribution.
        proj = proj + jnp.dot(out_h.astype(jnp.bfloat16),
                              wout_ref[h * d:(h + 1) * d, :],
                              preferred_element_type=jnp.float32)

    o_ref[0] = (proj + bout_ref[...]).astype(o_ref.dtype)


def h_attention_1d_pallas(x, pparams, *, heads, dim_head, block_size, eps=1e-8):
    b, n, dim = x.shape
    pad = 2 ** int(math.ceil(math.log2(n)))
    if pad != n:
        x = jnp.pad(x, ((0, 0), (0, pad - n), (0, 0)))
    num_levels = int(math.log2(pad // block_size)) - 1
    assert num_levels >= 1, "need max_seq_len >= 4 * block_size"
    assert pad <= 1024, "TODO(synk): window-tile level-0 / combine for longer sequences"
    inner = heads * dim_head

    kernel = partial(_fused_hattn_kernel, heads=heads, dim_head=dim_head,
                     block_size=block_size, pad=pad, num_levels=num_levels, eps=eps)

    out = pl.pallas_call(
        kernel,
        out_shape=jax.ShapeDtypeStruct((b, pad, dim), jnp.float32),
        grid=(b,),
        in_specs=[pl.BlockSpec((1, pad, dim), lambda bi: (bi, 0, 0)),
                  pl.BlockSpec((dim, 3 * inner), lambda bi: (0, 0)),
                  pl.BlockSpec((inner, dim), lambda bi: (0, 0)),
                  pl.BlockSpec((1, dim), lambda bi: (0, 0))],
        out_specs=pl.BlockSpec((1, pad, dim), lambda bi: (bi, 0, 0)),
        scratch_shapes=[pltpu.VMEM((pad, 3 * inner), jnp.float32)],
        compiler_params=pltpu.CompilerParams(
            dimension_semantics=("parallel",),
            vmem_limit_bytes=VMEM_LIMIT),
    )(x.astype(jnp.bfloat16), pparams['w_qkv'], pparams['w_out'], pparams['b_out'])

    return out[:, :n]


# ---------------------------------------------------------------------------
# Parameters.
# ---------------------------------------------------------------------------
def init_params(key, dim, heads, dim_head):
    inner = heads * dim_head
    k1, k2, k3 = jax.random.split(key, 3)
    w_qkv = jax.random.normal(k1, (dim, inner * 3), jnp.float32) * 0.05
    # Fold the dim_head**-0.5 query scale into the q columns (static transform).
    scale = dim_head ** (-0.5)
    col_scale = jnp.concatenate([jnp.full((inner,), scale, jnp.float32),
                                 jnp.ones((2 * inner,), jnp.float32)])
    w_qkv = w_qkv * col_scale[None, :]
    w_out = jax.random.normal(k2, (inner, dim), jnp.float32) * 0.05
    b_out = jax.random.normal(k3, (dim,), jnp.float32) * 0.05
    return dict(w_qkv=w_qkv, w_out=w_out, b_out=b_out)


def prepare_pallas_params(params):
    """One-time static weight transform for the Pallas path (bf16 MXU operands)."""
    return dict(w_qkv=params['w_qkv'].astype(jnp.bfloat16),
                w_out=params['w_out'].astype(jnp.bfloat16),
                b_out=params['b_out'].reshape(1, -1).astype(jnp.float32))


def build_hier_mask(max_seq_len, block_size):
    """Replicates the `mask` buffer of the PyTorch module (reference path only)."""
    num_levels = int(math.log2(max_seq_len // block_size)) - 1
    root = jnp.arange(max_seq_len)
    seqs = [root]
    seq = root
    for ind in range(num_levels):
        seq = seq.reshape(-1, 2).max(axis=-1)
        seqs.append(jnp.repeat(seq, 2 ** (ind + 1)))
    seq_keys = jnp.stack(seqs, axis=0)
    return seq_keys > root[None, :]


# ---------------------------------------------------------------------------
# Pure-JAX f32 reference (faithful port of the PyTorch module).
# ---------------------------------------------------------------------------
def reference_forward(x, params, hier_mask, *, heads, dim_head, block_size, eps=1e-8):
    b, n, dim = x.shape
    h, d, bsz = heads, dim_head, block_size
    pad = 2 ** int(math.ceil(math.log2(n)))
    if pad != n:
        x = jnp.pad(x, ((0, 0), (0, pad - n), (0, 0)))

    qkv = jnp.dot(x.reshape(b * pad, dim), params['w_qkv'],
                  precision=jax.lax.Precision.HIGHEST).reshape(b, pad, 3, h, d)
    q, k, v = (jnp.transpose(qkv[:, :, i], (0, 2, 1, 3)).reshape(b * h, pad, d)
               for i in range(3))
    # NOTE: the q scale is already folded into w_qkv's q columns.

    num_levels = int(math.log2(pad // bsz)) - 1
    B = b * h
    qkvs = [(q, k, v)]
    for _ in range(num_levels):
        q = q.reshape(B, -1, 2, d).mean(axis=2)
        k = k.reshape(B, -1, 2, d).mean(axis=2)
        v = v.reshape(B, -1, 2, d).sum(axis=2)
        qkvs.append((q, k, v))

    to_blocks = lambda t: t.reshape(B, -1, bsz, d)

    def flip_every_two(t):
        nb = t.shape[1]
        return jnp.flip(t.reshape(B, nb // 2, 2, bsz, d), axis=2).reshape(B, nb, bsz, d)

    Ys = []
    for ind, (ql, kl, vl) in enumerate(reversed(qkvs)):
        is_last = ind == len(qkvs) - 1
        ql, kl, vl = map(to_blocks, (ql, kl, vl))
        if not is_last:
            kl, vl = map(flip_every_two, (kl, vl))
            nb = ql.shape[1]
            sel = lambda t: t.reshape(B, nb // 2, 2, bsz, d)[:, :, 1]
            ql, kl, vl = map(sel, (ql, kl, vl))
        s = jnp.einsum('bnid,bnjd->bnij', ql, kl, precision=jax.lax.Precision.HIGHEST)
        if is_last:
            cm = jnp.triu(jnp.ones((bsz, bsz), bool), 1)
            s = jnp.where(cm[None, None], -jnp.finfo(s.dtype).max, s)
        s = s - jnp.max(s, axis=-1, keepdims=True)
        a = jnp.exp(s)
        y = jnp.einsum('bnij,bnjd->bnid', a, vl, precision=jax.lax.Precision.HIGHEST)
        A = jnp.sum(a, axis=-1)
        if not is_last:
            y = jnp.pad(y[:, :, None], ((0, 0), (0, 0), (1, 0), (0, 0), (0, 0)))
            A = jnp.pad(A[:, :, None], ((0, 0), (0, 0), (1, 0), (0, 0)))
        Ys.append((y.reshape(B, -1, d), A.reshape(B, -1)))

    y_levels, a_levels = [], []
    for lvl in range(num_levels + 1):
        y_l, a_l = Ys[num_levels - lvl]
        y_levels.append(jnp.repeat(y_l, 2 ** lvl, axis=1))
        a_levels.append(jnp.repeat(a_l, 2 ** lvl, axis=1))
    y_stack = jnp.stack(y_levels, axis=0)
    a_stack = jnp.stack(a_levels, axis=0)

    mask = hier_mask[:num_levels + 1, :pad]
    keep = (~mask).astype(y_stack.dtype)
    Ysum = (y_stack * keep[:, None, :, None]).sum(0)
    Asum = (a_stack * keep[:, None, :]).sum(0)
    out = Ysum / (Asum[..., None] + eps)

    out = out.reshape(b, h, pad, d).transpose(0, 2, 1, 3).reshape(b, pad, h * d)
    out = out[:, :n]
    out = jnp.dot(out.reshape(b * n, h * d), params['w_out'],
                  precision=jax.lax.Precision.HIGHEST) + params['b_out']
    return out.reshape(b, n, dim)


# ---------------------------------------------------------------------------
if __name__ == "__main__":
    dim = 32
    heads = 2
    dim_head = 32
    block_size = 16
    max_seq_len = 128
    batch = 2
    seq = 100                       # padded to 128 inside the forward pass

    key = jax.random.PRNGKey(0)
    kx, kp = jax.random.split(key)
    x = jax.random.normal(kx, (batch, seq, dim), jnp.float32)
    params = init_params(kp, dim, heads, dim_head)
    pparams = prepare_pallas_params(params)
    hier_mask = build_hier_mask(max_seq_len, block_size)

    fwd = jax.jit(partial(h_attention_1d_pallas, heads=heads, dim_head=dim_head,
                          block_size=block_size))
    out = jax.block_until_ready(fwd(x, pparams))
    assert out.shape == (batch, seq, dim)

    ref_fn = jax.jit(partial(reference_forward, heads=heads, dim_head=dim_head,
                             block_size=block_size))
    ref = jax.block_until_ready(ref_fn(x, params, hier_mask))

    max_err = float(jnp.max(jnp.abs(out - ref)))
    # bf16 MXU operands + approx reciprocal vs an f32 reference -> loose-ish bound.
    assert max_err < 2e-2, f"mismatch vs pure-JAX reference: {max_err}"

    print("KERNEL_OK")
</pallas_src>

<mosaic_0001>
module attributes {stable_mosaic.version = 11 : i64} {
  func.func @_fused_hattn_kernel(%arg0: i32, %arg1: memref<1x128x32xbf16, #tpu.memory_space<vmem>>, %arg2: memref<32x192xbf16, #tpu.memory_space<vmem>>, %arg3: memref<64x32xbf16, #tpu.memory_space<vmem>>, %arg4: memref<1x32xf32, #tpu.memory_space<vmem>>, %arg5: memref<1x128x32xf32, #tpu.memory_space<vmem>>, %arg6: memref<128x192xf32, #tpu.memory_space<vmem>>) attributes {dimension_semantics = [#tpu.dimension_semantics<parallel>], iteration_bounds = array<i64: 2>, scalar_prefetch = 0 : i64, scratch_operands = 1 : i64, tpu.core_type = #tpu.core_type<tc>, window_params = [{transform_indices = @transform_0, window_bounds = array<i64: 1, 128, 32>}, {pipeline_mode = #tpu.pipeline_mode<synchronous>, transform_indices = @transform_1, window_bounds = array<i64: 32, 192>}, {pipeline_mode = #tpu.pipeline_mode<synchronous>, transform_indices = @transform_2, window_bounds = array<i64: 64, 32>}, {pipeline_mode = #tpu.pipeline_mode<synchronous>, transform_indices = @transform_3, window_bounds = array<i64: 1, 32>}, {transform_indices = @transform_4, window_bounds = array<i64: 1, 128, 32>}]} {
    %c0 = arith.constant 0 : index
    %c0_0 = arith.constant 0 : index
    %c0_1 = arith.constant 0 : index
    %0 = vector.load %arg1[%c0, %c0_0, %c0_1] : memref<1x128x32xbf16, #tpu.memory_space<vmem>>, vector<1x128x32xbf16>
    %1 = vector.shape_cast %0 : vector<1x128x32xbf16> to vector<128x32xbf16>
    %c0_2 = arith.constant 0 : index
    %c0_3 = arith.constant 0 : index
    %2 = vector.load %arg2[%c0_2, %c0_3] : memref<32x192xbf16, #tpu.memory_space<vmem>>, vector<32x192xbf16>
    %cst = arith.constant dense<0.000000e+00> : vector<128x192xf32>
    %3 = tpu.matmul %1, %2, %cst {dimension_numbers = #tpu.dot_dimension_numbers<[1], [0], [0], [1], [0, 0, 1, 1], [], []>} : vector<128x32xbf16>, vector<32x192xbf16>, vector<128x192xf32> -> vector<128x192xf32>
    %c0_4 = arith.constant 0 : index
    %c0_5 = arith.constant 0 : index
    %4 = vector.load %arg6[%c0_4, %c0_5] : memref<128x192xf32, #tpu.memory_space<vmem>>, vector<128x192xf32>
    tpu.vector_store %arg6[%c0_4, %c0_5], %3 {strides = array<i32>} : memref<128x192xf32, #tpu.memory_space<vmem>>, vector<128x192xf32>,
    %5 = tpu.iota {dimensions = array<i32: 0>} : vector<128x128xi32>
    %6 = tpu.iota {dimensions = array<i32: 1>} : vector<128x128xi32>
    %c4_i32 = arith.constant 4 : i32
    %7 = vector.broadcast %c4_i32 : i32 to vector<128x128xi32>
    %8 = arith.shrsi %5, %7 : vector<128x128xi32>
    %c4_i32_6 = arith.constant 4 : i32
    %9 = vector.broadcast %c4_i32_6 : i32 to vector<128x128xi32>
    %10 = arith.shrsi %6, %9 : vector<128x128xi32>
    %11 = arith.cmpi eq, %8, %10 : vector<128x128xi32>
    %12 = arith.cmpi sle, %6, %5 : vector<128x128xi32>
    %13 = arith.andi %11, %12 : vector<128x128xi1>
    %14 = tpu.iota {dimensions = array<i32: 0>} : vector<64x128xi32>
    %15 = tpu.iota {dimensions = array<i32: 1>} : vector<64x128xi32>
    %c1_i32 = arith.constant 1 : i32
    %16 = vector.broadcast %c1_i32 : i32 to vector<64x128xi32>
    %17 = arith.shrsi %15, %16 : vector<64x128xi32>
    %18 = arith.cmpi eq, %17, %14 : vector<64x128xi32>
    %cst_7 = arith.constant 5.000000e-01 : f32
    %cst_8 = arith.constant 0.000000e+00 : f32
    %19 = vector.broadcast %cst_7 : f32 to vector<64x128xf32>
    %20 = vector.broadcast %cst_8 : f32 to vector<64x128xf32>
    %21 = arith.select %18, %19, %20 : vector<64x128xi1>, vector<64x128xf32>
    %22 = arith.extui %18 : vector<64x128xi1> to vector<64x128xi32>
    %23 = arith.sitofp %22 : vector<64x128xi32> to vector<64x128xf32>
    %24 = tpu.iota {dimensions = array<i32: 0>} : vector<64x64xi32>
    %25 = tpu.iota {dimensions = array<i32: 1>} : vector<64x64xi32>
    %c4_i32_9 = arith.constant 4 : i32
    %26 = vector.broadcast %c4_i32_9 : i32 to vector<64x64xi32>
    %27 = arith.shrsi %24, %26 : vector<64x64xi32>
    %c4_i32_10 = arith.constant 4 : i32
    %28 = vector.broadcast %c4_i32_10 : i32 to vector<64x64xi32>
    %29 = arith.shrsi %25, %28 : vector<64x64xi32>
    %c1_i32_11 = arith.constant 1 : i32
    %30 = vector.broadcast %c1_i32_11 : i32 to vector<64x64xi32>
    %31 = arith.andi %27, %30 : vector<64x64xi32>
    %c1_i32_12 = arith.constant 1 : i32
    %32 = vector.broadcast %c1_i32_12 : i32 to vector<64x64xi32>
    %33 = arith.cmpi eq, %31, %32 : vector<64x64xi32>
    %c1_i32_13 = arith.constant 1 : i32
    %34 = vector.broadcast %c1_i32_13 : i32 to vector<64x64xi32>
    %35 = arith.subi %27, %34 : vector<64x64xi32>
    %36 = arith.cmpi eq, %29, %35 : vector<64x64xi32>
    %37 = arith.andi %33, %36 : vector<64x64xi1>
    %38 = tpu.iota {dimensions = array<i32: 0>} : vector<128x64xi32>
    %39 = tpu.iota {dimensions = array<i32: 1>} : vector<128x64xi32>
    %c1_i32_14 = arith.constant 1 : i32
    %40 = vector.broadcast %c1_i32_14 : i32 to vector<128x64xi32>
    %41 = arith.andi %38, %40 : vector<128x64xi32>
    %c1_i32_15 = arith.constant 1 : i32
    %42 = vector.broadcast %c1_i32_15 : i32 to vector<128x64xi32>
    %43 = arith.cmpi eq, %41, %42 : vector<128x64xi32>
    %c1_i32_16 = arith.constant 1 : i32
    %44 = vector.broadcast %c1_i32_16 : i32 to vector<128x64xi32>
    %45 = arith.shrsi %38, %44 : vector<128x64xi32>
    %46 = arith.cmpi eq, %45, %39 : vector<128x64xi32>
    %47 = arith.andi %46, %43 : vector<128x64xi1>
    %48 = arith.extui %47 : vector<128x64xi1> to vector<128x64xi32>
    %49 = arith.sitofp %48 : vector<128x64xi32> to vector<128x64xf32>
    %cst_17 = arith.constant 1.000000e+00 : f32
    %50 = vector.broadcast %cst_17 : f32 to vector<1x64xf32>
    %51 = tpu.iota {dimensions = array<i32: 0>} : vector<32x64xi32>
    %52 = tpu.iota {dimensions = array<i32: 1>} : vector<32x64xi32>
    %c1_i32_18 = arith.constant 1 : i32
    %53 = vector.broadcast %c1_i32_18 : i32 to vector<32x64xi32>
    %54 = arith.shrsi %52, %53 : vector<32x64xi32>
    %55 = arith.cmpi eq, %54, %51 : vector<32x64xi32>
    %cst_19 = arith.constant 5.000000e-01 : f32
    %cst_20 = arith.constant 0.000000e+00 : f32
    %56 = vector.broadcast %cst_19 : f32 to vector<32x64xf32>
    %57 = vector.broadcast %cst_20 : f32 to vector<32x64xf32>
    %58 = arith.select %55, %56, %57 : vector<32x64xi1>, vector<32x64xf32>
    %59 = arith.extui %55 : vector<32x64xi1> to vector<32x64xi32>
    %60 = arith.sitofp %59 : vector<32x64xi32> to vector<32x64xf32>
    %61 = tpu.iota {dimensions = array<i32: 0>} : vector<32x32xi32>
    %62 = tpu.iota {dimensions = array<i32: 1>} : vector<32x32xi32>
    %c4_i32_21 = arith.constant 4 : i32
    %63 = vector.broadcast %c4_i32_21 : i32 to vector<32x32xi32>
    %64 = arith.shrsi %61, %63 : vector<32x32xi32>
    %c4_i32_22 = arith.constant 4 : i32
    %65 = vector.broadcast %c4_i32_22 : i32 to vector<32x32xi32>
    %66 = arith.shrsi %62, %65 : vector<32x32xi32>
    %c1_i32_23 = arith.constant 1 : i32
    %67 = vector.broadcast %c1_i32_23 : i32 to vector<32x32xi32>
    %68 = arith.andi %64, %67 : vector<32x32xi32>
    %c1_i32_24 = arith.constant 1 : i32
    %69 = vector.broadcast %c1_i32_24 : i32 to vector<32x32xi32>
    %70 = arith.cmpi eq, %68, %69 : vector<32x32xi32>
    %c1_i32_25 = arith.constant 1 : i32
    %71 = vector.broadcast %c1_i32_25 : i32 to vector<32x32xi32>
    %72 = arith.subi %64, %71 : vector<32x32xi32>
    %73 = arith.cmpi eq, %66, %72 : vector<32x32xi32>
    %74 = arith.andi %70, %73 : vector<32x32xi1>
    %75 = tpu.iota {dimensions = array<i32: 0>} : vector<128x32xi32>
    %76 = tpu.iota {dimensions = array<i32: 1>} : vector<128x32xi32>
    %c3_i32 = arith.constant 3 : i32
    %77 = vector.broadcast %c3_i32 : i32 to vector<128x32xi32>
    %78 = arith.andi %75, %77 : vector<128x32xi32>
    %c3_i32_26 = arith.constant 3 : i32
    %79 = vector.broadcast %c3_i32_26 : i32 to vector<128x32xi32>
    %80 = arith.cmpi eq, %78, %79 : vector<128x32xi32>
    %c2_i32 = arith.constant 2 : i32
    %81 = vector.broadcast %c2_i32 : i32 to vector<128x32xi32>
    %82 = arith.shrsi %75, %81 : vector<128x32xi32>
    %83 = arith.cmpi eq, %82, %76 : vector<128x32xi32>
    %84 = arith.andi %83, %80 : vector<128x32xi1>
    %85 = arith.extui %84 : vector<128x32xi1> to vector<128x32xi32>
    %86 = arith.sitofp %85 : vector<128x32xi32> to vector<128x32xf32>
    %cst_27 = arith.constant 1.000000e+00 : f32
    %87 = vector.broadcast %cst_27 : f32 to vector<1x32xf32>
    %cst_28 = arith.constant 0.000000e+00 : f32
    %88 = vector.broadcast %cst_28 : f32 to vector<128x32xf32>
    %c0_29 = arith.constant 0 : index
    %c0_30 = arith.constant 0 : index
    %89 = vector.load %arg6[%c0_29, %c0_30] : memref<128x192xf32, #tpu.memory_space<vmem>>, vector<128x32xf32>
    %c0_31 = arith.constant 0 : index
    %c64 = arith.constant 64 : index
    %90 = vector.load %arg6[%c0_31, %c64] : memref<128x192xf32, #tpu.memory_space<vmem>>, vector<128x32xf32>
    %c0_32 = arith.constant 0 : index
    %c128 = arith.constant 128 : index
    %91 = vector.load %arg6[%c0_32, %c128] : memref<128x192xf32, #tpu.memory_space<vmem>>, vector<128x32xf32>
    %92 = arith.truncf %89 : vector<128x32xf32> to vector<128x32xbf16>
    %93 = arith.truncf %90 : vector<128x32xf32> to vector<128x32xbf16>
    %cst_33 = arith.constant dense<0.000000e+00> : vector<128x128xf32>
    %94 = tpu.matmul %92, %93, %cst_33 {dimension_numbers = #tpu.dot_dimension_numbers<[1], [1], [0], [0], [0, 0, 1, 0], [], []>} : vector<128x32xbf16>, vector<128x32xbf16>, vector<128x128xf32> -> vector<128x128xf32>
    %cst_34 = arith.constant -3.40282347E+38 : f32
    %95 = vector.broadcast %cst_34 : f32 to vector<128x128xf32>
    %96 = arith.select %13, %94, %95 : vector<128x128xi1>, vector<128x128xf32>
    %cst_35 = arith.constant dense<0xFF800000> : vector<128xf32>
    %97 = vector.multi_reduction <maximumf>, %96, %cst_35 [1] : vector<128x128xf32> to vector<128xf32>
    %98 = vector.shape_cast %97 : vector<128xf32> to vector<128x1xf32>
    %99 = vector.broadcast %98 : vector<128x1xf32> to vector<128x128xf32>
    %100 = arith.subf %96, %99 : vector<128x128xf32>
    %101 = math.exp %100 : vector<128x128xf32>
    %cst_36 = arith.constant 0.000000e+00 : f32
    %102 = vector.broadcast %cst_36 : f32 to vector<128x128xf32>
    %103 = arith.select %13, %101, %102 : vector<128x128xi1>, vector<128x128xf32>
    %104 = arith.truncf %103 : vector<128x128xf32> to vector<128x128xbf16>
    %105 = arith.truncf %91 : vector<128x32xf32> to vector<128x32xbf16>
    %cst_37 = arith.constant dense<0.000000e+00> : vector<128x32xf32>
    %106 = tpu.matmul %104, %105, %cst_37 {dimension_numbers = #tpu.dot_dimension_numbers<[1], [0], [0], [1], [0, 0, 1, 1], [], []>} : vector<128x128xbf16>, vector<128x32xbf16>, vector<128x32xf32> -> vector<128x32xf32>
    %cst_38 = arith.constant dense<0.000000e+00> : vector<128xf32>
    %107 = vector.multi_reduction <add>, %103, %cst_38 [1] : vector<128x128xf32> to vector<128xf32>
    %108 = vector.shape_cast %107 : vector<128xf32> to vector<128x1xf32>
    %cst_39 = arith.constant dense<0.000000e+00> : vector<64x32xf32>
    %109 = tpu.matmul %21, %89, %cst_39 {dimension_numbers = #tpu.dot_dimension_numbers<[1], [0], [0], [1], [0, 0, 1, 1], [], []>} : vector<64x128xf32>, vector<128x32xf32>, vector<64x32xf32> -> vector<64x32xf32>
    %cst_40 = arith.constant dense<0.000000e+00> : vector<64x32xf32>
    %110 = tpu.matmul %21, %90, %cst_40 {dimension_numbers = #tpu.dot_dimension_numbers<[1], [0], [0], [1], [0, 0, 1, 1], [], []>} : vector<64x128xf32>, vector<128x32xf32>, vector<64x32xf32> -> vector<64x32xf32>
    %cst_41 = arith.constant dense<0.000000e+00> : vector<64x32xf32>
    %111 = tpu.matmul %23, %91, %cst_41 {dimension_numbers = #tpu.dot_dimension_numbers<[1], [0], [0], [1], [0, 0, 1, 1], [], []>} : vector<64x128xf32>, vector<128x32xf32>, vector<64x32xf32> -> vector<64x32xf32>
    %112 = arith.truncf %109 : vector<64x32xf32> to vector<64x32xbf16>
    %113 = arith.truncf %110 : vector<64x32xf32> to vector<64x32xbf16>
    %cst_42 = arith.constant dense<0.000000e+00> : vector<64x64xf32>
    %114 = tpu.matmul %112, %113, %cst_42 {dimension_numbers = #tpu.dot_dimension_numbers<[1], [1], [0], [0], [0, 0, 1, 0], [], []>} : vector<64x32xbf16>, vector<64x32xbf16>, vector<64x64xf32> -> vector<64x64xf32>
    %cst_43 = arith.constant -3.40282347E+38 : f32
    %115 = vector.broadcast %cst_43 : f32 to vector<64x64xf32>
    %116 = arith.select %37, %114, %115 : vector<64x64xi1>, vector<64x64xf32>
    %cst_44 = arith.constant dense<0xFF800000> : vector<64xf32>
    %117 = vector.multi_reduction <maximumf>, %116, %cst_44 [1] : vector<64x64xf32> to vector<64xf32>
    %118 = vector.shape_cast %117 : vector<64xf32> to vector<64x1xf32>
    %119 = vector.broadcast %118 : vector<64x1xf32> to vector<64x64xf32>
    %120 = arith.subf %116, %119 : vector<64x64xf32>
    %121 = math.exp %120 : vector<64x64xf32>
    %cst_45 = arith.constant 0.000000e+00 : f32
    %122 = vector.broadcast %cst_45 : f32 to vector<64x64xf32>
    %123 = arith.select %37, %121, %122 : vector<64x64xi1>, vector<64x64xf32>
    %124 = arith.truncf %123 : vector<64x64xf32> to vector<64x64xbf16>
    %125 = arith.truncf %111 : vector<64x32xf32> to vector<64x32xbf16>
    %cst_46 = arith.constant dense<0.000000e+00> : vector<64x32xf32>
    %126 = tpu.matmul %124, %125, %cst_46 {dimension_numbers = #tpu.dot_dimension_numbers<[1], [0], [0], [1], [0, 0, 1, 1], [], []>} : vector<64x64xbf16>, vector<64x32xbf16>, vector<64x32xf32> -> vector<64x32xf32>
    %cst_47 = arith.constant dense<0.000000e+00> : vector<128x32xf32>
    %127 = tpu.matmul %49, %126, %cst_47 {dimension_numbers = #tpu.dot_dimension_numbers<[1], [0], [0], [1], [0, 0, 1, 1], [], []>} : vector<128x64xf32>, vector<64x32xf32>, vector<128x32xf32> -> vector<128x32xf32>
    %128 = arith.addf %106, %127 : vector<128x32xf32>
    %cst_48 = arith.constant dense<0.000000e+00> : vector<1x64xf32>
    %129 = tpu.matmul %50, %123, %cst_48 {dimension_numbers = #tpu.dot_dimension_numbers<[1], [1], [0], [0], [0, 0, 1, 0], [], []>} : vector<1x64xf32>, vector<64x64xf32>, vector<1x64xf32> -> vector<1x64xf32>
    %130 = vector.broadcast %129 : vector<1x64xf32> to vector<128x64xf32>
    %131 = arith.mulf %49, %130 : vector<128x64xf32>
    %cst_49 = arith.constant dense<0.000000e+00> : vector<128xf32>
    %132 = vector.multi_reduction <add>, %131, %cst_49 [1] : vector<128x64xf32> to vector<128xf32>
    %133 = vector.shape_cast %132 : vector<128xf32> to vector<128x1xf32>
    %134 = arith.addf %108, %133 : vector<128x1xf32>
    %cst_50 = arith.constant dense<0.000000e+00> : vector<32x32xf32>
    %135 = tpu.matmul %58, %109, %cst_50 {dimension_numbers = #tpu.dot_dimension_numbers<[1], [0], [0], [1], [0, 0, 1, 1], [], []>} : vector<32x64xf32>, vector<64x32xf32>, vector<32x32xf32> -> vector<32x32xf32>
    %cst_51 = arith.constant dense<0.000000e+00> : vector<32x32xf32>
    %136 = tpu.matmul %58, %110, %cst_51 {dimension_numbers = #tpu.dot_dimension_numbers<[1], [0], [0], [1], [0, 0, 1, 1], [], []>} : vector<32x64xf32>, vector<64x32xf32>, vector<32x32xf32> -> vector<32x32xf32>
    %cst_52 = arith.constant dense<0.000000e+00> : vector<32x32xf32>
    %137 = tpu.matmul %60, %111, %cst_52 {dimension_numbers = #tpu.dot_dimension_numbers<[1], [0], [0], [1], [0, 0, 1, 1], [], []>} : vector<32x64xf32>, vector<64x32xf32>, vector<32x32xf32> -> vector<32x32xf32>
    %138 = arith.truncf %135 : vector<32x32xf32> to vector<32x32xbf16>
    %139 = arith.truncf %136 : vector<32x32xf32> to vector<32x32xbf16>
    %cst_53 = arith.constant dense<0.000000e+00> : vector<32x32xf32>
    %140 = tpu.matmul %138, %139, %cst_53 {dimension_numbers = #tpu.dot_dimension_numbers<[1], [1], [0], [0], [0, 0, 1, 0], [], []>} : vector<32x32xbf16>, vector<32x32xbf16>, vector<32x32xf32> -> vector<32x32xf32>
    %cst_54 = arith.constant -3.40282347E+38 : f32
    %141 = vector.broadcast %cst_54 : f32 to vector<32x32xf32>
    %142 = arith.select %74, %140, %141 : vector<32x32xi1>, vector<32x32xf32>
    %cst_55 = arith.constant dense<0xFF800000> : vector<32xf32>
    %143 = vector.multi_reduction <maximumf>, %142, %cst_55 [1] : vector<32x32xf32> to vector<32xf32>
    %144 = vector.shape_cast %143 : vector<32xf32> to vector<32x1xf32>
    %145 = vector.broadcast %144 : vector<32x1xf32> to vector<32x32xf32>
    %146 = arith.subf %142, %145 : vector<32x32xf32>
    %147 = math.exp %146 : vector<32x32xf32>
    %cst_56 = arith.constant 0.000000e+00 : f32
    %148 = vector.broadcast %cst_56 : f32 to vector<32x32xf32>
    %149 = arith.select %74, %147, %148 : vector<32x32xi1>, vector<32x32xf32>
    %150 = arith.truncf %149 : vector<32x32xf32> to vector<32x32xbf16>
    %151 = arith.truncf %137 : vector<32x32xf32> to vector<32x32xbf16>
    %cst_57 = arith.constant dense<0.000000e+00> : vector<32x32xf32>
    %152 = tpu.matmul %150, %151, %cst_57 {dimension_numbers = #tpu.dot_dimension_numbers<[1], [0], [0], [1], [0, 0, 1, 1], [], []>} : vector<32x32xbf16>, vector<32x32xbf16>, vector<32x32xf32> -> vector<32x32xf32>
    %cst_58 = arith.constant dense<0.000000e+00> : vector<128x32xf32>
    %153 = tpu.matmul %86, %152, %cst_58 {dimension_numbers = #tpu.dot_dimension_numbers<[1], [0], [0], [1], [0, 0, 1, 1], [], []>} : vector<128x32xf32>, vector<32x32xf32>, vector<128x32xf32> -> vector<128x32xf32>
    %154 = arith.addf %128, %153 : vector<128x32xf32>
    %cst_59 = arith.constant dense<0.000000e+00> : vector<1x32xf32>
    %155 = tpu.matmul %87, %149, %cst_59 {dimension_numbers = #tpu.dot_dimension_numbers<[1], [1], [0], [0], [0, 0, 1, 0], [], []>} : vector<1x32xf32>, vector<32x32xf32>, vector<1x32xf32> -> vector<1x32xf32>
    %156 = vector.broadcast %155 : vector<1x32xf32> to vector<128x32xf32>
    %157 = arith.mulf %86, %156 : vector<128x32xf32>
    %cst_60 = arith.constant dense<0.000000e+00> : vector<128xf32>
    %158 = vector.multi_reduction <add>, %157, %cst_60 [1] : vector<128x32xf32> to vector<128xf32>
    %159 = vector.shape_cast %158 : vector<128xf32> to vector<128x1xf32>
    %160 = arith.addf %134, %159 : vector<128x1xf32>
    %cst_61 = arith.constant 9.99999993E-9 : f32
    %161 = vector.broadcast %cst_61 : f32 to vector<128x1xf32>
    %162 = arith.addf %160, %161 : vector<128x1xf32>
    %163 = tpu.reciprocal %162 {approx = true} : vector<128x1xf32> -> vector<128x1xf32>
    %164 = vector.broadcast %163 : vector<128x1xf32> to vector<128x32xf32>
    %165 = arith.mulf %154, %164 : vector<128x32xf32>
    %166 = arith.truncf %165 : vector<128x32xf32> to vector<128x32xbf16>
    %c0_62 = arith.constant 0 : index
    %c0_63 = arith.constant 0 : index
    %167 = vector.load %arg3[%c0_62, %c0_63] : memref<64x32xbf16, #tpu.memory_space<vmem>>, vector<32x32xbf16>
    %cst_64 = arith.constant dense<0.000000e+00> : vector<128x32xf32>
    %168 = tpu.matmul %166, %167, %cst_64 {dimension_numbers = #tpu.dot_dimension_numbers<[1], [0], [0], [1], [0, 0, 1, 1], [], []>} : vector<128x32xbf16>, vector<32x32xbf16>, vector<128x32xf32> -> vector<128x32xf32>
    %169 = arith.addf %88, %168 : vector<128x32xf32>
    %c0_65 = arith.constant 0 : index
    %c32 = arith.constant 32 : index
    %170 = vector.load %arg6[%c0_65, %c32] : memref<128x192xf32, #tpu.memory_space<vmem>>, vector<128x32xf32>
    %c0_66 = arith.constant 0 : index
    %c96 = arith.constant 96 : index
    %171 = vector.load %arg6[%c0_66, %c96] : memref<128x192xf32, #tpu.memory_space<vmem>>, vector<128x32xf32>
    %c0_67 = arith.constant 0 : index
    %c160 = arith.constant 160 : index
    %172 = vector.load %arg6[%c0_67, %c160] : memref<128x192xf32, #tpu.memory_space<vmem>>, vector<128x32xf32>
    %173 = arith.truncf %170 : vector<128x32xf32> to vector<128x32xbf16>
    %174 = arith.truncf %171 : vector<128x32xf32> to vector<128x32xbf16>
    %cst_68 = arith.constant dense<0.000000e+00> : vector<128x128xf32>
    %175 = tpu.matmul %173, %174, %cst_68 {dimension_numbers = #tpu.dot_dimension_numbers<[1], [1], [0], [0], [0, 0, 1, 0], [], []>} : vector<128x32xbf16>, vector<128x32xbf16>, vector<128x128xf32> -> vector<128x128xf32>
    %cst_69 = arith.constant -3.40282347E+38 : f32
    %176 = vector.broadcast %cst_69 : f32 to vector<128x128xf32>
    %177 = arith.select %13, %175, %176 : vector<128x128xi1>, vector<128x128xf32>
    %cst_70 = arith.constant dense<0xFF800000> : vector<128xf32>
    %178 = vector.multi_reduction <maximumf>, %177, %cst_70 [1] : vector<128x128xf32> to vector<128xf32>
    %179 = vector.shape_cast %178 : vector<128xf32> to vector<128x1xf32>
    %180 = vector.broadcast %179 : vector<128x1xf32> to vector<128x128xf32>
    %181 = arith.subf %177, %180 : vector<128x128xf32>
    %182 = math.exp %181 : vector<128x128xf32>
    %cst_71 = arith.constant 0.000000e+00 : f32
    %183 = vector.broadcast %cst_71 : f32 to vector<128x128xf32>
    %184 = arith.select %13, %182, %183 : vector<128x128xi1>, vector<128x128xf32>
    %185 = arith.truncf %184 : vector<128x128xf32> to vector<128x128xbf16>
    %186 = arith.truncf %172 : vector<128x32xf32> to vector<128x32xbf16>
    %cst_72 = arith.constant dense<0.000000e+00> : vector<128x32xf32>
    %187 = tpu.matmul %185, %186, %cst_72 {dimension_numbers = #tpu.dot_dimension_numbers<[1], [0], [0], [1], [0, 0, 1, 1], [], []>} : vector<128x128xbf16>, vector<128x32xbf16>, vector<128x32xf32> -> vector<128x32xf32>
    %cst_73 = arith.constant dense<0.000000e+00> : vector<128xf32>
    %188 = vector.multi_reduction <add>, %184, %cst_73 [1] : vector<128x128xf32> to vector<128xf32>
    %189 = vector.shape_cast %188 : vector<128xf32> to vector<128x1xf32>
    %cst_74 = arith.constant dense<0.000000e+00> : vector<64x32xf32>
    %190 = tpu.matmul %21, %170, %cst_74 {dimension_numbers = #tpu.dot_dimension_numbers<[1], [0], [0], [1], [0, 0, 1, 1], [], []>} : vector<64x128xf32>, vector<128x32xf32>, vector<64x32xf32> -> vector<64x32xf32>
    %cst_75 = arith.constant dense<0.000000e+00> : vector<64x32xf32>
    %191 = tpu.matmul %21, %171, %cst_75 {dimension_numbers = #tpu.dot_dimension_numbers<[1], [0], [0], [1], [0, 0, 1, 1], [], []>} : vector<64x128xf32>, vector<128x32xf32>, vector<64x32xf32> -> vector<64x32xf32>
    %cst_76 = arith.constant dense<0.000000e+00> : vector<64x32xf32>
    %192 = tpu.matmul %23, %172, %cst_76 {dimension_numbers = #tpu.dot_dimension_numbers<[1], [0], [0], [1], [0, 0, 1, 1], [], []>} : vector<64x128xf32>, vector<128x32xf32>, vector<64x32xf32> -> vector<64x32xf32>
    %193 = arith.truncf %190 : vector<64x32xf32> to vector<64x32xbf16>
    %194 = arith.truncf %191 : vector<64x32xf32> to vector<64x32xbf16>
    %cst_77 = arith.constant dense<0.000000e+00> : vector<64x64xf32>
    %195 = tpu.matmul %193, %194, %cst_77 {dimension_numbers = #tpu.dot_dimension_numbers<[1], [1], [0], [0], [0, 0, 1, 0], [], []>} : vector<64x32xbf16>, vector<64x32xbf16>, vector<64x64xf32> -> vector<64x64xf32>
    %cst_78 = arith.constant -3.40282347E+38 : f32
    %196 = vector.broadcast %cst_78 : f32 to vector<64x64xf32>
    %197 = arith.select %37, %195, %196 : vector<64x64xi1>, vector<64x64xf32>
    %cst_79 = arith.constant dense<0xFF800000> : vector<64xf32>
    %198 = vector.multi_reduction <maximumf>, %197, %cst_79 [1] : vector<64x64xf32> to vector<64xf32>
    %199 = vector.shape_cast %198 : vector<64xf32> to vector<64x1xf32>
    %200 = vector.broadcast %199 : vector<64x1xf32> to vector<64x64xf32>
    %201 = arith.subf %197, %200 : vector<64x64xf32>
    %202 = math.exp %201 : vector<64x64xf32>
    %cst_80 = arith.constant 0.000000e+00 : f32
    %203 = vector.broadcast %cst_80 : f32 to vector<64x64xf32>
    %204 = arith.select %37, %202, %203 : vector<64x64xi1>, vector<64x64xf32>
    %205 = arith.truncf %204 : vector<64x64xf32> to vector<64x64xbf16>
    %206 = arith.truncf %192 : vector<64x32xf32> to vector<64x32xbf16>
    %cst_81 = arith.constant dense<0.000000e+00> : vector<64x32xf32>
    %207 = tpu.matmul %205, %206, %cst_81 {dimension_numbers = #tpu.dot_dimension_numbers<[1], [0], [0], [1], [0, 0, 1, 1], [], []>} : vector<64x64xbf16>, vector<64x32xbf16>, vector<64x32xf32> -> vector<64x32xf32>
    %cst_82 = arith.constant dense<0.000000e+00> : vector<128x32xf32>
    %208 = tpu.matmul %49, %207, %cst_82 {dimension_numbers = #tpu.dot_dimension_numbers<[1], [0], [0], [1], [0, 0, 1, 1], [], []>} : vector<128x64xf32>, vector<64x32xf32>, vector<128x32xf32> -> vector<128x32xf32>
    %209 = arith.addf %187, %208 : vector<128x32xf32>
    %cst_83 = arith.constant dense<0.000000e+00> : vector<1x64xf32>
    %210 = tpu.matmul %50, %204, %cst_83 {dimension_numbers = #tpu.dot_dimension_numbers<[1], [1], [0], [0], [0, 0, 1, 0], [], []>} : vector<1x64xf32>, vector<64x64xf32>, vector<1x64xf32> -> vector<1x64xf32>
    %211 = vector.broadcast %210 : vector<1x64xf32> to vector<128x64xf32>
    %212 = arith.mulf %49, %211 : vector<128x64xf32>
    %cst_84 = arith.constant dense<0.000000e+00> : vector<128xf32>
    %213 = vector.multi_reduction <add>, %212, %cst_84 [1] : vector<128x64xf32> to vector<128xf32>
    %214 = vector.shape_cast %213 : vector<128xf32> to vector<128x1xf32>
    %215 = arith.addf %189, %214 : vector<128x1xf32>
    %cst_85 = arith.constant dense<0.000000e+00> : vector<32x32xf32>
    %216 = tpu.matmul %58, %190, %cst_85 {dimension_numbers = #tpu.dot_dimension_numbers<[1], [0], [0], [1], [0, 0, 1, 1], [], []>} : vector<32x64xf32>, vector<64x32xf32>, vector<32x32xf32> -> vector<32x32xf32>
    %cst_86 = arith.constant dense<0.000000e+00> : vector<32x32xf32>
    %217 = tpu.matmul %58, %191, %cst_86 {dimension_numbers = #tpu.dot_dimension_numbers<[1], [0], [0], [1], [0, 0, 1, 1], [], []>} : vector<32x64xf32>, vector<64x32xf32>, vector<32x32xf32> -> vector<32x32xf32>
    %cst_87 = arith.constant dense<0.000000e+00> : vector<32x32xf32>
    %218 = tpu.matmul %60, %192, %cst_87 {dimension_numbers = #tpu.dot_dimension_numbers<[1], [0], [0], [1], [0, 0, 1, 1], [], []>} : vector<32x64xf32>, vector<64x32xf32>, vector<32x32xf32> -> vector<32x32xf32>
    %219 = arith.truncf %216 : vector<32x32xf32> to vector<32x32xbf16>
    %220 = arith.truncf %217 : vector<32x32xf32> to vector<32x32xbf16>
    %cst_88 = arith.constant dense<0.000000e+00> : vector<32x32xf32>
    %221 = tpu.matmul %219, %220, %cst_88 {dimension_numbers = #tpu.dot_dimension_numbers<[1], [1], [0], [0], [0, 0, 1, 0], [], []>} : vector<32x32xbf16>, vector<32x32xbf16>, vector<32x32xf32> -> vector<32x32xf32>
    %cst_89 = arith.constant -3.40282347E+38 : f32
    %222 = vector.broadcast %cst_89 : f32 to vector<32x32xf32>
    %223 = arith.select %74, %221, %222 : vector<32x32xi1>, vector<32x32xf32>
    %cst_90 = arith.constant dense<0xFF800000> : vector<32xf32>
    %224 = vector.multi_reduction <maximumf>, %223, %cst_90 [1] : vector<32x32xf32> to vector<32xf32>
    %225 = vector.shape_cast %224 : vector<32xf32> to vector<32x1xf32>
    %226 = vector.broadcast %225 : vector<32x1xf32> to vector<32x32xf32>
    %227 = arith.subf %223, %226 : vector<32x32xf32>
    %228 = math.exp %227 : vector<32x32xf32>
    %cst_91 = arith.constant 0.000000e+00 : f32
    %229 = vector.broadcast %cst_91 : f32 to vector<32x32xf32>
    %230 = arith.select %74, %228, %229 : vector<32x32xi1>, vector<32x32xf32>
    %231 = arith.truncf %230 : vector<32x32xf32> to vector<32x32xbf16>
    %232 = arith.truncf %218 : vector<32x32xf32> to vector<32x32xbf16>
    %cst_92 = arith.constant dense<0.000000e+00> : vector<32x32xf32>
    %233 = tpu.matmul %231, %232, %cst_92 {dimension_numbers = #tpu.dot_dimension_numbers<[1], [0], [0], [1], [0, 0, 1, 1], [], []>} : vector<32x32xbf16>, vector<32x32xbf16>, vector<32x32xf32> -> vector<32x32xf32>
    %cst_93 = arith.constant dense<0.000000e+00> : vector<128x32xf32>
    %234 = tpu.matmul %86, %233, %cst_93 {dimension_numbers = #tpu.dot_dimension_numbers<[1], [0], [0], [1], [0, 0, 1, 1], [], []>} : vector<128x32xf32>, vector<32x32xf32>, vector<128x32xf32> -> vector<128x32xf32>
    %235 = arith.addf %209, %234 : vector<128x32xf32>
    %cst_94 = arith.constant dense<0.000000e+00> : vector<1x32xf32>
    %236 = tpu.matmul %87, %230, %cst_94 {dimension_numbers = #tpu.dot_dimension_numbers<[1], [1], [0], [0], [0, 0, 1, 0], [], []>} : vector<1x32xf32>, vector<32x32xf32>, vector<1x32xf32> -> vector<1x32xf32>
    %237 = vector.broadcast %236 : vector<1x32xf32> to vector<128x32xf32>
    %238 = arith.mulf %86, %237 : vector<128x32xf32>
    %cst_95 = arith.constant dense<0.000000e+00> : vector<128xf32>
    %239 = vector.multi_reduction <add>, %238, %cst_95 [1] : vector<128x32xf32> to vector<128xf32>
    %240 = vector.shape_cast %239 : vector<128xf32> to vector<128x1xf32>
    %241 = arith.addf %215, %240 : vector<128x1xf32>
    %cst_96 = arith.constant 9.99999993E-9 : f32
    %242 = vector.broadcast %cst_96 : f32 to vector<128x1xf32>
    %243 = arith.addf %241, %242 : vector<128x1xf32>
    %244 = tpu.reciprocal %243 {approx = true} : vector<128x1xf32> -> vector<128x1xf32>
    %245 = vector.broadcast %244 : vector<128x1xf32> to vector<128x32xf32>
    %246 = arith.mulf %235, %245 : vector<128x32xf32>
    %247 = arith.truncf %246 : vector<128x32xf32> to vector<128x32xbf16>
    %c32_97 = arith.constant 32 : index
    %c0_98 = arith.constant 0 : index
    %248 = vector.load %arg3[%c32_97, %c0_98] : memref<64x32xbf16, #tpu.memory_space<vmem>>, vector<32x32xbf16>
    %cst_99 = arith.constant dense<0.000000e+00> : vector<128x32xf32>
    %249 = tpu.matmul %247, %248, %cst_99 {dimension_numbers = #tpu.dot_dimension_numbers<[1], [0], [0], [1], [0, 0, 1, 1], [], []>} : vector<128x32xbf16>, vector<32x32xbf16>, vector<128x32xf32> -> vector<128x32xf32>
    %250 = arith.addf %169, %249 : vector<128x32xf32>
    %c0_100 = arith.constant 0 : index
    %c0_101 = arith.constant 0 : index
    %251 = vector.load %arg4[%c0_100, %c0_101] : memref<1x32xf32, #tpu.memory_space<vmem>>, vector<1x32xf32>
    %252 = vector.broadcast %251 : vector<1x32xf32> to vector<128x32xf32>
    %253 = arith.addf %250, %252 : vector<128x32xf32>
    %c0_102 = arith.constant 0 : index
    %c0_103 = arith.constant 0 : index
    %c0_104 = arith.constant 0 : index
    %254 = vector.load %arg5[%c0_102, %c0_103, %c0_104] : memref<1x128x32xf32, #tpu.memory_space<vmem>>, vector<1x128x32xf32>
    %255 = vector.shape_cast %254 : vector<1x128x32xf32> to vector<128x32xf32>
    %256 = vector.shape_cast %253 : vector<128x32xf32> to vector<1x128x32xf32>
    tpu.vector_store %arg5[%c0_102, %c0_103, %c0_104], %256 {strides = array<i32>} : memref<1x128x32xf32, #tpu.memory_space<vmem>>, vector<1x128x32xf32>,
    return
  }
  func.func @transform_0(%arg0: i32) -> (i32, i32, i32) {
    %c0_i32 = arith.constant 0 : i32
    %c0_i32_0 = arith.constant 0 : i32
    %c0_i32_1 = arith.constant 0 : i32
    return %arg0, %c0_i32, %c0_i32_0 : i32, i32, i32
  }
  func.func @transform_1(%arg0: i32) -> (i32, i32) {
    %c0_i32 = arith.constant 0 : i32
    %c0_i32_0 = arith.constant 0 : i32
    %c0_i32_1 = arith.constant 0 : i32
    return %c0_i32, %c0_i32_0 : i32, i32
  }
  func.func @transform_2(%arg0: i32) -> (i32, i32) {
    %c0_i32 = arith.constant 0 : i32
    %c0_i32_0 = arith.constant 0 : i32
    %c0_i32_1 = arith.constant 0 : i32
    return %c0_i32, %c0_i32_0 : i32, i32
  }
  func.func @transform_3(%arg0: i32) -> (i32, i32) {
    %c0_i32 = arith.constant 0 : i32
    %c0_i32_0 = arith.constant 0 : i32
    %c0_i32_1 = arith.constant 0 : i32
    return %c0_i32, %c0_i32_0 : i32, i32
  }
  func.func @transform_4(%arg0: i32) -> (i32, i32, i32) {
    %c0_i32 = arith.constant 0 : i32
    %c0_i32_0 = arith.constant 0 : i32
    %c0_i32_1 = arith.constant 0 : i32
    return %arg0, %c0_i32, %c0_i32_0 : i32, i32, i32
  }
}

</mosaic_0001>

<bundles_post_ra>
// kernel: h_attention_1d_pallas.1
= control target key start
LH: loop header
LB: loop body
LE: loop exit
PB: predicated region body
PF: predicated region fallthrough
CT: control target
= control target key end

     0   :  { %s8355_s15 = smov 0   ;;  %s11655_s0 = inlined_call_operand.vmem [shape: bf16[2,128,32], index: 0, kind: input, shape index: {}]   ;;  %s11656_s1 = inlined_call_operand.vmem [shape: bf16[32,192], index: 1, kind: input, shape index: {}]   ;;  %s11657_s2 = inlined_call_operand.vmem [shape: bf16[64,32], index: 2, kind: input, shape index: {}]   ;;  %s11658_s3 = inlined_call_operand.vmem [shape: f32[1,32], index: 3, kind: input, shape index: {}]   ;;  %s11659_s4 = inlined_call_operand.vmem [shape: f32[2,128,32], index: 4, kind: output, shape index: {}]  }
   0x1 LB: > { %s5828_s16 = sadd.s32 4294967295, %s8319_s15   ;;  %p5832_p0 = scmp.ge.s32.totalorder %s8319_s15, 1  ;;  %s8319_s15 = sphi %s8355_s15, %s14_s15  }
   0x2   : > { %p162_p1 = scmp.lt.s32.totalorder %s8319_s15, 3 }
   0x4   : > { %p163_p2 = pnand %p5832_p0, %p162_p1 }
   0x6   : > { %166 = sbr.rel (%p163_p2) target bundleno = 4281 (0x10b9), region = 36 }
   0xd   : > { %v8119_v0 = vld [vmem:[%s11656_s1 + $0x4] ss:$8 sps:$4 sm:$0xff]   ;;  %p188_p3 = scmp.lt.s32.totalorder %s5828_s16, 1  ;;  %v8121_v1 = vld [vmem:[%s11656_s1] ss:$8 sps:$4 sm:$0xff]   ;;  %v8321_v2 = vmov 0   ;;  %v450_v13 = vlaneseq }
   0xe   : > { %336 = vmatprep.mubr.bf16.mxu0 %v8321_v2  ;;  %304 = vmatprep.subr.bf16.mxu0 %v8119_v0  ;;  %v8122_v3 = vld [vmem:[%s11656_s1 + $0x14] ss:$8 sps:$4 sm:$0xff]   ;;  %v8124_v4 = vld [vmem:[%s11656_s1 + $0x10] ss:$8 sps:$4 sm:$0xff]   ;;  %vm11704_vm0 = vcmask 261120   ;;  %v12080_v17 = vmov 0 }
   0xf   : > { %s13049_s16 = smov (!%p188_p3, %s5828_s16), 1  ;;  %305 = vmatpush1.bf16.msra.mxu0 %v8121_v1  ;;  %v8389_v14 = vand.u32 127, %v450_v13  ;;  %v8391_v15 = vshrl.u32 %v450_v13, 7  ;;  %v11661_v18 = vmov 0.5   ;;  %vm11706_vm2 = vcmask 523264   ;;  %s8323_s29 = smov 64  }
  0x10   : > { %306 = vmatprep.subr.bf16.mxu0 %v8122_v3  ;;  %s6180_s25 = sshll.u32 %s13049_s16, 6  ;;  %s8328_s30 = smov 96  }
  0x11   : > { %s192_s28 = scalar_lea.vmem %s11655_s0, %s6180_s25  ;;  %12078 = vst [vmem:[#allocation3_spill] sm:$0xff] %v8389_v14  ;;  %12079 = vst [vmem:[#allocation4_spill] sm:$0xff] %v8391_v15  ;;  %v8394_v16 = vshra.s32 %v8389_v14, 1  ;;  %s8329_s5 = smov 32  }
  0x12   : > { %v8125_v5 = vld [vmem:[%s192_s28] sm:$0xff]   ;;  %v8126_v6 = vld [vmem:[%s192_s28 + $0x8] sm:$0xff]   ;;  %v8127_v7 = vld [vmem:[%s192_s28 + $0x10] sm:$0xff]   ;;  %s6181_s14 = sshll.u32 %s13049_s16, 7 }
  0x13   : > { %307 = vmatpush1.bf16.msra.mxu0 %v8124_v4  ;;  %v8128_v8 = vld [vmem:[%s192_s28 + $0x18] sm:$0xff]   ;;  %v8129_v9 = vld [vmem:[%s192_s28 + $0x20] sm:$0xff]   ;;  %v8130_v10 = vld [vmem:[%s192_s28 + $0x28] sm:$0xff]   ;;  %vm8398_vm1 = vcmp.eq.s32.totalorder %v8394_v16, %v8391_v15  ;;  %s11618_s21 = scalar_lea.vmem %s11659_s4, %s6181_s14 }
  0x14   : > { %v8131_v11 = vld [vmem:[%s192_s28 + $0x30] sm:$0xff]   ;;  %v8132_v12 = vld [vmem:[%s192_s28 + $0x38] sm:$0xff]   ;;  %v12081_v17 = vsel %vm8398_vm1, 4294967295, %v12080_v17 }
  0x15   : > { %12082 = vst [vmem:[#allocation5_spill] sm:$0xff] %v12081_v17 }
  0x16   : > { %5849 = vmatmul.mubr.msk.bf16.vlgmr.msra.gmra.mrb[0].mxu0 %vm11704_vm0, %v8125_v5 }
  0x17   : > { %346 = vmatprep.mubr.bf16.mxu0 %v8321_v2 }
  0x1e   : > { %5850 = vmatmul.mubr.msk.bf16.gmra.mrb[4].mxu0 %vm11704_vm0, %v8126_v6 }
  0x1f   : > { %356 = vmatprep.mubr.bf16.mxu0 %v8321_v2 }
  0x26   : > { %5851 = vmatmul.mubr.msk.bf16.gmra.mrb[8].mxu0 %vm11704_vm0, %v8127_v7 }
  0x27   : > { %366 = vmatprep.mubr.bf16.mxu0 %v8321_v2 }
  0x2e   : > { %5852 = vmatmul.mubr.msk.bf16.gmra.mrb[12].mxu0 %vm11704_vm0, %v8128_v8 }
  0x2f   : > { %376 = vmatprep.mubr.bf16.mxu0 %v8321_v2 }
  0x36   : > { %5853 = vmatmul.mubr.msk.bf16.gmra.mrb[16].mxu0 %vm11704_vm0, %v8129_v9 }
  0x37   : > { %386 = vmatprep.mubr.bf16.mxu0 %v8321_v2 }
  0x3e   : > { %5854 = vmatmul.mubr.msk.bf16.gmra.mrb[20].mxu0 %vm11704_vm0, %v8130_v10 }
  0x3f   : > { %396 = vmatprep.mubr.bf16.mxu0 %v8321_v2 }
  0x46   : > { %5855 = vmatmul.mubr.msk.bf16.gmra.mrb[24].mxu0 %vm11704_vm0, %v8131_v11 }
  0x47   : > { %406 = vmatprep.mubr.bf16.mxu0 %v8321_v2 }
  0x4e   : > { %5856 = vmatmul.mubr.msk.bf16.gmra.mrb[28].mxu0 %vm11704_vm0, %v8132_v12 }
  0x4f   : > { %6710 = vmatprep.mubr.msk.f32.mxu0 %vm8398_vm1, %v11661_v18 }
  0xe9   : > { %v338_v19 = vpop.f32.mrb[0].mxu0 }
  0xea   : > { %v340_v20 = vpop.f32.mrb[1].mxu0 }
  0xeb   : > { %419 = vst.msk [vmem:[#allocation2 + $0x8] sm:$0xff] %vm11706_vm2, %v340_v20  ;;  %v342_v21 = vpop.f32.mrb[2].mxu0 }
  0xec   : > { %v344_v22 = vpop.f32.mrb[3].mxu0  ;;  %v8406_v23 = vpack.c.bf16 %v342_v21, %v338_v19  ;;  %v8408_v24 = vpack.i.bf16 %v342_v21, %v338_v19  ;;  %v12148_v19 = vmov 0 }
  0xed   : > { %421 = vst.msk [vmem:[#allocation2 + $0x18] sm:$0xff] %vm11706_vm2, %v344_v22 }
  0xee   : > { %12083 = vst [vmem:[#allocation6_spill] sm:$0xff] %v8406_v23  ;;  %12084 = vst [vmem:[#allocation7_spill] sm:$0xff] %v8408_v24  ;;  %879 = vrot.lane.b32.xlu0 %v8406_v23, %s8323_s29  ;;  %6662 = vmatprep.mubr.msk.bf16.mxu1 %vm11704_vm0, %v8406_v23 }
  0xef   : > { %7511 = vmatprep.subr.bf16.mxu0 %v8406_v23 }
  0xf0   : > { %7513 = vmatpush3.bf16.msra.mxu0 %v8406_v23 }
  0xf1   : > { %v348_v25 = vpop.f32.mrb[4].mxu0 }
  0xf2   : > { %v350_v26 = vpop.f32.mrb[5].mxu0  ;;  %v8420_v30 = vld [vmem:[#allocation2 + $0x8] sm:$0xff] }
  0xf3   : > { %423 = vst.msk [vmem:[#allocation2 + $0x28] sm:$0xff] %vm11706_vm2, %v350_v26  ;;  %v352_v27 = vpop.f32.mrb[6].mxu0  ;;  %12086 = vst [vmem:[#allocation9_spill] sm:$0xff] %v8420_v30 }
  0xf4   : > { %v354_v28 = vpop.f32.mrb[7].mxu0  ;;  %v8418_v29 = vpack.c.bf16 %v352_v27, %v348_v25  ;;  %v8422_v31 = vld [vmem:[#allocation2 + $0x18] sm:$0xff]  ;;  %v8424_v32 = vpack.i.bf16 %v352_v27, %v348_v25  ;;  %v8519_v27 = vadd.s32 8, %v8391_v15 }
  0xf5   : > { %12087 = vst [vmem:[#allocation10_spill] sm:$0xff] %v8422_v31  ;;  %425 = vst.msk [vmem:[#allocation2 + $0x38] sm:$0xff] %vm11706_vm2, %v354_v28 }
  0xf6   : > { %12085 = vst [vmem:[#allocation8_spill] sm:$0xff] %v8418_v29  ;;  %12088 = vst [vmem:[#allocation11_spill] sm:$0xff] %v8424_v32  ;;  %881 = vrot.lane.b32.xlu0 %v8418_v29, %s8323_s29  ;;  %7515 = vmatprep.subr.bf16.mxu0 %v8418_v29  ;;  %vm8542_vm3 = vcmp.eq.s32.totalorder %v8394_v16, %v8519_v27 }
  0xf7   : > { %7517 = vmatpush3.bf16.msra.mxu0 %v8418_v29  ;;  %12110 = vst [vmem:[#allocation33_spill] sm:$0xff] %v8519_v27 }
  0xf9   : > { %v358_v34 = vpop.f32.mrb[8].mxu0 }
  0xfa   : > { %v360_v35 = vpop.f32.mrb[9].mxu0  ;;  %v8438_v40 = vld [vmem:[#allocation2 + $0x28] sm:$0xff] }
  0xfb   : > { %427 = vst.msk [vmem:[#allocation2 + $0x48] sm:$0xff] %vm11706_vm2, %v360_v35  ;;  %v362_v36 = vpop.f32.mrb[10].mxu0  ;;  %12091 = vst [vmem:[#allocation14_spill] sm:$0xff] %v8438_v40 }
  0xfc   : > { %v364_v37 = vpop.f32.mrb[11].mxu0  ;;  %v8434_v38 = vpack.c.bf16 %v362_v36, %v358_v34  ;;  %v8436_v39 = vpack.i.bf16 %v362_v36, %v358_v34  ;;  %v8440_v41 = vld [vmem:[#allocation2 + $0x38] sm:$0xff]  ;;  %v12145_v36 = vmov 0 }
  0xfd   : > { %12092 = vst [vmem:[#allocation15_spill] sm:$0xff] %v8440_v41  ;;  %429 = vst.msk [vmem:[#allocation2 + $0x58] sm:$0xff] %vm11706_vm2, %v364_v37  ;;  %v8537_v37 = vpack.c.bf16 %v8422_v31, %v8420_v30 }
  0xfe   : > { %12089 = vst [vmem:[#allocation12_spill] sm:$0xff] %v8434_v38  ;;  %12090 = vst [vmem:[#allocation13_spill] sm:$0xff] %v8436_v39  ;;  %883 = vrot.lane.b32.xlu1 %v8434_v38, %s8323_s29  ;;  %7519 = vmatprep.subr.bf16.mxu0 %v8434_v38 }
  0xff   : > { %7521 = vmatpush3.bf16.msra.mxu0 %v8434_v38  ;;  %12114 = vst [vmem:[#allocation37_spill] sm:$0xff] %v8537_v37 }
 0x101   : > { %v368_v43 = vpop.f32.mrb[12].mxu0 }
 0x102   : > { %v370_v44 = vpop.f32.mrb[13].mxu0  ;;  %v8454_v49 = vld [vmem:[#allocation2 + $0x48] sm:$0xff] }
 0x103   : > { %431 = vst.msk [vmem:[#allocation2 + $0x68] sm:$0xff] %vm11706_vm2, %v370_v44  ;;  %v372_v45 = vpop.f32.mrb[14].mxu0  ;;  %12095 = vst [vmem:[#allocation18_spill] sm:$0xff] %v8454_v49  ;;  %v8556_v44 = vpack.c.bf16 %v8440_v41, %v8438_v40 }
 0x104   : > { %v374_v46 = vpop.f32.mrb[15].mxu0  ;;  %v8450_v47 = vpack.c.bf16 %v372_v45, %v368_v43  ;;  %v8452_v48 = vpack.i.bf16 %v372_v45, %v368_v43  ;;  %v8456_v50 = vld [vmem:[#allocation2 + $0x58] sm:$0xff]  ;;  %v12115_v43 = vmov 0 }
 0x105   : > { %12096 = vst [vmem:[#allocation19_spill] sm:$0xff] %v8456_v50  ;;  %433 = vst.msk [vmem:[#allocation2 + $0x78] sm:$0xff] %vm11706_vm2, %v374_v46  ;;  %v12116_v43 = vsel %vm8542_vm3, 4294967295, %v12115_v43 }
 0x106   : > { %12093 = vst [vmem:[#allocation16_spill] sm:$0xff] %v8450_v47  ;;  %12094 = vst [vmem:[#allocation17_spill] sm:$0xff] %v8452_v48  ;;  %885 = vrot.lane.b32.xlu1 %v8450_v47, %s8323_s29  ;;  %7523 = vmatprep.subr.bf16.mxu0 %v8450_v47 }
 0x107   : > { %7525 = vmatpush3.bf16.msra.mxu0 %v8450_v47  ;;  %12117 = vst [vmem:[#allocation38_spill] sm:$0xff] %v12116_v43  ;;  %12118 = vst [vmem:[#allocation39_spill] sm:$0xff] %v8556_v44 }
 0x109   : > { %v378_v52 = vpop.f32.mrb[16].mxu0 }
 0x10a   : > { %v380_v53 = vpop.f32.mrb[17].mxu0  ;;  %v8470_v58 = vld [vmem:[#allocation2 + $0x68] sm:$0xff] }
 0x10b   : > { %435 = vst.msk [vmem:[#allocation2 + $0x88] sm:$0xff] %vm11706_vm2, %v380_v53  ;;  %v382_v54 = vpop.f32.mrb[18].mxu0  ;;  %12099 = vst [vmem:[#allocation22_spill] sm:$0xff] %v8470_v58  ;;  %v8572_v53 = vpack.c.bf16 %v8456_v50, %v8454_v49 }
 0x10c   : > { %v384_v55 = vpop.f32.mrb[19].mxu0  ;;  %v8466_v56 = vpack.c.bf16 %v382_v54, %v378_v52  ;;  %v8468_v57 = vpack.i.bf16 %v382_v54, %v378_v52  ;;  %v8472_v59 = vld [vmem:[#allocation2 + $0x78] sm:$0xff]  ;;  %v8663_v52 = vadd.s32 56, %v8391_v15 }
 0x10d   : > { %12100 = vst [vmem:[#allocation23_spill] sm:$0xff] %v8472_v59  ;;  %437 = vst.msk [vmem:[#allocation2 + $0x98] sm:$0xff] %vm11706_vm2, %v384_v55  ;;  %v8580_v54 = vpack.c.bf16 %v8472_v59, %v8470_v58 }
 0x10e   : > { %12097 = vst [vmem:[#allocation20_spill] sm:$0xff] %v8466_v56  ;;  %12098 = vst [vmem:[#allocation21_spill] sm:$0xff] %v8468_v57  ;;  %887 = vrot.lane.b32.xlu0 %v8466_v56, %s8323_s29  ;;  %7527 = vmatprep.subr.bf16.mxu0 %v8466_v56  ;;  %vm8673_vm9 = vcmp.eq.s32.totalorder %v8394_v16, %v8663_v52 }
 0x10f   : > { %7529 = vmatpush3.bf16.msra.mxu0 %v8466_v56  ;;  %12121 = vst [vmem:[#allocation42_spill] sm:$0xff] %v8572_v53  ;;  %12122 = vst [vmem:[#allocation43_spill] sm:$0xff] %v8580_v54  ;;  %v12149_v19 = vsel %vm8673_vm9, 4294967295, %v12148_v19 }
 0x110   : > { %12144 = vst [vmem:[#allocation57_spill] sm:$0xff] %v8663_v52  ;;  %12150 = vst [vmem:[#allocation59_spill] sm:$0xff] %v12149_v19 }
 0x111   : > { %v388_v61 = vpop.f32.mrb[20].mxu0 }
 0x112   : > { %v390_v62 = vpop.f32.mrb[21].mxu0  ;;  %v8486_v3 = vld [vmem:[#allocation2 + $0x88] sm:$0xff] }
 0x113   : > { %439 = vst.msk [vmem:[#allocation2 + $0xa8] sm:$0xff] %vm11706_vm2, %v390_v62  ;;  %v392_v63 = vpop.f32.mrb[22].mxu0  ;;  %12103 = vst [vmem:[#allocation26_spill] sm:$0xff] %v8486_v3 }
 0x114   : > { %v394_v0 = vpop.f32.mrb[23].mxu0  ;;  %v8482_v1 = vpack.c.bf16 %v392_v63, %v388_v61  ;;  %v8484_v2 = vpack.i.bf16 %v392_v63, %v388_v61  ;;  %v8488_v4 = vld [vmem:[#allocation2 + $0x98] sm:$0xff]  ;;  %v8605_v63 = vadd.s32 16, %v8391_v15 }
 0x115   : > { %12104 = vst [vmem:[#allocation27_spill] sm:$0xff] %v8488_v4  ;;  %441 = vst.msk [vmem:[#allocation2 + $0xb8] sm:$0xff] %vm11706_vm2, %v394_v0  ;;  %v8588_v55 = vpack.c.bf16 %v8488_v4, %v8486_v3  ;;  %v8608_v0 = vadd.s32 24, %v8391_v15 }
 0x116   : > { %12101 = vst [vmem:[#allocation24_spill] sm:$0xff] %v8482_v1  ;;  %12102 = vst [vmem:[#allocation25_spill] sm:$0xff] %v8484_v2  ;;  %889 = vrot.lane.b32.xlu1 %v8482_v1, %s8323_s29  ;;  %7531 = vmatprep.subr.bf16.mxu0 %v8482_v1  ;;  %vm8616_vm4 = vcmp.eq.s32.totalorder %v8394_v16, %v8605_v63 }
 0x117   : > { %7533 = vmatpush3.bf16.msra.mxu0 %v8482_v1  ;;  %12123 = vst [vmem:[#allocation44_spill] sm:$0xff] %v8588_v55  ;;  %12126 = vst [vmem:[#allocation47_spill] sm:$0xff] %v8605_v63  ;;  %vm8623_vm5 = vcmp.eq.s32.totalorder %v8394_v16, %v8608_v0 }
 0x118   : > { %12127 = vst [vmem:[#allocation48_spill] sm:$0xff] %v8608_v0 }
 0x119   : > { %v398_v6 = vpop.f32.mrb[24].mxu0 }
 0x11a   : > { %v400_v7 = vpop.f32.mrb[25].mxu0  ;;  %v8502_v12 = vld [vmem:[#allocation2 + $0xa8] sm:$0xff] }
 0x11b   : > { %443 = vst.msk [vmem:[#allocation2 + $0xc8] sm:$0xff] %vm11706_vm2, %v400_v7  ;;  %v402_v8 = vpop.f32.mrb[26].mxu0  ;;  %12107 = vst [vmem:[#allocation30_spill] sm:$0xff] %v8502_v12  ;;  %v12129_v7 = vmov 0 }
 0x11c   : > { %v404_v9 = vpop.f32.mrb[27].mxu0  ;;  %v8498_v10 = vpack.c.bf16 %v402_v8, %v398_v6  ;;  %v8500_v11 = vpack.i.bf16 %v402_v8, %v398_v6  ;;  %v8504_v13 = vld [vmem:[#allocation2 + $0xb8] sm:$0xff]  ;;  %v12130_v7 = vsel %vm8616_vm4, 4294967295, %v12129_v7  ;;  %v12132_v8 = vmov 0 }
 0x11d   : > { %12108 = vst [vmem:[#allocation31_spill] sm:$0xff] %v8504_v13  ;;  %445 = vst.msk [vmem:[#allocation2 + $0xd8] sm:$0xff] %vm11706_vm2, %v404_v9  ;;  %v8594_v61 = vpack.c.bf16 %v8504_v13, %v8502_v12  ;;  %v12133_v8 = vsel %vm8623_vm5, 4294967295, %v12132_v8  ;;  %v8632_v9 = vadd.s32 32, %v8391_v15 }
 0x11e   : > { %12105 = vst [vmem:[#allocation28_spill] sm:$0xff] %v8498_v10  ;;  %12106 = vst [vmem:[#allocation29_spill] sm:$0xff] %v8500_v11  ;;  %891 = vrot.lane.b32.xlu0 %v8498_v10, %s8323_s29  ;;  %7535 = vmatprep.subr.bf16.mxu0 %v8498_v10 }
 0x11f   : > { %7537 = vmatpush3.bf16.msra.mxu0 %v8498_v10  ;;  %12124 = vst [vmem:[#allocation45_spill] sm:$0xff] %v8594_v61  ;;  %12131 = vst [vmem:[#allocation50_spill] sm:$0xff] %v12130_v7  ;;  %vm8642_vm6 = vcmp.eq.s32.totalorder %v8394_v16, %v8632_v9  ;;  %v9145_v7 = vadd.s32 104, %v8391_v15 }
 0x120   : > { %12134 = vst [vmem:[#allocation51_spill] sm:$0xff] %v12133_v8  ;;  %12135 = vst [vmem:[#allocation52_spill] sm:$0xff] %v8632_v9 }
 0x121   : > { %v408_v20 = vpop.f32.mrb[28].mxu0  ;;  %12224 = vst [vmem:[#allocation86_spill] sm:$0xff] %v9145_v7 }
 0x122   : > { %v410_v21 = vpop.f32.mrb[29].mxu0  ;;  %7960 = vrot.lane.b32.xlu0 %v8408_v24, %s8323_s29  ;;  %v8523_v34 = vld [vmem:[#allocation2 + $0xc8] sm:$0xff] }
 0x123   : > { %447 = vst.msk [vmem:[#allocation2 + $0xe8] sm:$0xff] %vm11706_vm2, %v410_v21  ;;  %v412_v22 = vpop.f32.mrb[30].mxu0  ;;  %12112 = vst [vmem:[#allocation35_spill] sm:$0xff] %v8523_v34  ;;  %v12137_v21 = vmov 0 }
 0x124   : > { %v414_v25 = vpop.f32.mrb[31].mxu0  ;;  %v8516_v26 = vpack.c.bf16 %v412_v22, %v408_v20  ;;  %v8521_v28 = vpack.i.bf16 %v412_v22, %v408_v20  ;;  %v8525_v35 = vld [vmem:[#allocation2 + $0xd8] sm:$0xff]  ;;  %v8638_v20 = vadd.s32 40, %v8391_v15  ;;  %v12138_v21 = vsel %vm8642_vm6, 4294967295, %v12137_v21 }
 0x125   : > { %12113 = vst [vmem:[#allocation36_spill] sm:$0xff] %v8525_v35  ;;  %449 = vst.msk [vmem:[#allocation2 + $0xf8] sm:$0xff] %vm11706_vm2, %v414_v25  ;;  %v8600_v62 = vpack.c.bf16 %v8525_v35, %v8523_v34  ;;  %v12140_v22 = vmov 0  ;;  %v8657_v25 = vadd.s32 48, %v8391_v15 }
 0x126   : > { %12109 = vst [vmem:[#allocation32_spill] sm:$0xff] %v8516_v26  ;;  %12111 = vst [vmem:[#allocation34_spill] sm:$0xff] %v8521_v28  ;;  %7970 = vrot.lane.b32.xlu0 %v8436_v39, %s8323_s29  ;;  %893 = vrot.lane.b32.xlu1 %v8516_v26, %s8323_s29  ;;  %vm8649_vm7 = vcmp.eq.s32.totalorder %v8394_v16, %v8638_v20  ;;  %v8915_v39 = vshra.s32 %v8663_v52, 4 }
 0x127   : > { %7539 = vmatprep.subr.bf16.mxu0 %v8516_v26  ;;  %12125 = vst [vmem:[#allocation46_spill] sm:$0xff] %v8600_v62  ;;  %12136 = vst [vmem:[#allocation53_spill] sm:$0xff] %v8638_v20  ;;  %v12141_v22 = vsel %vm8649_vm7, 4294967295, %v12140_v22  ;;  %vm8667_vm8 = vcmp.eq.s32.totalorder %v8394_v16, %v8657_v25 }
 0x128   : > { %7541 = vmatpush3.bf16.msra.mxu0 %v8516_v26  ;;  %12139 = vst [vmem:[#allocation54_spill] sm:$0xff] %v12138_v21  ;;  %12142 = vst [vmem:[#allocation55_spill] sm:$0xff] %v12141_v22  ;;  %v12146_v36 = vsel %vm8667_vm8, 4294967295, %v12145_v36 }
 0x129   : > { %7575 = vmatprep.subr.bf16.mxu0 %v8537_v37  ;;  %12143 = vst [vmem:[#allocation56_spill] sm:$0xff] %v8657_v25  ;;  %12147 = vst [vmem:[#allocation58_spill] sm:$0xff] %v12146_v36 }
 0x12a   : > { %7980 = vrot.lane.b32.xlu0 %v8468_v57, %s8323_s29  ;;  %7965 = vrot.lane.b32.xlu1 %v8424_v32, %s8323_s29  ;;  %v8559_v45 = vld [vmem:[#allocation2 + $0xe8] sm:$0xff] }
 0x12b   : > { %6711 = vmatmul.mubr.msk.f32.vlgmr.msra.gmra.mrb[32].mxu0 %vm8542_vm3, %v11661_v18  ;;  %12119 = vst [vmem:[#allocation40_spill] sm:$0xff] %v8559_v45 }
 0x12c   : > { %7577 = vmatpush3.bf16.msra.mxu0 %v8537_v37  ;;  %v8561_v46 = vld [vmem:[#allocation2 + $0xf8] sm:$0xff]  ;;  %6713 = vmatprep.mubr.msk.f32.mxu0 %vm8616_vm4, %v11661_v18 }
 0x12d   : > { %12120 = vst [vmem:[#allocation41_spill] sm:$0xff] %v8561_v46  ;;  %7579 = vmatprep.subr.bf16.mxu0 %v8556_v44  ;;  %v8612_v6 = vpack.c.bf16 %v8561_v46, %v8559_v45 }
 0x12e   : > { %7990 = vrot.lane.b32.xlu0 %v8500_v11, %s8323_s29  ;;  %7975 = vrot.lane.b32.xlu1 %v8452_v48, %s8323_s29 }
 0x12f   : > { %12128 = vst [vmem:[#allocation49_spill] sm:$0xff] %v8612_v6  ;;  %6714 = vmatmul.mubr.msk.f32.gmra.mrb[34].mxu0 %vm8623_vm5, %v11661_v18 }
 0x130   : > { %7581 = vmatpush3.bf16.msra.mxu0 %v8556_v44  ;;  %6716 = vmatprep.mubr.msk.f32.mxu0 %vm8642_vm6, %v11661_v18 }
 0x131   : > { %7583 = vmatprep.subr.bf16.mxu0 %v8572_v53 }
 0x132   : > { %7985 = vrot.lane.b32.xlu1 %v8484_v2, %s8323_s29 }
 0x133   : > { %6717 = vmatmul.mubr.msk.f32.gmra.mrb[36].mxu0 %vm8649_vm7, %v11661_v18 }
 0x134   : > { %7585 = vmatpush3.bf16.msra.mxu0 %v8572_v53  ;;  %6719 = vmatprep.mubr.msk.f32.mxu0 %vm8667_vm8, %v11661_v18 }
 0x135   : > { %7587 = vmatprep.subr.bf16.mxu0 %v8580_v54 }
 0x136   : > { %7995 = vrot.lane.b32.xlu1 %v8521_v28, %s8323_s29 }
 0x137   : > { %6720 = vmatmul.mubr.msk.f32.gmra.mrb[38].mxu0 %vm8673_vm9, %v11661_v18 }
 0x138   : > { %7589 = vmatpush3.bf16.msra.mxu0 %v8580_v54 }
 0x139   : > { %7591 = vmatprep.subr.bf16.mxu0 %v8588_v55 }
 0x13c   : > { %7593 = vmatpush3.bf16.msra.mxu0 %v8588_v55 }
 0x13d   : > { %7595 = vmatprep.subr.bf16.mxu0 %v8594_v61 }
 0x140   : > { %7597 = vmatpush3.bf16.msra.mxu0 %v8594_v61 }
 0x141   : > { %7599 = vmatprep.subr.bf16.mxu0 %v8600_v62 }
 0x144   : > { %7601 = vmatpush3.bf16.msra.mxu0 %v8600_v62 }
 0x145   : > { %7603 = vmatprep.subr.bf16.mxu0 %v8612_v6 }
 0x148   : > { %7605 = vmatpush3.bf16.msra.mxu0 %v8612_v6 }
 0x160   : > { %v880_v5 = vpop.permute.xlu0 %879 }
 0x161   : > { %7914 = vmatprep.subr.msk.bf16.mxu1 %vm11704_vm0, %v880_v5  ;;  %v920_v60 = vsel %vm11704_vm0, %v880_v5, 0 }
 0x162   : > { %6647 = vmatpush3.bf16.xpose.msra.mxu1 %v920_v60 }
 0x168   : > { %v882_v51 = vpop.permute.xlu0 %881 }
 0x169   : > { %7915 = vmatprep.subr.msk.bf16.mxu1 %vm11704_vm0, %v882_v51  ;;  %v923_v16 = vsel %vm11704_vm0, %v882_v51, 0 }
 0x16a   : > { %6649 = vmatpush3.bf16.xpose.msra.mxu1 %v923_v16 }
 0x170   : > { %v884_v42 = vpop.permute.xlu1 %883 }
 0x171   : > { %7916 = vmatprep.subr.msk.bf16.mxu1 %vm11704_vm0, %v884_v42  ;;  %v926_v33 = vsel %vm11704_vm0, %v884_v42, 0 }
 0x172   : > { %6651 = vmatpush3.bf16.xpose.msra.mxu1 %v926_v33 }
 0x178   : > { %v886_v45 = vpop.permute.xlu1 %885 }
 0x179   : > { %7917 = vmatprep.subr.msk.bf16.mxu1 %vm11704_vm0, %v886_v45  ;;  %v929_v18 = vsel %vm11704_vm0, %v886_v45, 0 }
 0x17a   : > { %6653 = vmatpush3.bf16.xpose.msra.mxu1 %v929_v18 }
 0x180   : > { %v888_v5 = vpop.permute.xlu0 %887 }
 0x181   : > { %7918 = vmatprep.subr.msk.bf16.mxu1 %vm11704_vm0, %v888_v5  ;;  %v932_v60 = vsel %vm11704_vm0, %v888_v5, 0 }
 0x182   : > { %6655 = vmatpush3.bf16.xpose.msra.mxu1 %v932_v60 }
 0x188   : > { %v890_v51 = vpop.permute.xlu1 %889 }
 0x189   : > { %7919 = vmatprep.subr.msk.bf16.mxu1 %vm11704_vm0, %v890_v51  ;;  %v935_v16 = vsel %vm11704_vm0, %v890_v51, 0 }
 0x18a   : > { %6657 = vmatpush3.bf16.xpose.msra.mxu1 %v935_v16 }
 0x190   : > { %v892_v42 = vpop.permute.xlu0 %891 }
 0x191   : > { %7920 = vmatprep.subr.msk.bf16.mxu1 %vm11704_vm0, %v892_v42  ;;  %v938_v33 = vsel %vm11704_vm0, %v892_v42, 0 }
 0x192   : > { %6659 = vmatpush3.bf16.xpose.msra.mxu1 %v938_v33 }
 0x194   : > { %v7961_v45 = vpop.permute.xlu0 %7960 }
 0x195   : > { %v7963_v18 = vunpack.i.h.bf16 %v7961_v45  ;;  %v7962_v46 = vunpack.i.l.bf16 %v7961_v45 }
 0x197   : > { %v7542_v60 = vpack.c.bf16 %v7963_v18, %v7962_v46 }
 0x198   : > { %v894_v34 = vpop.permute.xlu1 %893  ;;  %v7971_v12 = vpop.permute.xlu0 %7970 }
 0x199   : > { %7921 = vmatprep.subr.msk.bf16.mxu1 %vm11704_vm0, %v894_v34  ;;  %v941_v5 = vsel %vm11704_vm0, %v894_v34, 0  ;;  %v7973_v13 = vunpack.i.h.bf16 %v7971_v12  ;;  %v7972_v3 = vunpack.i.l.bf16 %v7971_v12 }
 0x19a   : > { %6661 = vmatpush3.bf16.xpose.msra.mxu1 %v941_v5 }
 0x19b   : > { %7543 = vmatprep.subr.bf16.mxu1 %v7542_v60  ;;  %v7550_v45 = vpack.c.bf16 %v7973_v13, %v7972_v3 }
 0x19c   : > { %v7966_v35 = vpop.permute.xlu1 %7965  ;;  %v7981_v18 = vpop.permute.xlu0 %7980 }
 0x19d   : > { %v7968_v51 = vunpack.i.h.bf16 %v7966_v35  ;;  %v7967_v16 = vunpack.i.l.bf16 %v7966_v35  ;;  %v7983_v35 = vunpack.i.h.bf16 %v7981_v18  ;;  %v7982_v5 = vunpack.i.l.bf16 %v7981_v18 }
 0x19f   : > { %v7546_v42 = vpack.c.bf16 %v7968_v51, %v7967_v16  ;;  %v7558_v16 = vpack.c.bf16 %v7983_v35, %v7982_v5  ;;  %v12151_v35 = vmov 0.5  }
 0x1a0   : > { %v7976_v33 = vpop.permute.xlu1 %7975 }
 0x1a1   : > { %6663 = vmatmul.mubr.msk.bf16.vlgmr.msra.gmra.mrb[0].mxu1 %vm11704_vm0, %v8418_v29  ;;  %v7978_v34 = vunpack.i.h.bf16 %v7976_v33  ;;  %v7977_v46 = vunpack.i.l.bf16 %v7976_v33  ;;  %v7991_v33 = vpop.permute.xlu0 %7990  ;;  %v12162_v29 = vmov 0 }
 0x1a2   : > { %6666 = vmatprep.mubr.msk.bf16.mxu1 %vm11704_vm0, %v8434_v38  ;;  %7545 = vmatpush3.bf16.msra.mxu1 %v7542_v60  ;;  %v7993_v3 = vunpack.i.h.bf16 %v7991_v33  ;;  %v7992_v13 = vunpack.i.l.bf16 %v7991_v33 }
 0x1a3   : > { %7547 = vmatprep.subr.bf16.mxu1 %v7546_v42  ;;  %v7554_v12 = vpack.c.bf16 %v7978_v34, %v7977_v46 }
 0x1a4   : > { %v7986_v4 = vpop.permute.xlu1 %7985 }
 0x1a5   : > { %v7988_v60 = vunpack.i.h.bf16 %v7986_v4  ;;  %v7987_v51 = vunpack.i.l.bf16 %v7986_v4 }
 0x1a6   : > { %7549 = vmatpush3.bf16.msra.mxu1 %v7546_v42 }
 0x1a7   : > { %7551 = vmatprep.subr.bf16.mxu1 %v7550_v45  ;;  %v7562_v42 = vpack.c.bf16 %v7988_v60, %v7987_v51 }
 0x1a8   : > { %v7996_v18 = vpop.permute.xlu1 %7995 }
 0x1a9   : > { %6667 = vmatmul.mubr.msk.bf16.gmra.mrb[4].mxu1 %vm11704_vm0, %v8450_v47  ;;  %v7998_v34 = vunpack.i.h.bf16 %v7996_v18  ;;  %v7997_v46 = vunpack.i.l.bf16 %v7996_v18 }
 0x1aa   : > { %6670 = vmatprep.mubr.msk.bf16.mxu1 %vm11704_vm0, %v8466_v56  ;;  %7553 = vmatpush3.bf16.msra.mxu1 %v7550_v45  ;;  %v7566_v45 = vpack.c.bf16 %v7993_v3, %v7992_v13 }
 0x1ab   : > { %7555 = vmatprep.subr.bf16.mxu1 %v7554_v12  ;;  %v7570_v4 = vpack.c.bf16 %v7998_v34, %v7997_v46 }
 0x1ae   : > { %7557 = vmatpush3.bf16.msra.mxu1 %v7554_v12 }
 0x1af   : > { %7559 = vmatprep.subr.bf16.mxu1 %v7558_v16 }
 0x1b1   : > { %6671 = vmatmul.mubr.msk.bf16.gmra.mrb[8].mxu1 %vm11704_vm0, %v8482_v1 }
 0x1b2   : > { %6674 = vmatprep.mubr.msk.bf16.mxu1 %vm11704_vm0, %v8498_v10  ;;  %7561 = vmatpush3.bf16.msra.mxu1 %v7558_v16 }
 0x1b3   : > { %7563 = vmatprep.subr.bf16.mxu1 %v7562_v42 }
 0x1b6   : > { %7565 = vmatpush3.bf16.msra.mxu1 %v7562_v42 }
 0x1b7   : > { %7567 = vmatprep.subr.bf16.mxu1 %v7566_v45 }
 0x1b9   : > { %6675 = vmatmul.mubr.msk.bf16.gmra.mrb[12].mxu1 %vm11704_vm0, %v8516_v26 }
 0x1ba   : > { %7569 = vmatpush3.bf16.msra.mxu1 %v7566_v45  ;;  %6754 = vmatprep.mubr.msk.f32.mxu1 %vm8398_vm1, %v12151_v35  ;;  %v11672_v45 = vmov 1.0  }
 0x1bb   : > { %7571 = vmatprep.subr.bf16.mxu1 %v7570_v4  ;;  %6798 = vmatprep.mubr.msk.f32.mxu0 %vm8398_vm1, %v11672_v45 }
 0x1bc   : > { %6799 = vmatmul.mubr.msk.f32.vlgmr.msra.gmra.mrb[40].mxu0 %vm8542_vm3, %v11672_v45 }
 0x1bd   : > { %6801 = vmatprep.mubr.msk.f32.mxu0 %vm8616_vm4, %v11672_v45 }
 0x1be   : > { %7573 = vmatpush3.bf16.msra.mxu1 %v7570_v4 }
 0x1c0   : > { %6802 = vmatmul.mubr.msk.f32.gmra.mrb[42].mxu0 %vm8623_vm5, %v11672_v45 }
 0x1c1   : > { %6755 = vmatmul.mubr.msk.f32.vlgmr.msra.gmra.mrb[16].mxu1 %vm8542_vm3, %v12151_v35  ;;  %6804 = vmatprep.mubr.msk.f32.mxu0 %vm8642_vm6, %v11672_v45  ;;  %vm504_vm3 = vcmp.le.s32.totalorder %v8389_v14, %v8605_v63 }
 0x1c2   : > { %6757 = vmatprep.mubr.msk.f32.mxu1 %vm8616_vm4, %v12151_v35 }
 0x1c4   : > { %6805 = vmatmul.mubr.msk.f32.gmra.mrb[44].mxu0 %vm8649_vm7, %v11672_v45 }
 0x1c5   : > { %6758 = vmatmul.mubr.msk.f32.gmra.mrb[18].mxu1 %vm8623_vm5, %v12151_v35  ;;  %6807 = vmatprep.mubr.msk.f32.mxu0 %vm8667_vm8, %v11672_v45 }
 0x1c6   : > { %6760 = vmatprep.mubr.msk.f32.mxu1 %vm8642_vm6, %v12151_v35 }
 0x1c8   : > { %6808 = vmatmul.mubr.msk.f32.gmra.mrb[46].mxu0 %vm8673_vm9, %v11672_v45 }
 0x1c9   : > { %6761 = vmatmul.mubr.msk.f32.gmra.mrb[20].mxu1 %vm8649_vm7, %v12151_v35 }
 0x1ca   : > { %6763 = vmatprep.mubr.msk.f32.mxu1 %vm8667_vm8, %v12151_v35 }
 0x1cd   : > { %6764 = vmatmul.mubr.msk.f32.gmra.mrb[22].mxu1 %vm8673_vm9, %v12151_v35 }
 0x1fe   : > { %v6712_v5 = vpop.f32.mrb[32].mxu0 }
 0x1ff   : > { %v1266_v12 = vpop.f32.mrb[33].mxu0 }
 0x200   : > { %v8737_v60 = vpack.c.bf16 %v6712_v5, %v1266_v12 }
 0x202   : > { %12152 = vst [vmem:[#allocation60_spill] sm:$0xff] %v8737_v60  ;;  %6818 = vmatprep.mubr.msk.bf16.mxu1 %vm11704_vm0, %v8737_v60  ;;  %v6715_v51 = vpop.f32.mrb[34].mxu0 }
 0x203   : > { %v1276_v16 = vpop.f32.mrb[35].mxu0 }
 0x204   : > { %v8741_v33 = vpack.c.bf16 %v6715_v51, %v1276_v16 }
 0x206   : > { %12153 = vst [vmem:[#allocation61_spill] sm:$0xff] %v8741_v33  ;;  %v6718_v3 = vpop.f32.mrb[36].mxu0 }
 0x207   : > { %v1286_v13 = vpop.f32.mrb[37].mxu0 }
 0x208   : > { %v8743_v42 = vpack.c.bf16 %v6718_v3, %v1286_v13 }
 0x20a   : > { %12154 = vst [vmem:[#allocation62_spill] sm:$0xff] %v8743_v42  ;;  %v6721_v18 = vpop.f32.mrb[38].mxu0 }
 0x20b   : > { %v1296_v34 = vpop.f32.mrb[39].mxu0 }
 0x20c   : > { %v8745_v46 = vpack.c.bf16 %v6721_v18, %v1296_v34 }
 0x20e   : > { %12155 = vst [vmem:[#allocation63_spill] sm:$0xff] %v8745_v46 }
 0x274   : > { %v8771_v4 = vpop.f32.mrb[0].mxu1 }
 0x275   : > { %v8773_v5 = vpop.f32.mrb[1].mxu1 }
 0x276   : > { %v8775_v12 = vpop.f32.mrb[2].mxu1 }
 0x277   : > { %v8777_v51 = vpop.f32.mrb[3].mxu1 }
 0x27c   : > { %v8779_v16 = vpop.f32.mrb[4].mxu1 }
 0x27d   : > { %v8781_v3 = vpop.f32.mrb[5].mxu1 }
 0x27e   : > { %v8783_v13 = vpop.f32.mrb[6].mxu1 }
 0x27f   : > { %v8785_v18 = vpop.f32.mrb[7].mxu1 }
 0x284   : > { %v8787_v34 = vpop.f32.mrb[8].mxu1 }
 0x285   : > { %v8789_v19 = vpop.f32.mrb[9].mxu1 }
 0x286   : > { %v8791_v45 = vpop.f32.mrb[10].mxu1 }
 0x287   : > { %v8793_v36 = vpop.f32.mrb[11].mxu1 }
 0x28c   : > { %v8795_v22 = vpop.f32.mrb[12].mxu1 }
 0x28d   : > { %v8797_v21 = vpop.f32.mrb[13].mxu1 }
 0x28e   : > { %v8799_v35 = vpop.f32.mrb[14].mxu1 }
 0x28f   : > { %v8801_v58 = vpop.f32.mrb[15].mxu1 }
 0x294   : > { %v6756_v59 = vpop.f32.mrb[16].mxu1 }
 0x295   : > { %v1435_v49 = vpop.f32.mrb[17].mxu1 }
 0x296   : > { %v8803_v50 = vpack.c.bf16 %v6756_v59, %v1435_v49 }
 0x298   : > { %7922 = vmatprep.subr.msk.bf16.mxu1 %vm11704_vm0, %v8803_v50  ;;  %v1600_v40 = vsel %vm11704_vm0, %v8803_v50, 0  ;;  %v6759_v41 = vpop.f32.mrb[18].mxu1 }
 0x299   : > { %6811 = vmatpush3.bf16.xpose.msra.mxu1 %v1600_v40  ;;  %v1445_v30 = vpop.f32.mrb[19].mxu1 }
 0x29a   : > { %v8809_v31 = vpack.c.bf16 %v6759_v41, %v1445_v30 }
 0x29c   : > { %7923 = vmatprep.subr.msk.bf16.mxu1 %vm11704_vm0, %v8809_v31  ;;  %v6762_v26 = vpop.f32.mrb[20].mxu1  ;;  %v1603_v49 = vsel %vm11704_vm0, %v8809_v31, 0 }
 0x29d   : > { %v1455_v10 = vpop.f32.mrb[21].mxu1 }
 0x29e   : > { %v8815_v59 = vpack.c.bf16 %v6762_v26, %v1455_v10 }
 0x2a0   : > { %v6765_v1 = vpop.f32.mrb[22].mxu1  ;;  %v1606_v30 = vsel %vm11704_vm0, %v8815_v59, 0 }
 0x2a1   : > { %6813 = vmatpush3.bf16.xpose.msra.mxu1 %v1603_v49  ;;  %v1465_v56 = vpop.f32.mrb[23].mxu1  ;;  %v8859_v49 = vshra.s32 %v8519_v27, 4 }
 0x2a2   : > { %7924 = vmatprep.subr.msk.bf16.mxu1 %vm11704_vm0, %v8815_v59  ;;  %v8819_v40 = vpack.c.bf16 %v6765_v1, %v1465_v56  ;;  %v8851_v56 = vshra.s32 %v8391_v15, 4  ;;  %v8854_v1 = vshra.s32 %v8605_v63, 4  ;;  %v9099_v63 = vadd.s32 96, %v8391_v15 }
 0x2a4   : > { %v1609_v41 = vsel %vm11704_vm0, %v8819_v40, 0  ;;  %v567_v10 = vand.u32 1, %v8851_v56  ;;  %v5865_v26 = vadd.s32 4294967295, %v8851_v56  ;;  %12211 = vst [vmem:[#allocation81_spill] sm:$0xff] %v9099_v63  ;;  %v481_v8 = vshra.s32 %v9099_v63, 4 }
 0x2a6   : > { %vm575_vm10 = vcmp.eq.s32.totalorder %v567_v10, 1  ;;  %v8884_v10 = vshra.s32 %v8657_v25, 4 }
 0x2a8   : > { %v573_v23 = vand.u32 1, %v8884_v10  ;;  %v5871_v28 = vadd.s32 4294967295, %v8884_v10 }
 0x2a9   : > { %6815 = vmatpush3.bf16.xpose.msra.mxu1 %v1606_v30  ;;  %v569_v30 = vand.u32 1, %v8854_v1 }
 0x2aa   : > { %7925 = vmatprep.subr.msk.bf16.mxu1 %vm11704_vm0, %v8819_v40  ;;  %vm581_vm8 = vcmp.eq.s32.totalorder %v573_v23, 1 }
 0x2ab   : > { %vm577_vm12 = vcmp.eq.s32.totalorder %v569_v30, 1 }
 0x2b1   : > { %6817 = vmatpush3.bf16.xpose.msra.mxu1 %v1609_v41  ;;  %v5867_v41 = vadd.s32 4294967295, %v8854_v1 }
 0x2b2   : > { %6882 = vmatprep.subr.bf16.mxu1 %v8537_v37 }
 0x2b8   : > { %6819 = vmatmul.mubr.msk.bf16.vlgmr.msra.gmra.mrb[24].mxu1 %vm11704_vm0, %v8741_v33 }
 0x2b9   : > { %6883 = vmatpush3.bf16.msra.mxu1 %v8537_v37  ;;  %6822 = vmatprep.mubr.msk.bf16.mxu1 %vm11704_vm0, %v8743_v42  ;;  %v12156_v37 = vmov 0 }
 0x2ba   : > { %6884 = vmatprep.subr.bf16.mxu1 %v8556_v44 }
 0x2bd   : > { %6885 = vmatpush3.bf16.msra.mxu1 %v8556_v44  ;;  %v8877_v44 = vshra.s32 %v8632_v9, 4 }
 0x2be   : > { %6886 = vmatprep.subr.bf16.mxu1 %v8572_v53 }
 0x2c0   : > { %6823 = vmatmul.mubr.msk.bf16.gmra.mrb[28].mxu1 %vm11704_vm0, %v8745_v46 }
 0x2c1   : > { %6887 = vmatpush3.bf16.msra.mxu1 %v8572_v53 }
 0x2c2   : > { %6888 = vmatprep.subr.bf16.mxu1 %v8580_v54 }
 0x2c5   : > { %6889 = vmatpush3.bf16.msra.mxu1 %v8580_v54 }
 0x2c6   : > { %6890 = vmatprep.subr.bf16.mxu1 %v8588_v55 }
 0x2c9   : > { %6891 = vmatpush3.bf16.msra.mxu1 %v8588_v55  ;;  %v8869_v55 = vshra.s32 %v8608_v0, 4 }
 0x2ca   : > { %6892 = vmatprep.subr.bf16.mxu1 %v8594_v61 }
 0x2cb   : > { %v570_v54 = vand.u32 1, %v8869_v55  ;;  %v5868_v53 = vadd.s32 4294967295, %v8869_v55 }
 0x2cd   : > { %6893 = vmatpush3.bf16.msra.mxu1 %v8594_v61  ;;  %v5866_v61 = vadd.s32 4294967295, %v8859_v49 }
 0x2ce   : > { %6894 = vmatprep.subr.bf16.mxu1 %v8600_v62 }
 0x2d1   : > { %6895 = vmatpush3.bf16.msra.mxu1 %v8600_v62  ;;  %v568_v62 = vand.u32 1, %v8859_v49 }
 0x2d2   : > { %6896 = vmatprep.subr.bf16.mxu1 %v8612_v6 }
 0x2d3   : > { %vm576_vm14 = vcmp.eq.s32.totalorder %v568_v62, 1  ;;  %v5869_v62 = vadd.s32 4294967295, %v8877_v44 }
 0x2d5   : > { %6897 = vmatpush3.bf16.msra.mxu1 %v8612_v6  ;;  %v8864_v6 = vshra.s32 %v8389_v14, 4 }
 0x2d6   : > { %7655 = vmatprep.subr.bf16.mxu1 %v8803_v50 }
 0x2d7   : > { %vm591_vm11 = vcmp.eq.s32.totalorder %v8864_v6, %v5865_v26  ;;  %vm593_vm13 = vcmp.eq.s32.totalorder %v8864_v6, %v5867_v41  ;;  %vm592_vm15 = vcmp.eq.s32.totalorder %v8864_v6, %v5866_v61  ;;  %v12158_v26 = vmov 0 }
 0x2d8   : > { %vm8879_vm0 = vmand %vm575_vm10, %vm591_vm11  ;;  %v571_v41 = vand.u32 1, %v8877_v44  ;;  %v8893_v61 = vshra.s32 %v8638_v20, 4  ;;  %vm8895_vm10 = vcmp.eq.s32.totalorder %v570_v54, 1  ;;  %vm597_vm7 = vcmp.eq.s32.totalorder %v8864_v6, %v5871_v28 }
 0x2d9   : > { %v12157_v37 = vsel %vm8879_vm0, 4294967295, %v12156_v37  ;;  %vm8886_vm2 = vmand %vm577_vm12, %vm593_vm13  ;;  %vm594_vm12 = vcmp.eq.s32.totalorder %v8864_v6, %v5868_v53  ;;  %vm12164_vm13 = vcmask 523264   ;;  %v12165_v53 = vmov 0 }
 0x2da   : > { %v12159_v26 = vsel %vm8886_vm2, 4294967295, %v12158_v26  ;;  %vm8899_vm11 = vmand %vm576_vm14, %vm592_vm15  ;;  %v572_v54 = vand.u32 1, %v8893_v61  ;;  %v5870_v57 = vadd.s32 4294967295, %v8893_v61  ;;  %vm579_vm14 = vcmp.eq.s32.totalorder %v571_v41, 1 }
 0x2db   : > { %v12163_v29 = vsel %vm8899_vm11, 4294967295, %v12162_v29  ;;  %vm595_vm15 = vcmp.eq.s32.totalorder %v8864_v6, %v5869_v62  ;;  %vm8928_vm9 = vmand %vm8895_vm10, %vm594_vm12  ;;  %v12172_v28 = vmov 0 }
 0x2dc   : > { %v12166_v53 = vsel %vm8928_vm9, 4294967295, %v12165_v53  ;;  %vm580_vm6 = vcmp.eq.s32.totalorder %v572_v54, 1  ;;  %vm596_vm5 = vcmp.eq.s32.totalorder %v8864_v6, %v5870_v57  ;;  %vm12168_vm4 = vmmov %vm12164_vm13  ;;  %v12175_v57 = vmov 0 }
 0x2dd   : > { %12167 = vst [vmem:[#allocation64_spill] sm:$0xff] %v12166_v53  ;;  %vm8940_vm10 = vmand %vm579_vm14, %vm595_vm15  ;;  %vm502_vm15 = vcmp.le.s32.totalorder %v8389_v14, %v8391_v15 }
 0x2de   : > { %vm8948_vm12 = vmand %vm581_vm8, %vm597_vm7  ;;  %vm12178_vm7 = vcmask 523264  }
 0x2df   : > { %v12173_v28 = vsel %vm8948_vm12, 4294967295, %v12172_v28  ;;  %vm12179_vm8 = vmmov %vm12178_vm7 }
 0x2e0   : > { %12174 = vst [vmem:[#allocation66_spill] sm:$0xff] %v12173_v28  ;;  %v12453_v28 = vld [vmem:[#allocation34_spill] sm:$0xff] }
 0x38b   : > { %v6820_v30 = vpop.f32.mrb[24].mxu1 }
 0x38c   : > { %v1645_v47 = vpop.f32.mrb[25].mxu1  ;;  %v8919_v24 = vsel %vm8886_vm2, %v6820_v30, -3.4028235e+38  ;;  %v12169_v30 = vmov 0 }
 0x38d   : > { %v8907_v11 = vsel %vm8879_vm0, %v1645_v47, -3.4028235e+38  ;;  %v6821_v2 = vpop.f32.mrb[26].mxu1  ;;  %v1690_v38 = vsel %vm12168_vm4, %v8919_v24, -inf  ;;  %v12170_v30 = vsel %vm8940_vm10, 4294967295, %v12169_v30 }
 0x38e   : > { %v1648_v48 = vpop.f32.mrb[27].mxu1  ;;  %v1684_v32 = vsel %vm12164_vm13, %v8907_v11, -inf  ;;  %12171 = vst [vmem:[#allocation65_spill] sm:$0xff] %v12170_v30  ;;  %v8946_v23 = vsel %vm8928_vm9, %v6821_v2, -3.4028235e+38  ;;  %v12468_v30 = vld [vmem:[#allocation19_spill] sm:$0xff] }
 0x38f   : > { %v8923_v47 = vsel %vm8899_vm11, %v1648_v48, -3.4028235e+38  ;;  %1685 = vmax.xlane.f32.xlu0 %v1684_v32  ;;  %v574_v48 = vand.u32 1, %v8915_v39  ;;  %v5872_v32 = vadd.s32 4294967295, %v8915_v39 }
 0x390   : > { %v1687_v46 = vsel %vm12164_vm13, %v8923_v47, -inf  ;;  %vm8952_vm13 = vmand %vm580_vm6, %vm596_vm5  ;;  %vm486_vm6 = vcmp.eq.s32.totalorder %v8851_v56, %v8864_v6 }
 0x391   : > { %1688 = vmax.xlane.f32.xlu1 %v1687_v46  ;;  %v12176_v57 = vsel %vm8952_vm13, 4294967295, %v12175_v57  ;;  %vm582_vm4 = vcmp.eq.s32.totalorder %v574_v48, 1  ;;  %vm598_vm14 = vcmp.eq.s32.totalorder %v8864_v6, %v5872_v32  ;;  %v12180_v48 = vmov 0 }
 0x392   : > { %12177 = vst [vmem:[#allocation67_spill] sm:$0xff] %v12176_v57  ;;  %vm8973_vm5 = vmand %vm582_vm4, %vm598_vm14  ;;  %vm488_vm14 = vcmp.eq.s32.totalorder %v8854_v1, %v8864_v6  ;;  %v12191_v1 = vmov 0  ;;  %v12452_v57 = vld [vmem:[#allocation29_spill] sm:$0xff] }
 0x393   : > { %1691 = vmax.xlane.f32.xlu0 %v1690_v38  ;;  %v6824_v46 = vpop.f32.mrb[28].mxu1  ;;  %v1693_v38 = vsel %vm12178_vm7, %v8946_v23, -inf  ;;  %v12181_v48 = vsel %vm8973_vm5, 4294967295, %v12180_v48  ;;  %vm8989_vm4 = vmand %vm486_vm6, %vm502_vm15  ;;  %vm12187_vm6 = vcmask 523264  }
 0x394   : > { %v1661_v41 = vpop.f32.mrb[29].mxu1  ;;  %v8967_v33 = vsel %vm8948_vm12, %v6824_v46, -3.4028235e+38  ;;  %12182 = vst [vmem:[#allocation68_spill] sm:$0xff] %v12181_v48  ;;  %v9004_v56 = vsel %vm8989_vm4, %v8773_v5, -3.4028235e+38  ;;  %vm9008_vm15 = vmand %vm488_vm14, %vm504_vm3  ;;  %vm506_vm3 = vcmp.le.s32.totalorder %v8389_v14, %v8632_v9 }
 0x395   : > { %v8958_v62 = vsel %vm8940_vm10, %v1661_v41, -3.4028235e+38  ;;  %v6825_v2 = vpop.f32.mrb[30].mxu1  ;;  %v1702_v32 = vsel %vm12178_vm7, %v8967_v33, -inf  ;;  %v9026_v5 = vadd.s32 64, %v8391_v15 }
 0x396   : > { %v1664_v54 = vpop.f32.mrb[31].mxu1  ;;  %v1696_v42 = vsel %vm12179_vm8, %v8958_v62, -inf  ;;  %vm12183_vm8 = vmmov %vm12178_vm7  ;;  %v8987_v41 = vsel %vm8973_vm5, %v6825_v2, -3.4028235e+38  ;;  %vm487_vm7 = vcmp.eq.s32.totalorder %v8859_v49, %v8864_v6  ;;  %vm489_vm5 = vcmp.eq.s32.totalorder %v8869_v55, %v8864_v6 }
 0x397   : > { %v8971_v60 = vsel %vm8952_vm13, %v1664_v54, -3.4028235e+38  ;;  %1694 = vmax.xlane.f32.xlu0 %v1693_v38  ;;  %1697 = vmax.xlane.f32.xlu1 %v1696_v42  ;;  %v12184_v42 = vmov 0  ;;  %v1705_v2 = vsel %vm12187_vm6, %v8987_v41, -inf  ;;  %v12188_v54 = vmov 0  ;;  %12194 = vst [vmem:[#allocation72_spill] sm:$0xff] %v9026_v5 }
 0x398   : > { %v1699_v46 = vsel %vm12183_vm8, %v8971_v60, -inf  ;;  %v12185_v42 = vsel %vm8989_vm4, 4294967295, %v12184_v42  ;;  %vm503_vm8 = vcmp.le.s32.totalorder %v8389_v14, %v8519_v27  ;;  %v12189_v54 = vsel %vm9008_vm15, 4294967295, %v12188_v54 }
 0x399   : > { %12186 = vst [vmem:[#allocation69_spill] sm:$0xff] %v12185_v42  ;;  %12190 = vst [vmem:[#allocation70_spill] sm:$0xff] %v12189_v54  ;;  %vm505_vm4 = vcmp.le.s32.totalorder %v8389_v14, %v8608_v0  ;;  %vm490_vm6 = vcmp.eq.s32.totalorder %v8877_v44, %v8864_v6  ;;  %v9031_v49 = vsel %vm9008_vm15, %v8771_v4, -3.4028235e+38  ;;  %v12195_v38 = vmov 0 }
 0x39a   : > { %vm9013_vm1 = vmand %vm487_vm7, %vm503_vm8  ;;  %v9043_v44 = vadd.s32 80, %v8391_v15  ;;  %v12199_v4 = vmov 0  ;;  %vm492_vm8 = vcmp.eq.s32.totalorder %v8884_v10, %v8864_v6  ;;  %vm507_vm15 = vcmp.le.s32.totalorder %v8389_v14, %v8638_v20 }
 0x39b   : > { %1703 = vmax.xlane.f32.xlu1 %v1702_v32  ;;  %1700 = vmax.xlane.f32.xlu0 %v1699_v46  ;;  %v12192_v1 = vsel %vm9013_vm1, 4294967295, %v12191_v1  ;;  %v9036_v55 = vsel %vm9013_vm1, %v8777_v51, -3.4028235e+38  ;;  %vm9038_vm14 = vmand %vm489_vm5, %vm505_vm4  ;;  %v6800_v32 = vpop.f32.mrb[40].mxu0  ;;  %vm508_vm5 = vcmp.le.s32.totalorder %v8389_v14, %v8657_v25  ;;  %v9056_v51 = vadd.s32 72, %v8391_v15 }
 0x39c   : > { %12193 = vst [vmem:[#allocation71_spill] sm:$0xff] %v12192_v1  ;;  %v12196_v38 = vsel %vm9038_vm14, 4294967295, %v12195_v38  ;;  %12198 = vst [vmem:[#allocation74_spill] sm:$0xff] %v9043_v44  ;;  %v1540_v46 = vpop.f32.mrb[41].mxu0  ;;  %vm491_vm4 = vcmp.eq.s32.totalorder %v8893_v61, %v8864_v6  ;;  %v9073_v25 = vsel %vm9038_vm14, %v8775_v12, -3.4028235e+38 }
 0x39d   : > { %12197 = vst [vmem:[#allocation73_spill] sm:$0xff] %v12196_v38  ;;  %vm9047_vm7 = vmand %vm490_vm6, %vm506_vm3  ;;  %v9063_v9 = vpack.c.bf16 %v6800_v32, %v1540_v46  ;;  %v12204_v0 = vmov 0  ;;  %v479_v61 = vshra.s32 %v9043_v44, 4  ;;  %v6803_v20 = vpop.f32.mrb[42].mxu0  ;;  %v478_v12 = vshra.s32 %v9056_v51, 4 }
 0x39e   : > { %v12200_v4 = vsel %vm9047_vm7, 4294967295, %v12199_v4  ;;  %12202 = vst [vmem:[#allocation76_spill] sm:$0xff] %v9056_v51  ;;  %v9068_v10 = vsel %vm9047_vm7, %v8781_v3, -3.4028235e+38  ;;  %vm9075_vm6 = vmand %vm492_vm8, %vm508_vm5  ;;  %v12207_v3 = vmov 0  ;;  %vm493_vm7 = vcmp.eq.s32.totalorder %v8915_v39, %v8864_v6  ;;  %v1550_v46 = vpop.f32.mrb[43].mxu0 }
 0x39f   : > { %1056 = vmax.xlane.f32.xlu1 %v9004_v56  ;;  %1706 = vmax.xlane.f32.xlu0 %v1705_v2  ;;  %12201 = vst [vmem:[#allocation75_spill] sm:$0xff] %v12200_v4  ;;  %v477_v2 = vshra.s32 %v9026_v5, 4  ;;  %12203 = vst [vmem:[#allocation77_spill] sm:$0xff] %v9063_v9  ;;  %v12205_v0 = vsel %vm9075_vm6, 4294967295, %v12204_v0  ;;  %vm509_vm8 = vcmp.le.s32.totalorder %v8389_v14, %v8663_v52  ;;  %v9093_v32 = vadd.s32 88, %v8391_v15 }
 0x3a0   : > { %12206 = vst [vmem:[#allocation78_spill] sm:$0xff] %v12205_v0  ;;  %6826 = vmatprep.subr.bf16.mxu0 %v9063_v9  ;;  %vm9083_vm3 = vmand %vm491_vm4, %vm507_vm15  ;;  %vm510_vm15 = vcmp.le.s32.totalorder %v8389_v14, %v9026_v5  ;;  %v9101_v27 = vpack.c.bf16 %v6803_v20, %v1550_v46  ;;  %v9107_v39 = vsel %vm9075_vm6, %v8779_v16, -3.4028235e+38  ;;  %vm9119_vm14 = vcmp.eq.s32.totalorder %v479_v61, %v8864_v6  ;;  %v6806_v46 = vpop.f32.mrb[44].mxu0 }
 0x3a1   : > { %v12208_v3 = vsel %vm9083_vm3, 4294967295, %v12207_v3  ;;  %12210 = vst [vmem:[#allocation80_spill] sm:$0xff] %v9093_v32  ;;  %vm494_vm5 = vcmp.eq.s32.totalorder %v477_v2, %v8864_v6  ;;  %6827 = vmatpush3.bf16.msra.mxu0 %v9063_v9  ;;  %v9112_v52 = vsel %vm9083_vm3, %v8785_v18, -3.4028235e+38  ;;  %vm9114_vm4 = vmand %vm493_vm7, %vm509_vm8  ;;  %v12213_v2 = vmov 0  ;;  %v1560_v5 = vpop.f32.mrb[45].mxu0 }
 0x3a2   : > { %12209 = vst [vmem:[#allocation79_spill] sm:$0xff] %v12208_v3  ;;  %12212 = vst [vmem:[#allocation82_spill] sm:$0xff] %v9101_v27  ;;  %v12214_v2 = vsel %vm9114_vm4, 4294967295, %v12213_v2  ;;  %6828 = vmatprep.subr.bf16.mxu0 %v9101_v27  ;;  %v12218_v16 = vmov 0  ;;  %vm512_vm7 = vcmp.le.s32.totalorder %v8389_v14, %v9043_v44  ;;  %vm9133_vm8 = vcmp.eq.s32.totalorder %v478_v12, %v8864_v6 }
 0x3a3   : > { %1060 = vmax.xlane.f32.xlu1 %v9031_v49  ;;  %1058 = vmax.xlane.f32.xlu0 %v9036_v55  ;;  %12215 = vst [vmem:[#allocation83_spill] sm:$0xff] %v12214_v2  ;;  %vm9126_vm6 = vmand %vm494_vm5, %vm510_vm15  ;;  %v480_v61 = vshra.s32 %v9093_v32, 4  ;;  %v9139_v9 = vadd.s32 112, %v8391_v15  ;;  %vm511_vm5 = vcmp.le.s32.totalorder %v8389_v14, %v9056_v51  ;;  %v9147_v44 = vpack.c.bf16 %v6806_v46, %v1560_v5  ;;  %v6809_v5 = vpop.f32.mrb[46].mxu0 }
 0x3a4   : > { %v12219_v16 = vsel %vm9126_vm6, 4294967295, %v12218_v16  ;;  %v9153_v12 = vsel %vm9126_vm6, %v8789_v19, -3.4028235e+38  ;;  %v9158_v43 = vsel %vm9114_vm4, %v8783_v13, -3.4028235e+38  ;;  %vm9162_vm15 = vmand %vm9119_vm14, %vm512_vm7  ;;  %v12226_v51 = vmov 0 }
 0x3a5   : > { %12220 = vst [vmem:[#allocation84_spill] sm:$0xff] %v12219_v16  ;;  %12223 = vst [vmem:[#allocation85_spill] sm:$0xff] %v9139_v9  ;;  %6829 = vmatpush3.bf16.msra.mxu0 %v9101_v27  ;;  %v12227_v51 = vsel %vm9162_vm15, 4294967295, %v12226_v51  ;;  %v12229_v19 = vmov 0  ;;  %vm497_vm4 = vcmp.eq.s32.totalorder %v480_v61, %v8864_v6  ;;  %vm513_vm14 = vcmp.le.s32.totalorder %v8389_v14, %v9093_v32  ;;  %v1570_v46 = vpop.f32.mrb[47].mxu0 }
 0x3a6   : > { %12225 = vst [vmem:[#allocation87_spill] sm:$0xff] %v9147_v44  ;;  %12228 = vst [vmem:[#allocation88_spill] sm:$0xff] %v12227_v51  ;;  %6830 = vmatprep.subr.bf16.mxu0 %v9147_v44  ;;  %v483_v13 = vshra.s32 %v9139_v9, 4  ;;  %v9180_v20 = vadd.s32 120, %v8391_v15  ;;  %vm498_vm7 = vcmp.eq.s32.totalorder %v481_v8, %v8864_v6  ;;  %vm514_vm3 = vcmp.le.s32.totalorder %v8389_v14, %v9099_v63 }
 0x3a7   : > { %1064 = vmax.xlane.f32.xlu1 %v9068_v10  ;;  %1062 = vmax.xlane.f32.xlu0 %v9073_v25  ;;  %vm9171_vm6 = vmand %vm9133_vm8, %vm511_vm5  ;;  %v482_v18 = vshra.s32 %v9145_v7, 4  ;;  %v9186_v27 = vpack.c.bf16 %v6809_v5, %v1570_v46  ;;  %v9192_v61 = vsel %vm9162_vm15, %v8787_v34, -3.4028235e+38  ;;  %v12234_v8 = vmov 0 }
 0x3a8   : > { %v12230_v19 = vsel %vm9171_vm6, 4294967295, %v12229_v19  ;;  %12232 = vst [vmem:[#allocation90_spill] sm:$0xff] %v9180_v20  ;;  %v9197_v32 = vsel %vm9171_vm6, %v8793_v36, -3.4028235e+38  ;;  %vm9199_vm8 = vmand %vm497_vm4, %vm513_vm14  ;;  %v12237_v5 = vmov 0  ;;  %vm500_vm15 = vcmp.eq.s32.totalorder %v483_v13, %v8864_v6 }
 0x3a9   : > { %12231 = vst [vmem:[#allocation89_spill] sm:$0xff] %v12230_v19  ;;  %12233 = vst [vmem:[#allocation91_spill] sm:$0xff] %v9186_v27  ;;  %6831 = vmatpush3.bf16.msra.mxu0 %v9147_v44  ;;  %v12235_v8 = vsel %vm9199_vm8, 4294967295, %v12234_v8  ;;  %vm516_vm6 = vcmp.le.s32.totalorder %v8389_v14, %v9139_v9  ;;  %vm499_vm4 = vcmp.eq.s32.totalorder %v482_v18, %v8864_v6  ;;  %v484_v36 = vshra.s32 %v9180_v20, 4 }
 0x3aa   : > { %12236 = vst [vmem:[#allocation92_spill] sm:$0xff] %v12235_v8  ;;  %6832 = vmatprep.subr.bf16.mxu0 %v9186_v27  ;;  %vm9206_vm5 = vmand %vm498_vm7, %vm514_vm3  ;;  %vm515_vm14 = vcmp.le.s32.totalorder %v8389_v14, %v9145_v7  ;;  %v9226_v13 = vsel %vm9199_vm8, %v8791_v45, -3.4028235e+38  ;;  %v12240_v46 = vmov 0  ;;  %v12243_v18 = vmov 0 }
 0x3ab   : > { %1068 = vmax.xlane.f32.xlu1 %v9107_v39  ;;  %1066 = vmax.xlane.f32.xlu0 %v9112_v52  ;;  %v12238_v5 = vsel %vm9206_vm5, 4294967295, %v12237_v5  ;;  %v9221_v34 = vsel %vm9206_vm5, %v8797_v21, -3.4028235e+38  ;;  %vm9228_vm3 = vmand %vm500_vm15, %vm516_vm6  ;;  %vm501_vm5 = vcmp.eq.s32.totalorder %v484_v36, %v8864_v6  ;;  %vm517_vm1 = vcmp.le.s32.totalorder %v8389_v14, %v9180_v20 }
 0x3ac   : > { %12239 = vst [vmem:[#allocation93_spill] sm:$0xff] %v12238_v5  ;;  %v12241_v46 = vsel %vm9228_vm3, 4294967295, %v12240_v46  ;;  %vm9234_vm7 = vmand %vm499_vm4, %vm515_vm14  ;;  %v9244_v21 = vsel %vm9228_vm3, %v8795_v22, -3.4028235e+38  ;;  %vm12252_vm4 = vnez %v12181_v48 }
 0x3ad   : > { %6833 = vmatpush3.bf16.msra.mxu0 %v9186_v27  ;;  %12242 = vst [vmem:[#allocation94_spill] sm:$0xff] %v12241_v46  ;;  %v12244_v18 = vsel %vm9234_vm7, 4294967295, %v12243_v18  ;;  %v9249_v45 = vsel %vm9234_vm7, %v8801_v58, -3.4028235e+38  ;;  %vm9253_vm6 = vmand %vm501_vm5, %vm517_vm1  ;;  %v12246_v27 = vmov 0  ;;  %vm12249_vm1 = vcmask 523264  }
 0x3ae   : > { %12245 = vst [vmem:[#allocation95_spill] sm:$0xff] %v12244_v18  ;;  %v12247_v27 = vsel %vm9253_vm6, 4294967295, %v12246_v27  ;;  %v9260_v6 = vsel %vm9253_vm6, %v8799_v35, -3.4028235e+38  ;;  %vm12250_vm15 = vmmov %vm12249_vm1  ;;  %v12366_v18 = vld [vmem:[#allocation80_spill] sm:$0xff] }
 0x3af   : > { %1072 = vmax.xlane.f32.xlu1 %v9153_v12  ;;  %1070 = vmax.xlane.f32.xlu0 %v9158_v43  ;;  %12248 = vst [vmem:[#allocation96_spill] sm:$0xff] %v12247_v27  ;;  %vm12251_vm5 = vmmov %vm12249_vm1 }
 0x3b0   : > { %vm12255_vm14 = vmmov %vm12249_vm1 }
 0x3b3   : > { %1076 = vmax.xlane.f32.xlu1 %v9192_v61  ;;  %1074 = vmax.xlane.f32.xlu0 %v9197_v32 }
 0x3b7   : > { %1080 = vmax.xlane.f32.xlu1 %v9221_v34  ;;  %1078 = vmax.xlane.f32.xlu0 %v9226_v13 }
 0x3bb   : > { %1084 = vmax.xlane.f32.xlu1 %v9244_v21  ;;  %1082 = vmax.xlane.f32.xlu0 %v9249_v45 }
 0x3bf   : > { %1086 = vmax.xlane.f32.xlu0 %v9260_v6 }
 0x41c   : > { %v1686_v22 = vpop.xlane.xlu0 %1685 }
 0x41d   : > { %v1708_v36 = vsub.f32 %v8907_v11, %v1686_v22 }
 0x41e   : > { %v1689_v58 = vpop.xlane.xlu1 %1688 }
 0x41f   : > { %v1716_v44 = vmul.f32 1.442695, %v1708_v36  ;;  %v1709_v20 = vsub.f32 %v8923_v47, %v1689_v58 }
 0x420   : > { %v1692_v9 = vpop.xlane.xlu0 %1691 }
 0x421   : > { %8137 = vpow2.f32 %v1716_v44  ;;  %v1718_v7 = vmul.f32 1.442695, %v1709_v20  ;;  %v1710_v63 = vsub.f32 %v8919_v24, %v1692_v9 }
 0x423   : > { %8139 = vpow2.f32 %v1718_v7  ;;  %v1720_v17 = vmul.f32 1.442695, %v1710_v63 }
 0x424   : > { %v1695_v14 = vpop.xlane.xlu0 %1694  ;;  %v1698_v15 = vpop.xlane.xlu1 %1697 }
 0x425   : > { %v1711_v35 = vsub.f32 %v8946_v23, %v1695_v14  ;;  %v1712_v27 = vsub.f32 %v8958_v62, %v1698_v15  ;;  %8141 = vpow2.f32 %v1720_v17 }
 0x427   : > { %v1722_v46 = vmul.f32 1.442695, %v1711_v35  ;;  %v1724_v11 = vmul.f32 1.442695, %v1712_v27 }
 0x428   : > { %v1704_v22 = vpop.xlane.xlu1 %1703  ;;  %v1701_v36 = vpop.xlane.xlu0 %1700 }
 0x429   : > { %8143 = vpow2.f32 %v1722_v46  ;;  %v1714_v47 = vsub.f32 %v8967_v33, %v1704_v22  ;;  %v1713_v44 = vsub.f32 %v8971_v60, %v1701_v36 }
 0x42a   : > { %8145 = vpow2.f32 %v1724_v11 }
 0x42b   : > { %v8138_v20 = vpop.eup %8137  ;;  %v1728_v24 = vmul.f32 1.442695, %v1714_v47  ;;  %v1726_v63 = vmul.f32 1.442695, %v1713_v44 }
 0x42c   : > { %v1057_v7 = vpop.xlane.xlu1 %1056  ;;  %v1707_v9 = vpop.xlane.xlu0 %1706  ;;  %v1732_v17 = vsel %vm8879_vm0, %v8138_v20, 0.0 }
 0x42d   : > { %v8140_v58 = vpop.eup %8139  ;;  %v1088_v14 = vsub.f32 %v9004_v56, %v1057_v7  ;;  %v1715_v15 = vsub.f32 %v8987_v41, %v1707_v9  ;;  %8147 = vpow2.f32 %v1726_v63 }
 0x42e   : > { %v1733_v27 = vsel %vm8899_vm11, %v8140_v58, 0.0  ;;  %8149 = vpow2.f32 %v1728_v24 }
 0x42f   : > { %v1730_v60 = vmul.f32 1.442695, %v1715_v15  ;;  %v9276_v33 = vpack.c.bf16 %v1733_v27, %v1732_v17  ;;  %v8142_v46 = vpop.eup %8141  ;;  %v1104_v35 = vmul.f32 1.442695, %v1088_v14 }
 0x430   : > { %v1061_v23 = vpop.xlane.xlu1 %1060  ;;  %v1059_v62 = vpop.xlane.xlu0 %1058  ;;  %v1734_v36 = vsel %vm8886_vm2, %v8142_v46, 0.0  ;;  %vm12403_vm2 = vcmask 523264  }
 0x431   : > { %v1090_v11 = vsub.f32 %v9031_v49, %v1061_v23  ;;  %v1089_v56 = vsub.f32 %v9036_v55, %v1059_v62  ;;  %6834 = vmatprep.mubr.msk.bf16.mxu0 %vm12249_vm1, %v9276_v33  ;;  %8151 = vpow2.f32 %v1730_v60  ;;  %vm12256_vm1 = vnez %v12185_v42 }
 0x432   : > { %8153 = vpow2.f32 %v1104_v35 }
 0x433   : > { %v8144_v41 = vpop.eup %8143  ;;  %v1106_v22 = vmul.f32 1.442695, %v1089_v56  ;;  %v1108_v44 = vmul.f32 1.442695, %v1090_v11 }
 0x434   : > { %v1735_v47 = vsel %vm8928_vm9, %v8144_v41, 0.0  ;;  %v1065_v20 = vpop.xlane.xlu1 %1064  ;;  %v1063_v24 = vpop.xlane.xlu0 %1062 }
 0x435   : > { %v8146_v63 = vpop.eup %8145  ;;  %v9286_v7 = vpack.c.bf16 %v1735_v47, %v1734_v36  ;;  %v1092_v49 = vsub.f32 %v9068_v10, %v1065_v20  ;;  %v1091_v55 = vsub.f32 %v9073_v25, %v1063_v24  ;;  %8155 = vpow2.f32 %v1106_v22 }
 0x436   : > { %8157 = vpow2.f32 %v1108_v44  ;;  %v1736_v17 = vsel %vm8940_vm10, %v8146_v63, 0.0 }
 0x437   : > { %v1110_v9 = vmul.f32 1.442695, %v1091_v55  ;;  %6835 = vmatmul.mubr.msk.bf16.vlgmr.msra.gmra.mrb[48].mxu0 %vm12250_vm15, %v9286_v7  ;;  %v8148_v58 = vpop.eup %8147  ;;  %v1112_v60 = vmul.f32 1.442695, %v1092_v49  ;;  %vm12257_vm15 = vnez %v12192_v1 }
 0x438   : > { %v1069_v14 = vpop.xlane.xlu1 %1068  ;;  %v1067_v15 = vpop.xlane.xlu0 %1066  ;;  %v1737_v25 = vsel %vm8952_vm13, %v8148_v58, 0.0 }
 0x439   : > { %v8150_v27 = vpop.eup %8149  ;;  %v1094_v23 = vsub.f32 %v9107_v39, %v1069_v14  ;;  %v1093_v10 = vsub.f32 %v9112_v52, %v1067_v15  ;;  %8159 = vpow2.f32 %v1110_v9  ;;  %v9298_v62 = vpack.c.bf16 %v1737_v25, %v1736_v17 }
 0x43a   : > { %v1738_v22 = vsel %vm8948_vm12, %v8150_v27, 0.0  ;;  %8161 = vpow2.f32 %v1112_v60 }
 0x43b   : > { %v1114_v46 = vmul.f32 1.442695, %v1093_v10  ;;  %v8152_v35 = vpop.eup %8151  ;;  %v1116_v11 = vmul.f32 1.442695, %v1094_v23  ;;  %6838 = vmatprep.mubr.msk.bf16.mxu0 %vm12251_vm5, %v9298_v62  ;;  %vm11837_vm5 = vmpackc.low %vm12257_vm15, %vm12256_vm1  ;;  %vm12265_vm15 = vnez %v12208_v3 }
 0x43c   : > { %v1073_v56 = vpop.xlane.xlu1 %1072  ;;  %v1071_v41 = vpop.xlane.xlu0 %1070  ;;  %v1739_v36 = vsel %vm12252_vm4, %v8152_v35, 0.0  ;;  %vm12261_vm4 = vnez %v12196_v38 }
 0x43d   : > { %v1096_v52 = vsub.f32 %v9153_v12, %v1073_v56  ;;  %v1095_v39 = vsub.f32 %v9158_v43, %v1071_v41  ;;  %8163 = vpow2.f32 %v1114_v46  ;;  %v9308_v47 = vpack.c.bf16 %v1739_v36, %v1738_v22  ;;  %v9310_v44 = vpop.eup %8153 }
 0x43e   : > { %12253 = vst [vmem:[#allocation97_spill] sm:$0xff] %v9310_v44  ;;  %8165 = vpow2.f32 %v1116_v11 }
 0x43f   : > { %v1118_v20 = vmul.f32 1.442695, %v1095_v39  ;;  %v9312_v24 = vpop.eup %8155  ;;  %6839 = vmatmul.mubr.msk.bf16.gmra.mrb[52].mxu0 %vm12255_vm14, %v9308_v47  ;;  %v1120_v43 = vmul.f32 1.442695, %v1096_v52  ;;  %vm12260_vm14 = vnez %v12189_v54 }
 0x440   : > { %12254 = vst [vmem:[#allocation98_spill] sm:$0xff] %v9312_v24  ;;  %v1077_v63 = vpop.xlane.xlu1 %1076  ;;  %v1075_v49 = vpop.xlane.xlu0 %1074  ;;  %v5962_v9 = vpack.c.bf16 %v9312_v24, %v9310_v44  ;;  %vm11840_vm13 = vmpackc.low %vm12261_vm4, %vm12260_vm14  ;;  %vm12269_vm4 = vnez %v12214_v2 }
 0x441   : > { %v1098_v12 = vsub.f32 %v9192_v61, %v1077_v63  ;;  %v1097_v55 = vsub.f32 %v9197_v32, %v1075_v49  ;;  %v9324_v58 = vpop.eup %8157  ;;  %8167 = vpow2.f32 %v1118_v20 }
 0x442   : > { %12258 = vst [vmem:[#allocation99_spill] sm:$0xff] %v9324_v58  ;;  %6898 = vmatprep.mubr.msk.bf16.mxu1 %vm11837_vm5, %v5962_v9  ;;  %8169 = vpow2.f32 %v1120_v43  ;;  %vm12264_vm5 = vnez %v12200_v4 }
 0x443   : > { %v1122_v14 = vmul.f32 1.442695, %v1097_v55  ;;  %v9331_v15 = vpop.eup %8159  ;;  %v1124_v17 = vmul.f32 1.442695, %v1098_v12  ;;  %vm11843_vm1 = vmpackc.low %vm12265_vm15, %vm12264_vm5  ;;  %vm12273_vm15 = vnez %v12230_v19 }
 0x444   : > { %12259 = vst [vmem:[#allocation100_spill] sm:$0xff] %v9331_v15  ;;  %v1081_v27 = vpop.xlane.xlu1 %1080  ;;  %v1079_v61 = vpop.xlane.xlu0 %1078  ;;  %v5965_v32 = vpack.c.bf16 %v9331_v15, %v9324_v58  ;;  %v12326_v58 = vmov 0.0  }
 0x445   : > { %v1100_v60 = vsub.f32 %v9221_v34, %v1081_v27  ;;  %v1099_v23 = vsub.f32 %v9226_v13, %v1079_v61  ;;  %8171 = vpow2.f32 %v1122_v14  ;;  %v9341_v10 = vpop.eup %8161 }
 0x446   : > { %12262 = vst [vmem:[#allocation101_spill] sm:$0xff] %v9341_v10  ;;  %6899 = vmatmul.mubr.msk.bf16.vlgmr.msra.gmra.mrb[32].mxu1 %vm11840_vm13, %v5965_v32  ;;  %8173 = vpow2.f32 %v1124_v17  ;;  %vm12268_vm13 = vnez %v12205_v0  ;;  %v12284_v32 = vld [vmem:[#allocation4_spill] sm:$0xff] }
 0x447   : > { %v1126_v25 = vmul.f32 1.442695, %v1099_v23  ;;  %v9348_v46 = vpop.eup %8163  ;;  %7657 = vmatpush3.bf16.msra.mxu1 %v8803_v50  ;;  %v1128_v34 = vmul.f32 1.442695, %v1100_v60  ;;  %vm11846_vm14 = vmpackc.low %vm12269_vm4, %vm12268_vm13  ;;  %v607_v60 = vand.u32 1, %v12284_v32  ;;  %v639_v23 = vshra.s32 %v12284_v32, 1 }
 0x448   : > { %12263 = vst [vmem:[#allocation102_spill] sm:$0xff] %v9348_v46  ;;  %v1085_v35 = vpop.xlane.xlu1 %1084  ;;  %v1083_v11 = vpop.xlane.xlu0 %1082  ;;  %7659 = vmatprep.subr.bf16.mxu1 %v8809_v31  ;;  %v5968_v41 = vpack.c.bf16 %v9348_v46, %v9341_v10 }
 0x449   : > { %v1102_v13 = vsub.f32 %v9244_v21, %v1085_v35  ;;  %v1101_v56 = vsub.f32 %v9249_v45, %v1083_v11  ;;  %v9360_v22 = vpop.eup %8165  ;;  %8175 = vpow2.f32 %v1126_v25  ;;  %v12285_v25 = vld [vmem:[#allocation3_spill] sm:$0xff]  ;;  %v11864_v35 = vmov 0.0  }
 0x44a   : > { %12266 = vst [vmem:[#allocation103_spill] sm:$0xff] %v9360_v22  ;;  %6902 = vmatprep.mubr.msk.bf16.mxu1 %vm11843_vm1, %v5968_v41  ;;  %8177 = vpow2.f32 %v1128_v34  ;;  %vm12272_vm1 = vnez %v12219_v16  ;;  %v12288_v34 = vld [vmem:[#allocation5_spill] sm:$0xff]  ;;  %v618_v16 = vand.u32 1, %v12366_v18 }
 0x44b   : > { %v1130_v50 = vmul.f32 1.442695, %v1101_v56  ;;  %v9367_v52 = vpop.eup %8167  ;;  %v1132_v39 = vmul.f32 1.442695, %v1102_v13  ;;  %7661 = vmatpush3.bf16.msra.mxu1 %v8809_v31  ;;  %vm11848_vm5 = vmpackc.low %vm12273_vm15, %vm12272_vm1  ;;  %v12291_v56 = vld [vmem:[#allocation38_spill] sm:$0xff] }
 0x44c   : > { %12267 = vst [vmem:[#allocation104_spill] sm:$0xff] %v9367_v52  ;;  %v1087_v21 = vpop.xlane.xlu0 %1086  ;;  %7663 = vmatprep.subr.bf16.mxu1 %v8815_v59  ;;  %v5971_v36 = vpack.c.bf16 %v9367_v52, %v9360_v22  ;;  %v9378_v20 = vpop.eup %8169 }
 0x44d   : > { %v1103_v45 = vsub.f32 %v9260_v6, %v1087_v21  ;;  %8179 = vpow2.f32 %v1130_v50  ;;  %12270 = vst [vmem:[#allocation105_spill] sm:$0xff] %v9378_v20  ;;  %v12296_v50 = vld [vmem:[#allocation50_spill] sm:$0xff]  ;;  %v12299_v21 = vld [vmem:[#allocation51_spill] sm:$0xff] }
 0x44e   : > { %6903 = vmatmul.mubr.msk.bf16.gmra.mrb[36].mxu1 %vm11846_vm14, %v5971_v36  ;;  %8181 = vpow2.f32 %v1132_v39  ;;  %vm12276_vm14 = vnez %v12227_v51 }
 0x44f   : > { %v1134_v63 = vmul.f32 1.442695, %v1103_v45  ;;  %v9385_v31 = vpop.eup %8171  ;;  %7665 = vmatpush3.bf16.msra.mxu1 %v8815_v59  ;;  %vm11850_vm4 = vmpackc.low %vm9199_vm8, %vm12276_vm14  ;;  %vm12287_vm14 = vcmask 523264   ;;  %vm12289_vm8 = vnez %v12288_v34 }
 0x450   : > { %12271 = vst [vmem:[#allocation106_spill] sm:$0xff] %v9385_v31  ;;  %7667 = vmatprep.subr.bf16.mxu1 %v8819_v40  ;;  %v5974_v6 = vpack.c.bf16 %v9385_v31, %v9378_v20  ;;  %v9395_v49 = vpop.eup %8173  ;;  %v9457_v13 = vsel %vm12289_vm8, 0.5, %v11864_v35 }
 0x451   : > { %8183 = vpow2.f32 %v1134_v63  ;;  %12274 = vst [vmem:[#allocation107_spill] sm:$0xff] %v9395_v49  ;;  %12290 = vst [vmem:[#allocation5_spill] sm:$0xff] %v9457_v13 }
 0x452   : > { %6906 = vmatprep.mubr.msk.bf16.mxu1 %vm11848_vm5, %v5974_v6  ;;  %vm12279_vm5 = vnez %v12238_v5  ;;  %v650_v5 = vshra.s32 %v12366_v18, 1 }
 0x453   : > { %v9402_v59 = vpop.eup %8175  ;;  %7669 = vmatpush3.bf16.msra.mxu1 %v8819_v40  ;;  %vm11853_vm15 = vmpackc.low %vm9234_vm7, %vm12279_vm5  ;;  %vm623_vm7 = vcmp.eq.s32.totalorder %v607_v60, 1 }
 0x454   : > { %12275 = vst [vmem:[#allocation108_spill] sm:$0xff] %v9402_v59  ;;  %v5977_v43 = vpack.c.bf16 %v9402_v59, %v9395_v49  ;;  %v9411_v12 = vpop.eup %8177 }
 0x455   : > { %12277 = vst [vmem:[#allocation109_spill] sm:$0xff] %v9411_v12 }
 0x456   : > { %6907 = vmatmul.mubr.msk.bf16.gmra.mrb[40].mxu1 %vm11850_vm4, %v5977_v43  ;;  %vm11858_vm4 = vmpackc.low %vm9253_vm6, %vm9228_vm3 }
 0x457   : > { %v9418_v55 = vpop.eup %8179  ;;  %vm12294_vm3 = vmmov %vm12287_vm14 }
 0x458   : > { %12278 = vst [vmem:[#allocation110_spill] sm:$0xff] %v9418_v55  ;;  %v5980_v40 = vpack.c.bf16 %v9418_v55, %v9411_v12  ;;  %v9426_v9 = vpop.eup %8181  ;;  %vm12303_vm6 = vmmov %vm12294_vm3  ;;  %v12305_v55 = vld [vmem:[#allocation47_spill] sm:$0xff] }
 0x459   : > { %12280 = vst [vmem:[#allocation111_spill] sm:$0xff] %v9426_v9  ;;  %v609_v49 = vand.u32 1, %v12305_v55  ;;  %v641_v20 = vshra.s32 %v12305_v55, 1 }
 0x45a   : > { %6910 = vmatprep.mubr.msk.bf16.mxu1 %vm11853_vm15, %v5980_v40  ;;  %vm655_vm15 = vcmp.eq.s32.totalorder %v639_v23, %v12285_v25 }
 0x45b   : > { %v9428_v14 = vpop.eup %8183  ;;  %vm671_vm5 = vmand %vm655_vm15, %vm623_vm7  ;;  %vm12297_vm15 = vnez %v12296_v50 }
 0x45c   : > { %12281 = vst [vmem:[#allocation112_spill] sm:$0xff] %v9428_v14  ;;  %v5983_v61 = vpack.c.bf16 %v9428_v14, %v9426_v9  ;;  %v9450_v11 = vsel %vm671_vm5, 1.0, %v11864_v35  ;;  %vm12295_vm7 = vmmov %vm12294_vm3  ;;  %v9471_v39 = vsel %vm12297_vm15, 0.5, %v11864_v35  ;;  %vm12300_vm5 = vnez %v12299_v21  ;;  %v12304_v9 = vld [vmem:[#allocation33_spill] sm:$0xff] }
 0x45d   : > { %12286 = vst [vmem:[#allocation3_spill] sm:$0xff] %v9450_v11  ;;  %6858 = vmatprep.mubr.msk.f32.mxu0 %vm12287_vm14, %v9450_v11  ;;  %12298 = vst [vmem:[#allocation50_spill] sm:$0xff] %v9471_v39  ;;  %v9476_v45 = vsel %vm12300_vm5, 0.5, %v11864_v35  ;;  %v640_v12 = vshra.s32 %v12304_v9, 1 }
 0x45e   : > { %6911 = vmatmul.mubr.msk.bf16.gmra.mrb[44].mxu1 %vm11858_vm4, %v5983_v61  ;;  %vm12292_vm4 = vnez %v12291_v56  ;;  %12301 = vst [vmem:[#allocation51_spill] sm:$0xff] %v9476_v45  ;;  %vm12302_vm14 = vmmov %vm12294_vm3 }
 0x45f   : > { %v9462_v41 = vsel %vm12292_vm4, 0.5, %v11864_v35  ;;  %6971 = vmatprep.mubr.msk.f32.mxu1 %vm12294_vm3, %v9457_v13  ;;  %v608_v35 = vand.u32 1, %v12304_v9 }
 0x460   : > { %12293 = vst [vmem:[#allocation38_spill] sm:$0xff] %v9462_v41 }
 0x461   : > { %vm9487_vm3 = vcmp.eq.s32.totalorder %v608_v35, 1 }
 0x466   : > { %6972 = vmatmul.mubr.msk.f32.vlgmr.msra.gmra.mrb[48].mxu1 %vm12295_vm7, %v9462_v41  ;;  %vm9497_vm7 = vcmp.eq.s32.totalorder %v609_v49, 1 }
 0x467   : > { %6974 = vmatprep.mubr.msk.f32.mxu1 %vm12302_vm14, %v9471_v39  ;;  %vm9502_vm14 = vcmp.eq.s32.totalorder %v641_v20, %v12285_v25  ;;  %v12333_v20 = vld [vmem:[#allocation57_spill] sm:$0xff] }
 0x468   : > { %vm673_vm12 = vmand %vm9502_vm14, %vm9497_vm7  ;;  %v646_v24 = vshra.s32 %v12333_v20, 1 }
 0x469   : > { %v9550_v15 = vsel %vm673_vm12, 1.0, %v12326_v58 }
 0x46a   : > { %6975 = vmatmul.mubr.msk.f32.gmra.mrb[50].mxu1 %vm12303_vm6, %v9476_v45  ;;  %vm9492_vm6 = vcmp.eq.s32.totalorder %v640_v12, %v12285_v25  ;;  %12328 = vst [vmem:[#allocation47_spill] sm:$0xff] %v9550_v15 }
 0x46b   : > { %vm672_vm1 = vmand %vm9492_vm6, %vm9487_vm3 }
 0x46c   : > { %v9547_v44 = vsel %vm672_vm1, 1.0, %v12326_v58 }
 0x46d   : > { %12327 = vst [vmem:[#allocation33_spill] sm:$0xff] %v9547_v44 }
 0x50a   : > { %v6836_v36 = vpop.f32.mrb[48].mxu0 }
 0x50b   : > { %v1794_v63 = vpop.f32.mrb[49].mxu0 }
 0x50c   : > { %v6837_v6 = vpop.f32.mrb[50].mxu0 }
 0x50d   : > { %v7610_v43 = vpack.c.bf16 %v6837_v6, %v6836_v36  ;;  %v1797_v40 = vpop.f32.mrb[51].mxu0  ;;  %v12306_v6 = vld [vmem:[#allocation48_spill] sm:$0xff] }
 0x50e   : > { %v7606_v61 = vpack.c.bf16 %v1797_v40, %v1794_v63  ;;  %v610_v63 = vand.u32 1, %v12306_v6  ;;  %v12320_v40 = vld [vmem:[#allocation53_spill] sm:$0xff] }
 0x50f   : > { %v612_v10 = vand.u32 1, %v12320_v40 }
 0x510   : > { %7607 = vmatprep.subr.bf16.mxu0 %v7606_v61  ;;  %vm9516_vm13 = vcmp.eq.s32.totalorder %v610_v63, 1 }
 0x511   : > { %7609 = vmatpush3.bf16.msra.mxu0 %v7606_v61  ;;  %v644_v61 = vshra.s32 %v12320_v40, 1  ;;  %vm9561_vm9 = vcmp.eq.s32.totalorder %v612_v10, 1 }
 0x512   : > { %7611 = vmatprep.subr.bf16.mxu0 %v7610_v43  ;;  %v6840_v60 = vpop.f32.mrb[52].mxu0 }
 0x513   : > { %v1810_v23 = vpop.f32.mrb[53].mxu0  ;;  %vm9566_vm12 = vcmp.eq.s32.totalorder %v644_v61, %v12285_v25  ;;  %v12339_v61 = vld [vmem:[#allocation72_spill] sm:$0xff] }
 0x514   : > { %v6841_v14 = vpop.f32.mrb[54].mxu0  ;;  %v615_v22 = vand.u32 1, %v12339_v61  ;;  %vm676_vm11 = vmand %vm9566_vm12, %vm9561_vm9  ;;  %vm12352_vm9 = vcmask 523264  }
 0x515   : > { %7613 = vmatpush3.bf16.msra.mxu0 %v7610_v43  ;;  %v7618_v59 = vpack.c.bf16 %v6841_v14, %v6840_v60  ;;  %v1813_v31 = vpop.f32.mrb[55].mxu0  ;;  %v642_v43 = vshra.s32 %v12306_v6, 1  ;;  %v12315_v14 = vld [vmem:[#allocation52_spill] sm:$0xff] }
 0x516   : > { %v7614_v36 = vpack.c.bf16 %v1813_v31, %v1810_v23  ;;  %v611_v35 = vand.u32 1, %v12315_v14  ;;  %v643_v60 = vshra.s32 %v12315_v14, 1  ;;  %v12325_v31 = vld [vmem:[#allocation56_spill] sm:$0xff] }
 0x517   : > { %vm9527_vm10 = vcmp.eq.s32.totalorder %v642_v43, %v12285_v25  ;;  %v613_v43 = vand.u32 1, %v12325_v31  ;;  %v645_v46 = vshra.s32 %v12325_v31, 1 }
 0x518   : > { %7615 = vmatprep.subr.bf16.mxu0 %v7614_v36  ;;  %vm9535_vm3 = vcmp.eq.s32.totalorder %v611_v35, 1  ;;  %vm9540_vm6 = vcmp.eq.s32.totalorder %v643_v60, %v12285_v25  ;;  %vm674_vm7 = vmand %vm9527_vm10, %vm9516_vm13  ;;  %v11889_v35 = vmov 0.0|0.0   ;;  %vm12334_vm10 = vcmask 523264  }
 0x519   : > { %7617 = vmatpush3.bf16.msra.mxu0 %v7614_v36  ;;  %v9508_v12 = vpop.f32.mrb[32].mxu1  ;;  %vm675_vm14 = vmand %vm9540_vm6, %vm9535_vm3  ;;  %v614_v36 = vand.u32 1, %v12333_v20  ;;  %vm9574_vm13 = vcmp.eq.s32.totalorder %v613_v43, 1  ;;  %vm9579_vm1 = vcmp.eq.s32.totalorder %v645_v46, %v12285_v25  ;;  %v12343_v43 = vmov 0 }
 0x51a   : > { %7619 = vmatprep.subr.bf16.mxu0 %v7618_v59  ;;  %v9510_v23 = vpop.f32.mrb[33].mxu1  ;;  %vm12340_vm3 = vmmov %vm12334_vm10  ;;  %v9601_v27 = vsel %vm675_vm14, 1.0, %v12326_v58  ;;  %vm9628_vm14 = vcmp.eq.s32.totalorder %v615_v22, 1 }
 0x51b   : > { %v9520_v49 = vpop.f32.mrb[34].mxu1  ;;  %vm12342_vm6 = vmmov %vm12340_vm3  ;;  %12346 = vst [vmem:[#allocation53_spill] sm:$0xff] %v9601_v27 }
 0x51c   : > { %v9533_v63 = vpop.f32.mrb[35].mxu1 }
 0x51d   : > { %7621 = vmatpush3.bf16.msra.mxu0 %v7618_v59  ;;  %v12351_v59 = vld [vmem:[#allocation76_spill] sm:$0xff] }
 0x51e   : > { %7622 = vmatprep.subr.bf16.mxu0 %v11889_v35  ;;  %v647_v35 = vshra.s32 %v12339_v61, 1  ;;  %v616_v51 = vand.u32 1, %v12351_v59  ;;  %v648_v60 = vshra.s32 %v12351_v59, 1 }
 0x520   : > { %6859 = vmatmul.mubr.msk.f32.vlgmr.msra.gmra.mrb[56].mxu0 %vm12334_vm10, %v9547_v44  ;;  %v9590_v44 = vsel %vm674_vm7, 1.0, %v12326_v58  ;;  %vm9594_vm10 = vmpackc.low %vm12342_vm6, %vm12342_vm6  ;;  %vm9618_vm6 = vcmp.eq.s32.totalorder %v646_v24, %v12285_v25  ;;  %vm9633_vm12 = vcmp.eq.s32.totalorder %v647_v35, %v12285_v25  ;;  %v12357_v24 = vld [vmem:[#allocation74_spill] sm:$0xff]  ;;  %v12361_v35 = vmov 0.0|0.0  }
 0x521   : > { %v9585_v17 = vpop.f32.mrb[36].mxu1  ;;  %6861 = vmatprep.mubr.msk.f32.mxu0 %vm12340_vm3, %v9550_v15  ;;  %12341 = vst [vmem:[#allocation48_spill] sm:$0xff] %v9590_v44  ;;  %v12344_v43 = vsel %vm9594_vm10, 4294967295, %v12343_v43  ;;  %vm677_vm7 = vmand %vm9579_vm1, %vm9574_vm13  ;;  %vm9613_vm3 = vcmp.eq.s32.totalorder %v614_v36, 1  ;;  %v617_v8 = vand.u32 1, %v12357_v24  ;;  %v649_v19 = vshra.s32 %v12357_v24, 1 }
 0x522   : > { %12345 = vst [vmem:[#allocation52_spill] sm:$0xff] %v12344_v43  ;;  %v9598_v46 = vpop.f32.mrb[37].mxu1  ;;  %vm12358_vm13 = vmmov %vm12352_vm9  ;;  %v9648_v22 = vsel %vm677_vm7, 1.0, %v12326_v58  ;;  %vm12367_vm7 = vcmask 523264  }
 0x523   : > { %v9607_v15 = vpop.f32.mrb[38].mxu1  ;;  %12360 = vst [vmem:[#allocation57_spill] sm:$0xff] %v9648_v22  ;;  %vm678_vm1 = vmand %vm9618_vm6, %vm9613_vm3  ;;  %vm9672_vm3 = vcmp.eq.s32.totalorder %v617_v8, 1  ;;  %vm9677_vm6 = vcmp.eq.s32.totalorder %v649_v19, %v12285_v25 }
 0x524   : > { %6862 = vmatmul.mubr.msk.f32.gmra.mrb[58].mxu0 %vm12352_vm9, %v9590_v44  ;;  %v9626_v52 = vpop.f32.mrb[39].mxu1  ;;  %v9642_v44 = vsel %vm676_vm11, 1.0, %v12326_v58  ;;  %vm679_vm11 = vmand %vm9633_vm12, %vm9628_vm14  ;;  %vm9659_vm9 = vcmp.eq.s32.totalorder %v616_v51, 1  ;;  %v12414_v51 = vld [vmem:[#allocation61_spill] sm:$0xff] }
 0x525   : > { %6864 = vmatprep.mubr.msk.f32.mxu0 %vm12358_vm13, %v9601_v27  ;;  %12359 = vst [vmem:[#allocation56_spill] sm:$0xff] %v9642_v44  ;;  %vm9664_vm13 = vcmp.eq.s32.totalorder %v648_v60, %v12285_v25  ;;  %v12372_v60 = vld [vmem:[#allocation81_spill] sm:$0xff]  ;;  %vm12373_vm14 = vmmov %vm12367_vm7  ;;  %v9693_v3 = vsel %vm679_vm11, 1.0, %v12326_v58  ;;  %v12380_v27 = vld [vmem:[#allocation86_spill] sm:$0xff]  ;;  %vm12381_vm11 = vcmask 523264  }
 0x526   : > { %7625 = vmatpush3.bf16.xpose.msk.msra.mxu0 %vm9594_vm10, %v9276_v33  ;;  %v619_v36 = vand.u32 1, %v12372_v60  ;;  %v651_v2 = vshra.s32 %v12372_v60, 1  ;;  %12375 = vst [vmem:[#allocation76_spill] sm:$0xff] %v9693_v3  ;;  %vm680_vm12 = vmand %vm9664_vm13, %vm9659_vm9  ;;  %v620_v38 = vand.u32 1, %v12380_v27  ;;  %v652_v33 = vshra.s32 %v12380_v27, 1 }
 0x527   : > { %7626 = vmatprep.subr.bf16.mxu0 %v12361_v35 }
 0x528   : > { %6865 = vmatmul.mubr.msk.f32.gmra.mrb[60].mxu0 %vm12367_vm7, %v9642_v44  ;;  %v9688_v44 = vsel %vm678_vm1, 1.0, %v12326_v58  ;;  %vm681_vm7 = vmand %vm9677_vm6, %vm9672_vm3  ;;  %vm9710_vm1 = vcmp.eq.s32.totalorder %v650_v5, %v12285_v25  ;;  %vm9720_vm9 = vcmp.eq.s32.totalorder %v619_v36, 1  ;;  %vm9725_vm13 = vcmp.eq.s32.totalorder %v651_v2, %v12285_v25  ;;  %v12386_v5 = vld [vmem:[#allocation85_spill] sm:$0xff] }
 0x529   : > { %v9683_v0 = vpop.f32.mrb[40].mxu1  ;;  %6867 = vmatprep.mubr.msk.f32.mxu0 %vm12373_vm14, %v9648_v22  ;;  %12374 = vst [vmem:[#allocation72_spill] sm:$0xff] %v9688_v44  ;;  %vm9705_vm14 = vcmp.eq.s32.totalorder %v618_v16, 1  ;;  %v621_v54 = vand.u32 1, %v12386_v5  ;;  %v653_v1 = vshra.s32 %v12386_v5, 1  ;;  %vm12387_vm3 = vmmov %vm12381_vm11  ;;  %v9740_v36 = vsel %vm681_vm7, 1.0, %v12326_v58 }
 0x52a   : > { %v9690_v8 = vpop.f32.mrb[41].mxu1  ;;  %12389 = vst [vmem:[#allocation80_spill] sm:$0xff] %v9740_v36  ;;  %vm682_vm6 = vmand %vm9710_vm1, %vm9705_vm14  ;;  %v12394_v22 = vld [vmem:[#allocation90_spill] sm:$0xff]  ;;  %vm12395_vm7 = vcmask 523264  }
 0x52b   : > { %v9699_v19 = vpop.f32.mrb[42].mxu1  ;;  %v654_v4 = vshra.s32 %v12394_v22, 1  ;;  %vm9764_vm14 = vcmp.eq.s32.totalorder %v621_v54, 1  ;;  %vm9769_vm1 = vcmp.eq.s32.totalorder %v653_v1, %v12285_v25  ;;  %v9778_v16 = vsel %vm682_vm6, 1.0, %v12326_v58 }
 0x52c   : > { %6868 = vmatmul.mubr.msk.f32.gmra.mrb[62].mxu0 %vm12381_vm11, %v9688_v44  ;;  %v9718_v10 = vpop.f32.mrb[43].mxu1  ;;  %v9734_v44 = vsel %vm680_vm12, 1.0, %v12326_v58  ;;  %vm683_vm12 = vmand %vm9725_vm13, %vm9720_vm9  ;;  %vm9751_vm11 = vcmp.eq.s32.totalorder %v620_v38, 1  ;;  %12401 = vst [vmem:[#allocation81_spill] sm:$0xff] %v9778_v16  ;;  %v12415_v38 = vld [vmem:[#allocation62_spill] sm:$0xff] }
 0x52d   : > { %6870 = vmatprep.mubr.msk.f32.mxu0 %vm12387_vm3, %v9693_v3  ;;  %12388 = vst [vmem:[#allocation74_spill] sm:$0xff] %v9734_v44  ;;  %vm9756_vm3 = vcmp.eq.s32.totalorder %v652_v33, %v12285_v25  ;;  %v622_v3 = vand.u32 1, %v12394_v22  ;;  %vm12400_vm9 = vmmov %vm12395_vm7  ;;  %v9783_v54 = vsel %vm683_vm12, 1.0, %v12326_v58  ;;  %vm670_vm6 = vcmp.eq.s32.totalorder %v654_v4, %v12285_v25 }
 0x52e   : > { %7629 = vmatpush3.bf16.xpose.msk.msra.mxu0 %vm9594_vm10, %v9286_v7  ;;  %12402 = vst [vmem:[#allocation86_spill] sm:$0xff] %v9783_v54  ;;  %vm684_vm13 = vmand %vm9756_vm3, %vm9751_vm11  ;;  %v12411_v4 = vmov 1.0  }
 0x52f   : > { %7630 = vmatprep.subr.bf16.mxu0 %v12361_v35  ;;  %vm12404_vm12 = vmmov %vm12403_vm2  ;;  %v9803_v2 = vsel %vm684_vm13, 1.0, %v12326_v58 }
 0x530   : > { %6871 = vmatmul.mubr.msk.f32.gmra.mrb[64].mxu0 %vm12395_vm7, %v9734_v44  ;;  %vm685_vm7 = vmand %vm9769_vm1, %vm9764_vm14  ;;  %12405 = vst [vmem:[#allocation85_spill] sm:$0xff] %v9803_v2  ;;  %vm11977_vm1 = vmmov 0  }
 0x531   : > { %v9773_v33 = vpop.f32.mrb[44].mxu1  ;;  %6873 = vmatprep.mubr.msk.f32.mxu0 %vm12400_vm9, %v9740_v36  ;;  %vm638_vm9 = vcmp.eq.s32.totalorder %v622_v3, 1  ;;  %v9809_v7 = vsel %vm685_vm7, 1.0, %v12326_v58  ;;  %vm12407_vm3 = vmmov %vm12403_vm2 }
 0x532   : > { %v9780_v42 = vpop.f32.mrb[45].mxu1  ;;  %12406 = vst [vmem:[#allocation90_spill] sm:$0xff] %v9809_v7  ;;  %vm686_vm11 = vmand %vm670_vm6, %vm638_vm9 }
 0x533   : > { %v9789_v1 = vpop.f32.mrb[46].mxu1  ;;  %v9817_v3 = vsel %vm686_vm11, 1.0, %v12326_v58  ;;  %vm12409_vm14 = vmmov %vm12403_vm2  ;;  %vm12424_vm11 = vcmask 261120  }
 0x534   : > { %6874 = vmatmul.mubr.msk.f32.gmra.mrb[66].mxu0 %vm12403_vm2, %v9778_v16  ;;  %v9798_v36 = vpop.f32.mrb[47].mxu1  ;;  %12408 = vst [vmem:[#allocation113_spill] sm:$0xff] %v9817_v3  ;;  %vm12412_vm13 = vmmov %vm12403_vm2 }
 0x535   : > { %6876 = vmatprep.mubr.msk.f32.mxu0 %vm12404_vm12, %v9783_v54  ;;  %vm12413_vm7 = vmmov %vm12403_vm2 }
 0x536   : > { %7633 = vmatpush3.bf16.xpose.msk.msra.mxu0 %vm9594_vm10, %v9298_v62  ;;  %v12410_v62 = vld [vmem:[#allocation60_spill] sm:$0xff]  ;;  %vm12418_vm9 = vmmov %vm12403_vm2 }
 0x537   : > { %7634 = vmatprep.subr.bf16.mxu0 %v12361_v35  ;;  %vm12419_vm6 = vmmov %vm12403_vm2 }
 0x538   : > { %6877 = vmatmul.mubr.msk.f32.gmra.mrb[68].mxu0 %vm12403_vm2, %v9803_v2  ;;  %vm12421_vm12 = vmmov %vm12403_vm2 }
 0x539   : > { %6879 = vmatprep.mubr.msk.f32.mxu0 %vm12407_vm3, %v9809_v7  ;;  %vm12425_vm2 = vmmov %vm12424_vm11 }
 0x53a   : > { %vm12426_vm3 = vmmov %vm12425_vm2 }
 0x53c   : > { %6880 = vmatmul.mubr.msk.f32.gmra.mrb[70].mxu0 %vm12409_vm14, %v9817_v3  ;;  %v12416_v3 = vld [vmem:[#allocation63_spill] sm:$0xff]  ;;  %vm12427_vm14 = vmmov %vm12425_vm2 }
 0x53d   : > { %6930 = vmatprep.mubr.msk.f32.mxu0 %vm11977_vm1, %v12326_v58 }
 0x53e   : > { %7637 = vmatpush3.bf16.xpose.msk.msra.mxu0 %vm9594_vm10, %v9308_v47  ;;  %v12417_v47 = vld [vmem:[#allocation77_spill] sm:$0xff]  ;;  %vm12502_vm10 = vcmask 261120  }
 0x53f   : > { %7639 = vmatprep.subr.bf16.mxu0 %v12410_v62 }
 0x545   : > { %6931 = vmatmul.mubr.msk.f32.vlgmr.msra.gmra.mrb[72].mxu0 %vm12412_vm13, %v12411_v4  ;;  %vm12431_vm13 = vmmov %vm12419_vm6 }
 0x546   : > { %7641 = vmatpush3.bf16.msra.mxu0 %v12410_v62  ;;  %6949 = vmatprep.mubr.msk.f32.mxu0 %vm12413_vm7, %v9457_v13  ;;  %v12420_v62 = vld [vmem:[#allocation82_spill] sm:$0xff]  ;;  %vm12432_vm7 = vmmov %vm12419_vm6  ;;  %v12451_v13 = vld [vmem:[#allocation25_spill] sm:$0xff] }
 0x547   : > { %7643 = vmatprep.subr.bf16.mxu0 %v12414_v51 }
 0x54a   : > { %7645 = vmatpush3.bf16.msra.mxu0 %v12414_v51  ;;  %v12422_v51 = vld [vmem:[#allocation87_spill] sm:$0xff] }
 0x54b   : > { %7647 = vmatprep.subr.bf16.mxu0 %v12415_v38 }
 0x54e   : > { %7649 = vmatpush3.bf16.msra.mxu0 %v12415_v38  ;;  %v6973_v38 = vpop.f32.mrb[48].mxu1 }
 0x54f   : > { %7651 = vmatprep.subr.bf16.mxu0 %v12416_v3 }
 0x552   : > { %7653 = vmatpush3.bf16.msra.mxu0 %v12416_v3  ;;  %v12423_v3 = vld [vmem:[#allocation91_spill] sm:$0xff] }
 0x553   : > { %7671 = vmatprep.subr.bf16.mxu0 %v12417_v47 }
 0x555   : > { %6950 = vmatmul.mubr.msk.f32.vlgmr.msra.gmra.mrb[74].mxu0 %vm12418_vm9, %v9462_v41  ;;  %vm12433_vm9 = vmmov %vm12419_vm6 }
 0x556   : > { %7673 = vmatpush3.bf16.msra.mxu0 %v12417_v47  ;;  %6952 = vmatprep.mubr.msk.f32.mxu0 %vm12419_vm6, %v9471_v39  ;;  %v2459_v47 = vpop.f32.mrb[49].mxu1 }
 0x557   : > { %7675 = vmatprep.subr.bf16.mxu0 %v12420_v62  ;;  %v2577_v7 = vpack.c.bf16 %v6973_v38, %v2459_v47  ;;  %v6976_v54 = vpop.f32.mrb[50].mxu1 }
 0x558   : > { %v2469_v16 = vpop.f32.mrb[51].mxu1 }
 0x559   : > { %6953 = vmatmul.mubr.msk.f32.gmra.mrb[76].mxu0 %vm12421_vm12, %v9476_v45  ;;  %v2586_v2 = vsel %vm12424_vm11, %v2577_v7, 0  ;;  %7926 = vmatprep.subr.msk.bf16.mxu1 %vm12425_vm2, %v2577_v7  ;;  %v2578_v44 = vpack.c.bf16 %v6976_v54, %v2469_v16  ;;  %v9865_v7 = vsel %vm12292_vm4, 1.0, %v12326_v58  ;;  %v9870_v16 = vsel %vm12297_vm15, 1.0, %v12326_v58  ;;  %vm12438_vm12 = vmmov %vm12425_vm2 }
 0x55a   : > { %7677 = vmatpush3.bf16.msra.mxu0 %v12420_v62  ;;  %7000 = vmatpush3.bf16.xpose.msra.mxu1 %v2586_v2  ;;  %12429 = vst [vmem:[#allocation61_spill] sm:$0xff] %v9865_v7  ;;  %12430 = vst [vmem:[#allocation62_spill] sm:$0xff] %v9870_v16 }
 0x55b   : > { %7679 = vmatprep.subr.bf16.mxu0 %v12422_v51  ;;  %v2589_v62 = vsel %vm12426_vm3, %v2578_v44, 0  ;;  %7927 = vmatprep.subr.msk.bf16.mxu1 %vm12427_vm14, %v2578_v44  ;;  %v9881_v44 = vsel %vm12300_vm5, 1.0, %v12326_v58  ;;  %vm12439_vm11 = vmmov %vm12425_vm2  ;;  %vm12440_vm3 = vnez %v12159_v26  ;;  %vm12441_vm14 = vnez %v12163_v29 }
 0x55c   : > { %12434 = vst [vmem:[#allocation63_spill] sm:$0xff] %v9881_v44 }
 0x55e   : > { %7681 = vmatpush3.bf16.msra.mxu0 %v12422_v51  ;;  %v9860_v51 = vsel %vm12289_vm8, 1.0, %v12326_v58 }
 0x55f   : > { %7683 = vmatprep.subr.bf16.mxu0 %v12423_v3  ;;  %12428 = vst [vmem:[#allocation60_spill] sm:$0xff] %v9860_v51  ;;  %6993 = vmatprep.mubr.msk.f32.mxu0 %vm12431_vm13, %v9860_v51  ;;  %vm12442_vm13 = vmmov %vm12425_vm2 }
 0x562   : > { %7685 = vmatpush3.bf16.msra.mxu0 %v12423_v3  ;;  %7002 = vmatpush3.bf16.xpose.msra.mxu1 %v2589_v62 }
 0x563   : > { %7694 = vmatprep.subr.bf16.mxu1 %v12361_v35 }
 0x565   : > { %6994 = vmatmul.mubr.msk.f32.vlgmr.msra.gmra.mrb[78].mxu0 %vm12432_vm7, %v9865_v7  ;;  %vm12443_vm7 = vnez %v12166_v53 }
 0x566   : > { %6996 = vmatprep.mubr.msk.f32.mxu0 %vm12433_vm9, %v9870_v16  ;;  %vm12444_vm9 = vmmov %vm12425_vm2 }
 0x569   : > { %6997 = vmatmul.mubr.msk.f32.gmra.mrb[80].mxu0 %vm12419_vm6, %v9881_v44  ;;  %vm12445_vm6 = vmmov %vm12425_vm2 }
 0x5f3   : > { %v6860_v54 = vpop.f32.mrb[56].mxu0 }
 0x5f4   : > { %v9886_v2 = vadd.f32 %v6860_v54, %v9533_v63  ;;  %v1939_v3 = vpop.f32.mrb[57].mxu0 }
 0x5f5   : > { %v9889_v38 = vadd.f32 %v9510_v23, %v1939_v3 }
 0x5f7   : > { %v6863_v47 = vpop.f32.mrb[58].mxu0 }
 0x5f8   : > { %v9892_v62 = vadd.f32 %v9520_v49, %v6863_v47  ;;  %v1949_v16 = vpop.f32.mrb[59].mxu0 }
 0x5f9   : > { %v9895_v7 = vadd.f32 %v9508_v12, %v1949_v16 }
 0x5fb   : > { %v6866_v51 = vpop.f32.mrb[60].mxu0 }
 0x5fc   : > { %v9898_v43 = vadd.f32 %v6866_v51, %v9626_v52  ;;  %v1959_v44 = vpop.f32.mrb[61].mxu0 }
 0x5fd   : > { %v9901_v63 = vadd.f32 %v9598_v46, %v1959_v44 }
 0x5ff   : > { %v6869_v54 = vpop.f32.mrb[62].mxu0 }
 0x600   : > { %v9904_v23 = vadd.f32 %v9607_v15, %v6869_v54  ;;  %v1969_v3 = vpop.f32.mrb[63].mxu0 }
 0x601   : > { %v9907_v49 = vadd.f32 %v9585_v17, %v1969_v3 }
 0x603   : > { %v6872_v47 = vpop.f32.mrb[64].mxu0 }
 0x604   : > { %v9910_v12 = vadd.f32 %v6872_v47, %v9718_v10  ;;  %v1979_v16 = vpop.f32.mrb[65].mxu0 }
 0x605   : > { %v9913_v52 = vadd.f32 %v9690_v8, %v1979_v16 }
 0x607   : > { %v6875_v51 = vpop.f32.mrb[66].mxu0 }
 0x608   : > { %v9916_v46 = vadd.f32 %v9699_v19, %v6875_v51  ;;  %v1989_v44 = vpop.f32.mrb[67].mxu0 }
 0x609   : > { %v9919_v15 = vadd.f32 %v9683_v0, %v1989_v44 }
 0x60b   : > { %v6878_v54 = vpop.f32.mrb[68].mxu0 }
 0x60c   : > { %v9922_v17 = vadd.f32 %v6878_v54, %v9798_v36  ;;  %v1999_v3 = vpop.f32.mrb[69].mxu0 }
 0x60d   : > { %v9925_v10 = vadd.f32 %v9780_v42, %v1999_v3 }
 0x60f   : > { %v6881_v47 = vpop.f32.mrb[70].mxu0 }
 0x610   : > { %v9928_v8 = vadd.f32 %v9789_v1, %v6881_v47  ;;  %v2009_v16 = vpop.f32.mrb[71].mxu0 }
 0x611   : > { %v9931_v19 = vadd.f32 %v9773_v33, %v2009_v16 }
 0x612   : > { %12435 = vst [vmem:[#allocation77_spill] sm:$0xff] %v9928_v8 }
 0x613   : > { %12436 = vst [vmem:[#allocation82_spill] sm:$0xff] %v9931_v19  ;;  %v12469_v19 = vld [vmem:[#allocation18_spill] sm:$0xff] }
 0x614   : > { %v12470_v8 = vpack.i.bf16 %v12468_v30, %v12469_v19  ;;  %v12477_v30 = vld [vmem:[#allocation31_spill] sm:$0xff] }
 0x618   : > { %v9933_v51 = vpop.f32.mrb[72].mxu0 }
 0x619   : > { %12437 = vst [vmem:[#allocation87_spill] sm:$0xff] %v9933_v51  ;;  %v6932_v0 = vpop.f32.mrb[73].mxu0 }
 0x628   : > { %v6951_v44 = vpop.f32.mrb[74].mxu0 }
 0x629   : > { %v2374_v45 = vpop.f32.mrb[75].mxu0 }
 0x62a   : > { %v2575_v39 = vpack.c.bf16 %v6951_v44, %v2374_v45 }
 0x62c   : > { %v6954_v36 = vpop.f32.mrb[76].mxu0  ;;  %7003 = vmatprep.mubr.msk.bf16.mxu1 %vm12438_vm12, %v2575_v39  ;;  %vm12486_vm12 = vmmov %vm12425_vm2 }
 0x62d   : > { %v2384_v54 = vpop.f32.mrb[77].mxu0 }
 0x62e   : > { %v2576_v42 = vpack.c.bf16 %v6954_v36, %v2384_v54 }
 0x630   : > { %7004 = vmatmul.mubr.msk.bf16.vlgmr.msra.gmra.mrb[52].mxu1 %vm12439_vm11, %v2576_v42  ;;  %vm10053_vm11 = vmpackc.low %vm12486_vm12, %vm12486_vm12 }
 0x631   : > { %7055 = vmatprep.mubr.msk.f32.mxu1 %vm11977_vm1, %v12326_v58 }
 0x703   : > { %v7005_v1 = vpop.f32.mrb[52].mxu1 }
 0x704   : > { %v2625_v3 = vpop.f32.mrb[53].mxu1  ;;  %v9947_v39 = vsel %vm12440_vm3, %v7005_v1, -3.4028235e+38  ;;  %v12446_v1 = vld [vmem:[#allocation7_spill] sm:$0xff] }
 0x705   : > { %v9941_v33 = vsel %vm8879_vm0, %v2625_v3, -3.4028235e+38  ;;  %v7006_v47 = vpop.f32.mrb[54].mxu1  ;;  %v2650_v54 = vsel %vm12444_vm9, %v9947_v39, -inf  ;;  %v12447_v3 = vld [vmem:[#allocation13_spill] sm:$0xff]  ;;  %vm12491_vm9 = vmmov %vm12425_vm2 }
 0x706   : > { %v2628_v16 = vpop.f32.mrb[55].mxu1  ;;  %v2644_v45 = vsel %vm12425_vm2, %v9941_v33, -inf  ;;  %v9957_v36 = vsel %vm12443_vm7, %v7006_v47, -3.4028235e+38  ;;  %v12448_v47 = vld [vmem:[#allocation11_spill] sm:$0xff] }
 0x707   : > { %v9951_v0 = vsel %vm12441_vm14, %v2628_v16, -3.4028235e+38  ;;  %2645 = vmax.xlane.f32.xlu1 %v2644_v45  ;;  %v2653_v42 = vsel %vm12445_vm6, %v9957_v36, -inf  ;;  %v6995_v16 = vpop.f32.mrb[78].mxu0 }
 0x708   : > { %v2647_v44 = vsel %vm12442_vm13, %v9951_v0, -inf  ;;  %v2556_v45 = vpop.f32.mrb[79].mxu0  ;;  %vm12490_vm13 = vmmov %vm12425_vm2 }
 0x709   : > { %2648 = vmax.xlane.f32.xlu0 %v2647_v44  ;;  %v12449_v44 = vld [vmem:[#allocation17_spill] sm:$0xff]  ;;  %v6998_v51 = vpop.f32.mrb[80].mxu0 }
 0x70a   : > { %v2566_v41 = vpop.f32.mrb[81].mxu0 }
 0x70b   : > { %2651 = vmax.xlane.f32.xlu1 %v2650_v54  ;;  %v2674_v54 = vpack.c.bf16 %v6995_v16, %v2556_v45  ;;  %v2675_v48 = vpack.c.bf16 %v6998_v51, %v2566_v41  ;;  %v12455_v41 = vld [vmem:[#allocation8_spill] sm:$0xff] }
 0x70c   : > { %v12456_v51 = vld [vmem:[#allocation12_spill] sm:$0xff] }
 0x70d   : > { %2654 = vmax.xlane.f32.xlu0 %v2653_v42  ;;  %7007 = vmatprep.subr.bf16.mxu0 %v2674_v54  ;;  %v12450_v42 = vld [vmem:[#allocation21_spill] sm:$0xff]  ;;  %v12458_v16 = vld [vmem:[#allocation20_spill] sm:$0xff] }
 0x70e   : > { %7008 = vmatpush3.bf16.msra.mxu0 %v2674_v54  ;;  %v12461_v45 = vld [vmem:[#allocation32_spill] sm:$0xff]  ;;  %v12466_v54 = vld [vmem:[#allocation14_spill] sm:$0xff] }
 0x70f   : > { %7009 = vmatprep.subr.bf16.mxu0 %v2675_v48 }
 0x712   : > { %7010 = vmatpush3.bf16.msra.mxu0 %v2675_v48  ;;  %v12454_v48 = vld [vmem:[#allocation6_spill] sm:$0xff] }
 0x71c   : > { %8000 = vrot.lane.b32.xlu1 %v12446_v1, %s8328_s30 }
 0x720   : > { %8010 = vrot.lane.b32.xlu1 %v12447_v3, %s8328_s30 }
 0x723   : > { %8005 = vrot.lane.b32.xlu0 %v12448_v47, %s8328_s30 }
 0x724   : > { %8015 = vrot.lane.b32.xlu1 %v12449_v44, %s8328_s30 }
 0x727   : > { %8020 = vrot.lane.b32.xlu0 %v12450_v42, %s8328_s30 }
 0x728   : > { %8025 = vrot.lane.b32.xlu1 %v12451_v13, %s8328_s30 }
 0x72b   : > { %8030 = vrot.lane.b32.xlu0 %v12452_v57, %s8328_s30 }
 0x72c   : > { %8035 = vrot.lane.b32.xlu1 %v12453_v28, %s8328_s30 }
 0x72f   : > { %8040 = vrot.lane.b32.xlu0 %v12446_v1, %s8329_s5  ;;  %v12457_v1 = vld [vmem:[#allocation16_spill] sm:$0xff] }
 0x730   : > { %8045 = vrot.lane.b32.xlu1 %v12448_v47, %s8329_s5  ;;  %v12460_v47 = vld [vmem:[#allocation28_spill] sm:$0xff] }
 0x733   : > { %8050 = vrot.lane.b32.xlu0 %v12447_v3, %s8329_s5  ;;  %v12459_v3 = vld [vmem:[#allocation24_spill] sm:$0xff] }
 0x734   : > { %8055 = vrot.lane.b32.xlu1 %v12449_v44, %s8329_s5  ;;  %v12465_v44 = vld [vmem:[#allocation15_spill] sm:$0xff] }
 0x737   : > { %8060 = vrot.lane.b32.xlu0 %v12450_v42, %s8329_s5  ;;  %v12467_v42 = vpack.i.bf16 %v12465_v44, %v12466_v54 }
 0x738   : > { %8065 = vrot.lane.b32.xlu1 %v12451_v13, %s8329_s5  ;;  %v12463_v13 = vld [vmem:[#allocation9_spill] sm:$0xff] }
 0x73b   : > { %8070 = vrot.lane.b32.xlu0 %v12452_v57, %s8329_s5  ;;  %v12462_v57 = vld [vmem:[#allocation10_spill] sm:$0xff] }
 0x73c   : > { %8075 = vrot.lane.b32.xlu1 %v12453_v28, %s8329_s5  ;;  %v12464_v28 = vpack.i.bf16 %v12462_v57, %v12463_v13  ;;  %v12472_v57 = vld [vmem:[#allocation22_spill] sm:$0xff]  ;;  %v12474_v13 = vld [vmem:[#allocation27_spill] sm:$0xff] }
 0x73f   : > { %3184 = vrot.lane.b32.xlu0 %v12454_v48, %s8329_s5 }
 0x740   : > { %3186 = vrot.lane.b32.xlu1 %v12455_v41, %s8329_s5 }
 0x743   : > { %3188 = vrot.lane.b32.xlu0 %v12456_v51, %s8329_s5 }
 0x744   : > { %3190 = vrot.lane.b32.xlu1 %v12457_v1, %s8329_s5 }
 0x747   : > { %3192 = vrot.lane.b32.xlu0 %v12458_v16, %s8329_s5 }
 0x748   : > { %3194 = vrot.lane.b32.xlu1 %v12459_v3, %s8329_s5 }
 0x74b   : > { %3196 = vrot.lane.b32.xlu0 %v12460_v47, %s8329_s5 }
 0x74c   : > { %3198 = vrot.lane.b32.xlu1 %v12461_v45, %s8329_s5 }
 0x74f   : > { %8080 = vrot.lane.b32.xlu0 %v12464_v28, %s8328_s30  ;;  %v12475_v28 = vld [vmem:[#allocation26_spill] sm:$0xff] }
 0x750   : > { %3168 = vrot.lane.b32.xlu1 %v12454_v48, %s8328_s30  ;;  %v12471_v48 = vld [vmem:[#allocation23_spill] sm:$0xff]  ;;  %v12476_v44 = vpack.i.bf16 %v12474_v13, %v12475_v28 }
 0x753   : > { %3170 = vrot.lane.b32.xlu0 %v12455_v41, %s8328_s30  ;;  %v12473_v41 = vpack.i.bf16 %v12471_v48, %v12472_v57 }
 0x754   : > { %8085 = vrot.lane.b32.xlu1 %v12467_v42, %s8328_s30  ;;  %v12484_v42 = vld [vmem:[#allocation40_spill] sm:$0xff] }
 0x757   : > { %8090 = vrot.lane.b32.xlu0 %v12470_v8, %s8328_s30  ;;  %v12478_v8 = vld [vmem:[#allocation30_spill] sm:$0xff] }
 0x758   : > { %3172 = vrot.lane.b32.xlu1 %v12456_v51, %s8328_s30  ;;  %v12479_v19 = vpack.i.bf16 %v12477_v30, %v12478_v8  ;;  %v12480_v51 = vld [vmem:[#allocation36_spill] sm:$0xff] }
 0x75b   : > { %3174 = vrot.lane.b32.xlu0 %v12457_v1, %s8328_s30  ;;  %v12481_v1 = vld [vmem:[#allocation35_spill] sm:$0xff] }
 0x75c   : > { %8095 = vrot.lane.b32.xlu1 %v12473_v41, %s8328_s30  ;;  %v12482_v54 = vpack.i.bf16 %v12480_v51, %v12481_v1 }
 0x75f   : > { %8100 = vrot.lane.b32.xlu0 %v12476_v44, %s8328_s30 }
 0x760   : > { %3176 = vrot.lane.b32.xlu1 %v12458_v16, %s8328_s30  ;;  %v12483_v16 = vld [vmem:[#allocation41_spill] sm:$0xff] }
 0x763   : > { %3178 = vrot.lane.b32.xlu0 %v12459_v3, %s8328_s30  ;;  %v12485_v3 = vpack.i.bf16 %v12483_v16, %v12484_v42 }
 0x764   : > { %8105 = vrot.lane.b32.xlu1 %v12479_v19, %s8328_s30 }
 0x767   : > { %8110 = vrot.lane.b32.xlu0 %v12482_v54, %s8328_s30 }
 0x768   : > { %3180 = vrot.lane.b32.xlu1 %v12460_v47, %s8328_s30 }
 0x76b   : > { %3182 = vrot.lane.b32.xlu0 %v12461_v45, %s8328_s30 }
 0x76c   : > { %8115 = vrot.lane.b32.xlu1 %v12485_v3, %s8328_s30 }
 0x794   : > { %v2646_v48 = vpop.xlane.xlu1 %2645 }
 0x795   : > { %v2656_v57 = vsub.f32 %v9941_v33, %v2646_v48 }
 0x796   : > { %v2649_v41 = vpop.xlane.xlu0 %2648 }
 0x797   : > { %v2660_v13 = vmul.f32 1.442695, %v2656_v57  ;;  %v2657_v28 = vsub.f32 %v9951_v0, %v2649_v41 }
 0x798   : > { %v2652_v44 = vpop.xlane.xlu1 %2651 }
 0x799   : > { %8185 = vpow2.f32 %v2660_v13  ;;  %v2662_v30 = vmul.f32 1.442695, %v2657_v28  ;;  %v2658_v47 = vsub.f32 %v9947_v39, %v2652_v44  ;;  %v12487_v39 = vmov 0 }
 0x79a   : > { %v2655_v8 = vpop.xlane.xlu0 %2654  ;;  %v12488_v39 = vsel %vm10053_vm11, 4294967295, %v12487_v39 }
 0x79b   : > { %8187 = vpow2.f32 %v2662_v30  ;;  %v2664_v45 = vmul.f32 1.442695, %v2658_v47  ;;  %v2659_v19 = vsub.f32 %v9957_v36, %v2655_v8  ;;  %12489 = vst [vmem:[#allocation91_spill] sm:$0xff] %v12488_v39 }
 0x79c   : > { %v8001_v3 = vpop.permute.xlu1 %8000 }
 0x79d   : > { %8189 = vpow2.f32 %v2664_v45  ;;  %v2666_v51 = vmul.f32 1.442695, %v2659_v19  ;;  %v8003_v13 = vunpack.i.h.bf16 %v8001_v3  ;;  %v8002_v28 = vunpack.i.l.bf16 %v8001_v3 }
 0x79e   : > { %v8006_v30 = vpop.permute.xlu0 %8005 }
 0x79f   : > { %8191 = vpow2.f32 %v2666_v51  ;;  %v7702_v44 = vpack.c.bf16 %v8003_v13, %v8002_v28  ;;  %v8008_v8 = vunpack.i.h.bf16 %v8006_v30  ;;  %v8007_v45 = vunpack.i.l.bf16 %v8006_v30 }
 0x7a0   : > { %v8011_v47 = vpop.permute.xlu1 %8010 }
 0x7a1   : > { %v8013_v19 = vunpack.i.h.bf16 %v8011_v47  ;;  %v8012_v51 = vunpack.i.l.bf16 %v8011_v47 }
 0x7a3   : > { %v8186_v1 = vpop.eup %8185 }
 0x7a4   : > { %v2668_v33 = vsel %vm8879_vm0, %v8186_v1, 0.0  ;;  %v7706_v1 = vpack.c.bf16 %v8008_v8, %v8007_v45 }
 0x7a5   : > { %v8188_v54 = vpop.eup %8187 }
 0x7a6   : > { %v2669_v0 = vsel %vm12441_vm14, %v8188_v54, 0.0  ;;  %v8016_v54 = vpop.permute.xlu1 %8015 }
 0x7a7   : > { %v8190_v16 = vpop.eup %8189  ;;  %v2672_v42 = vpack.c.bf16 %v2669_v0, %v2668_v33  ;;  %v12492_v33 = vmov 0.5   ;;  %v8018_v0 = vunpack.i.h.bf16 %v8016_v54 }
 0x7a8   : > { %v2670_v48 = vsel %vm12440_vm3, %v8190_v16, 0.0  ;;  %v8017_v16 = vunpack.i.l.bf16 %v8016_v54 }
 0x7a9   : > { %v8192_v36 = vpop.eup %8191  ;;  %7011 = vmatprep.mubr.msk.bf16.mxu0 %vm12425_vm2, %v2672_v42  ;;  %7697 = vmatpush3.bf16.xpose.msk.msra.mxu1 %vm10053_vm11, %v2672_v42  ;;  %v7710_v42 = vpack.c.bf16 %v8013_v19, %v8012_v51 }
 0x7aa   : > { %v2671_v57 = vsel %vm12443_vm7, %v8192_v36, 0.0  ;;  %7698 = vmatprep.subr.bf16.mxu1 %v12361_v35  ;;  %v8021_v36 = vpop.permute.xlu0 %8020 }
 0x7ab   : > { %v2673_v41 = vpack.c.bf16 %v2671_v57, %v2670_v48  ;;  %v8023_v3 = vunpack.i.h.bf16 %v8021_v36  ;;  %v8022_v48 = vunpack.i.l.bf16 %v8021_v36  ;;  %v7714_v57 = vpack.c.bf16 %v8018_v0, %v8017_v16 }
 0x7ad   : > { %7012 = vmatmul.mubr.msk.bf16.vlgmr.msra.gmra.mrb[84].mxu0 %vm12490_vm13, %v2673_v41 }
 0x7ae   : > { %v8031_v30 = vpop.permute.xlu0 %8030 }
 0x7af   : > { %v8033_v47 = vunpack.i.h.bf16 %v8031_v30  ;;  %v8032_v8 = vunpack.i.l.bf16 %v8031_v30 }
 0x7b1   : > { %7701 = vmatpush3.bf16.xpose.msk.msra.mxu1 %vm10053_vm11, %v2673_v41  ;;  %v8026_v41 = vpop.permute.xlu1 %8025 }
 0x7b2   : > { %7703 = vmatprep.subr.bf16.mxu1 %v7702_v44  ;;  %v8028_v13 = vunpack.i.h.bf16 %v8026_v41  ;;  %v8027_v28 = vunpack.i.l.bf16 %v8026_v41  ;;  %v8041_v36 = vpop.permute.xlu0 %8040 }
 0x7b3   : > { %v8043_v0 = vunpack.i.h.bf16 %v8041_v36  ;;  %v8042_v16 = vunpack.i.l.bf16 %v8041_v36 }
 0x7b4   : > { %v7722_v45 = vpack.c.bf16 %v8028_v13, %v8027_v28 }
 0x7b5   : > { %v8036_v54 = vpop.permute.xlu1 %8035 }
 0x7b6   : > { %v8038_v19 = vunpack.i.h.bf16 %v8036_v54  ;;  %v8037_v51 = vunpack.i.l.bf16 %v8036_v54  ;;  %v8051_v30 = vpop.permute.xlu0 %8050 }
 0x7b7   : > { %v8053_v13 = vunpack.i.h.bf16 %v8051_v30  ;;  %v8052_v28 = vunpack.i.l.bf16 %v8051_v30  ;;  %v12499_v30 = vld [vmem:[#allocation59_spill] sm:$0xff] }
 0x7b8   : > { %7056 = vmatmul.mubr.msk.f32.vlgmr.msra.gmra.mrb[56].mxu1 %vm12491_vm9, %v12411_v4  ;;  %vm12500_vm13 = vnez %v12499_v30 }
 0x7b9   : > { %7705 = vmatpush3.bf16.msra.mxu1 %v7702_v44  ;;  %7122 = vmatprep.mubr.msk.f32.mxu1 %vm12289_vm8, %v12492_v33  ;;  %v7718_v44 = vpack.c.bf16 %v8023_v3, %v8022_v48  ;;  %v8046_v41 = vpop.permute.xlu1 %8045  ;;  %v7742_v54 = vpack.c.bf16 %v8053_v13, %v8052_v28 }
 0x7ba   : > { %7707 = vmatprep.subr.bf16.mxu1 %v7706_v1  ;;  %v8048_v3 = vunpack.i.h.bf16 %v8046_v41  ;;  %v8047_v48 = vunpack.i.l.bf16 %v8046_v41  ;;  %v12497_v41 = vld [vmem:[#allocation58_spill] sm:$0xff] }
 0x7bb   : > { %vm12498_vm2 = vnez %v12497_v41 }
 0x7bd   : > { %7709 = vmatpush3.bf16.msra.mxu1 %v7706_v1  ;;  %v7726_v1 = vpack.c.bf16 %v8033_v47, %v8032_v8  ;;  %v8056_v47 = vpop.permute.xlu1 %8055 }
 0x7be   : > { %7711 = vmatprep.subr.bf16.mxu1 %v7710_v42  ;;  %v8058_v8 = vunpack.i.h.bf16 %v8056_v47 }
 0x7c1   : > { %7713 = vmatpush3.bf16.msra.mxu1 %v7710_v42  ;;  %v7730_v42 = vpack.c.bf16 %v8038_v19, %v8037_v51  ;;  %v8061_v19 = vpop.permute.xlu0 %8060  ;;  %v12493_v51 = vld [vmem:[#allocation54_spill] sm:$0xff] }
 0x7c2   : > { %7715 = vmatprep.subr.bf16.mxu1 %v7714_v57  ;;  %vm12494_vm6 = vnez %v12493_v51  ;;  %v8062_v36 = vunpack.i.l.bf16 %v8061_v19 }
 0x7c5   : > { %7717 = vmatpush3.bf16.msra.mxu1 %v7714_v57  ;;  %v7734_v57 = vpack.c.bf16 %v8043_v0, %v8042_v16  ;;  %v12495_v16 = vld [vmem:[#allocation55_spill] sm:$0xff]  ;;  %v8071_v13 = vpop.permute.xlu0 %8070 }
 0x7c6   : > { %7719 = vmatprep.subr.bf16.mxu1 %v7718_v44  ;;  %vm12496_vm12 = vnez %v12495_v16  ;;  %v8073_v28 = vunpack.i.h.bf16 %v8071_v13 }
 0x7c9   : > { %7721 = vmatpush3.bf16.msra.mxu1 %v7718_v44  ;;  %v7738_v44 = vpack.c.bf16 %v8048_v3, %v8047_v48 }
 0x7ca   : > { %7723 = vmatprep.subr.bf16.mxu1 %v7722_v45 }
 0x7cd   : > { %7725 = vmatpush3.bf16.msra.mxu1 %v7722_v45  ;;  %v8057_v45 = vunpack.i.l.bf16 %v8056_v47 }
 0x7ce   : > { %7727 = vmatprep.subr.bf16.mxu1 %v7726_v1 }
 0x7cf   : > { %v7746_v0 = vpack.c.bf16 %v8058_v8, %v8057_v45 }
 0x7d1   : > { %7729 = vmatpush3.bf16.msra.mxu1 %v7726_v1  ;;  %v8063_v1 = vunpack.i.h.bf16 %v8061_v19 }
 0x7d2   : > { %7731 = vmatprep.subr.bf16.mxu1 %v7730_v42 }
 0x7d5   : > { %7733 = vmatpush3.bf16.msra.mxu1 %v7730_v42  ;;  %v8066_v42 = vpop.permute.xlu1 %8065 }
 0x7d6   : > { %7735 = vmatprep.subr.bf16.mxu1 %v7734_v57  ;;  %v8068_v3 = vunpack.i.h.bf16 %v8066_v42  ;;  %v8067_v48 = vunpack.i.l.bf16 %v8066_v42 }
 0x7d8   : > { %7123 = vmatmul.mubr.msk.f32.vlgmr.msra.gmra.mrb[58].mxu1 %vm12292_vm4, %v12492_v33  ;;  %v7754_v47 = vpack.c.bf16 %v8068_v3, %v8067_v48  ;;  %v720_v48 = vand.u32 3, %v12304_v9 }
 0x7d9   : > { %7737 = vmatpush3.bf16.msra.mxu1 %v7734_v57  ;;  %7125 = vmatprep.mubr.msk.f32.mxu1 %vm12297_vm15, %v12492_v33  ;;  %v7750_v57 = vpack.c.bf16 %v8063_v1, %v8062_v36  ;;  %v8076_v8 = vpop.permute.xlu1 %8075  ;;  %v719_v36 = vand.u32 3, %v12284_v32 }
 0x7da   : > { %7739 = vmatprep.subr.bf16.mxu1 %v7738_v44  ;;  %v8078_v45 = vunpack.i.h.bf16 %v8076_v8  ;;  %vm736_vm7 = vcmp.eq.s32.totalorder %v720_v48, 3 }
 0x7db   : > { %vm735_vm9 = vcmp.eq.s32.totalorder %v719_v36, 3  ;;  %v723_v36 = vand.u32 3, %v12315_v14 }
 0x7dc   : > { %7126 = vmatmul.mubr.msk.f32.gmra.mrb[60].mxu1 %vm12300_vm5, %v12492_v33 }
 0x7dd   : > { %7741 = vmatpush3.bf16.msra.mxu1 %v7738_v44  ;;  %7128 = vmatprep.mubr.msk.f32.mxu1 %vm12494_vm6, %v12492_v33  ;;  %v8072_v44 = vunpack.i.l.bf16 %v8071_v13  ;;  %vm10165_vm3 = vcmp.eq.s32.totalorder %v723_v36, 3  ;;  %v727_v36 = vand.u32 3, %v12339_v61 }
 0x7de   : > { %7743 = vmatprep.subr.bf16.mxu1 %v7742_v54 }
 0x7df   : > { %v7758_v19 = vpack.c.bf16 %v8073_v28, %v8072_v44 }
 0x7e0   : > { %7129 = vmatmul.mubr.msk.f32.gmra.mrb[62].mxu1 %vm12496_vm12, %v12492_v33 }
 0x7e1   : > { %7745 = vmatpush3.bf16.msra.mxu1 %v7742_v54  ;;  %7131 = vmatprep.mubr.msk.f32.mxu1 %vm12498_vm2, %v12492_v33  ;;  %v8077_v54 = vunpack.i.l.bf16 %v8076_v8 }
 0x7e2   : > { %7747 = vmatprep.subr.bf16.mxu1 %v7746_v0 }
 0x7e3   : > { %v7762_v1 = vpack.c.bf16 %v8078_v45, %v8077_v54  ;;  %v753_v45 = vshra.s32 %v12305_v55, 2  ;;  %v722_v54 = vand.u32 3, %v12306_v6 }
 0x7e4   : > { %7132 = vmatmul.mubr.msk.f32.gmra.mrb[64].mxu1 %vm12500_vm13, %v12492_v33 }
 0x7e5   : > { %7749 = vmatpush3.bf16.msra.mxu1 %v7746_v0  ;;  %7166 = vmatprep.mubr.msk.f32.mxu1 %vm12289_vm8, %v12492_v33  ;;  %v751_v0 = vshra.s32 %v12284_v32, 2 }
 0x7e6   : > { %7751 = vmatprep.subr.bf16.mxu1 %v7750_v57 }
 0x7e7   : > { %vm767_vm1 = vcmp.eq.s32.totalorder %v751_v0, %v12285_v25 }
 0x7e8   : > { %vm783_vm11 = vmand %vm767_vm1, %vm735_vm9  ;;  %vm10138_vm9 = vcmp.eq.s32.totalorder %v753_v45, %v12285_v25 }
 0x7e9   : > { %7753 = vmatpush3.bf16.msra.mxu1 %v7750_v57  ;;  %v10122_v42 = vsel %vm783_vm11, 1.0, %v12326_v58  ;;  %v752_v57 = vshra.s32 %v12304_v9, 2 }
 0x7ea   : > { %7755 = vmatprep.subr.bf16.mxu1 %v7754_v47  ;;  %12501 = vst [vmem:[#allocation7_spill] sm:$0xff] %v10122_v42  ;;  %7023 = vmatprep.mubr.msk.f32.mxu0 %vm12502_vm10, %v10122_v42 }
 0x7eb   : > { %vm768_vm1 = vcmp.eq.s32.totalorder %v752_v57, %v12285_v25  ;;  %v3187_v57 = vpop.permute.xlu1 %3186 }
 0x7ec   : > { %vm784_vm10 = vmand %vm768_vm1, %vm736_vm7  ;;  %vm10153_vm1 = vcmp.eq.s32.totalorder %v722_v54, 3  ;;  %v726_v54 = vand.u32 3, %v12333_v20 }
 0x7ed   : > { %7757 = vmatpush3.bf16.msra.mxu1 %v7754_v47  ;;  %v721_v47 = vand.u32 3, %v12305_v55  ;;  %v755_v55 = vshra.s32 %v12315_v14, 2  ;;  %v10145_v0 = vsel %vm784_vm10, 1.0, %v12326_v58  ;;  %v724_v14 = vand.u32 3, %v12320_v40 }
 0x7ee   : > { %7759 = vmatprep.subr.bf16.mxu1 %v7758_v19  ;;  %12507 = vst [vmem:[#allocation13_spill] sm:$0xff] %v10145_v0  ;;  %vm12513_vm10 = vcmask 261120  }
 0x7ef   : > { %vm10133_vm11 = vcmp.eq.s32.totalorder %v721_v47, 3  ;;  %v725_v47 = vand.u32 3, %v12325_v31  ;;  %v3191_v9 = vpop.permute.xlu1 %3190 }
 0x7f0   : > { %vm785_vm7 = vmand %vm10138_vm9, %vm10133_vm11  ;;  %vm10170_vm11 = vcmp.eq.s32.totalorder %v755_v55, %v12285_v25  ;;  %v759_v55 = vshra.s32 %v12339_v61, 2 }
 0x7f1   : > { %7761 = vmatpush3.bf16.msra.mxu1 %v7758_v19  ;;  %v754_v19 = vshra.s32 %v12306_v6, 2  ;;  %vm12518_vm9 = vmmov %vm12513_vm10 }
 0x7f2   : > { %7763 = vmatprep.subr.bf16.mxu1 %v7762_v1  ;;  %vm12520_vm0 = vmmov %vm12518_vm9 }
 0x7f3   : > { %vm10158_vm14 = vcmp.eq.s32.totalorder %v754_v19, %v12285_v25  ;;  %v758_v19 = vshra.s32 %v12333_v20, 2 }
 0x7f5   : > { %7765 = vmatpush3.bf16.msra.mxu1 %v7762_v1  ;;  %v734_v1 = vand.u32 3, %v12394_v22 }
 0x7f8   : > { %7167 = vmatmul.mubr.msk.f32.vlgmr.msra.gmra.mrb[66].mxu1 %vm12292_vm4, %v12492_v33 }
 0x7f9   : > { %7169 = vmatprep.mubr.msk.f32.mxu1 %vm12297_vm15, %v12492_v33 }
 0x7fc   : > { %7170 = vmatmul.mubr.msk.f32.gmra.mrb[68].mxu1 %vm12300_vm5, %v12492_v33 }
 0x7fd   : > { %7172 = vmatprep.mubr.msk.f32.mxu1 %vm12494_vm6, %v12492_v33 }
 0x800   : > { %7173 = vmatmul.mubr.msk.f32.gmra.mrb[70].mxu1 %vm12496_vm12, %v12492_v33  ;;  %vm10232_vm12 = vcmp.eq.s32.totalorder %v726_v54, 3  ;;  %v730_v54 = vand.u32 3, %v12366_v18 }
 0x801   : > { %7175 = vmatprep.mubr.msk.f32.mxu1 %vm12498_vm2, %v12492_v33  ;;  %vm10191_vm2 = vcmp.eq.s32.totalorder %v724_v14, 3 }
 0x804   : > { %7176 = vmatmul.mubr.msk.f32.gmra.mrb[72].mxu1 %vm12500_vm13, %v12492_v33  ;;  %vm787_vm13 = vmand %vm10170_vm11, %vm10165_vm3 }
 0x805   : > { %vm12530_vm3 = vmmov %vm12518_vm9  ;;  %v10220_v14 = vsel %vm787_vm13, 1.0, %v12326_v58  ;;  %vm10237_vm13 = vcmp.eq.s32.totalorder %v758_v19, %v12285_v25  ;;  %v762_v19 = vshra.s32 %v12366_v18, 2 }
 0x806   : > { %12532 = vst [vmem:[#allocation25_spill] sm:$0xff] %v10220_v14 }
 0x880   : > { %v7013_v3 = vpop.f32.mrb[84].mxu0 }
 0x881   : > { %v2716_v33 = vpop.f32.mrb[85].mxu0 }
 0x882   : > { %v7014_v13 = vpop.f32.mrb[86].mxu0 }
 0x883   : > { %v7690_v28 = vpack.c.bf16 %v7014_v13, %v7013_v3  ;;  %v2719_v44 = vpop.f32.mrb[87].mxu0  ;;  %v3185_v3 = vpop.permute.xlu0 %3184 }
 0x884   : > { %v7686_v8 = vpack.c.bf16 %v2719_v44, %v2716_v33  ;;  %v756_v33 = vshra.s32 %v12320_v40, 2  ;;  %v10179_v40 = vsel %vm785_vm7, 1.0, %v12326_v58 }
 0x885   : > { %12519 = vst [vmem:[#allocation17_spill] sm:$0xff] %v10179_v40 }
 0x886   : > { %7687 = vmatprep.subr.bf16.mxu0 %v7686_v8  ;;  %vm10196_vm7 = vcmp.eq.s32.totalorder %v756_v33, %v12285_v25  ;;  %v728_v33 = vand.u32 3, %v12351_v59 }
 0x887   : > { %7689 = vmatpush3.bf16.msra.mxu0 %v7686_v8  ;;  %v757_v8 = vshra.s32 %v12325_v31, 2  ;;  %vm788_vm11 = vmand %vm10196_vm7, %vm10191_vm2  ;;  %vm10243_vm2 = vcmp.eq.s32.totalorder %v727_v36, 3  ;;  %vm10248_vm7 = vcmp.eq.s32.totalorder %v759_v55, %v12285_v25  ;;  %v731_v55 = vand.u32 3, %v12372_v60 }
 0x888   : > { %7691 = vmatprep.subr.bf16.mxu0 %v7690_v28  ;;  %v10256_v31 = vsel %vm788_vm11, 1.0, %v12326_v58  ;;  %vm791_vm11 = vmand %vm10248_vm7, %vm10243_vm2  ;;  %v766_v36 = vshra.s32 %v12394_v22, 2 }
 0x889   : > { %12543 = vst [vmem:[#allocation29_spill] sm:$0xff] %v10256_v31 }
 0x88b   : > { %7693 = vmatpush3.bf16.msra.mxu0 %v7690_v28  ;;  %v10147_v6 = vpop.f32.mrb[56].mxu1  ;;  %v3189_v28 = vpop.permute.xlu0 %3188 }
 0x88c   : > { %12508 = vst [vmem:[#allocation11_spill] sm:$0xff] %v10147_v6  ;;  %v7057_v13 = vpop.f32.mrb[57].mxu1  ;;  %7928 = vmatprep.subr.msk.bf16.mxu0 %vm12513_vm10, %v3185_v3  ;;  %vm786_vm10 = vmand %vm10158_vm14, %vm10153_vm1  ;;  %vm10202_vm14 = vcmp.eq.s32.totalorder %v725_v47, 3  ;;  %v729_v47 = vand.u32 3, %v12357_v24  ;;  %v12693_v6 = vld [vmem:[#allocation92_spill] sm:$0xff] }
 0x88d   : > { %v10214_v48 = vsel %vm786_vm10, 1.0, %v12326_v58  ;;  %vm12531_vm1 = vmmov %vm12530_vm3  ;;  %v760_v13 = vshra.s32 %v12351_v59, 2 }
 0x88e   : > { %7024 = vmatmul.mubr.msk.f32.vlgmr.msra.gmra.mrb[82].mxu0 %vm12518_vm9, %v10145_v0  ;;  %12529 = vst [vmem:[#allocation21_spill] sm:$0xff] %v10214_v48  ;;  %v3225_v20 = vsel %vm12531_vm1, %v3185_v3, 0  ;;  %vm12533_vm9 = vmmov %vm12531_vm1  ;;  %v10302_v3 = vsel %vm791_vm11, 1.0, %v12326_v58  ;;  %vm10319_vm11 = vcmp.eq.s32.totalorder %v762_v19, %v12285_v25  ;;  %v12690_v0 = vld [vmem:[#allocation44_spill] sm:$0xff] }
 0x88f   : > { %7026 = vmatprep.mubr.msk.f32.mxu0 %vm12520_vm0, %v10179_v40  ;;  %vm10207_vm0 = vcmp.eq.s32.totalorder %v757_v8, %v12285_v25  ;;  %v761_v8 = vshra.s32 %v12357_v24, 2  ;;  %12558 = vst [vmem:[#allocation8_spill] sm:$0xff] %v10302_v3  ;;  %v765_v24 = vshra.s32 %v12386_v5, 2 }
 0x890   : > { %vm789_vm10 = vmand %vm10207_vm0, %vm10202_vm14 }
 0x891   : > { %vm12542_vm14 = vmmov %vm12531_vm1  ;;  %v10261_v59 = vsel %vm789_vm10, 1.0, %v12326_v58  ;;  %vm10278_vm10 = vcmp.eq.s32.totalorder %v760_v13, %v12285_v25  ;;  %v764_v13 = vshra.s32 %v12380_v27, 2 }
 0x892   : > { %7027 = vmatmul.mubr.msk.f32.gmra.mrb[88].mxu0 %vm12530_vm3, %v10214_v48  ;;  %vm12544_vm0 = vmmov %vm12531_vm1  ;;  %12545 = vst [vmem:[#allocation34_spill] sm:$0xff] %v10261_v59  ;;  %v12688_v48 = vld [vmem:[#allocation84_spill] sm:$0xff] }
 0x893   : > { %7029 = vmatprep.mubr.msk.f32.mxu0 %vm12533_vm9, %v10220_v14  ;;  %vm790_vm3 = vmand %vm10237_vm13, %vm10232_vm12  ;;  %vm10273_vm9 = vcmp.eq.s32.totalorder %v728_v33, 3  ;;  %vm10284_vm12 = vcmp.eq.s32.totalorder %v729_v47, 3  ;;  %vm10289_vm13 = vcmp.eq.s32.totalorder %v761_v8, %v12285_v25  ;;  %v732_v33 = vand.u32 3, %v12380_v27  ;;  %v3195_v27 = vpop.permute.xlu1 %3194 }
 0x894   : > { %7059 = vmatpush3.bf16.xpose.msra.mxu0 %v3225_v20  ;;  %vm12546_vm1 = vmmov %vm12544_vm0  ;;  %v763_v20 = vshra.s32 %v12372_v60, 2  ;;  %v10296_v61 = vsel %vm790_vm3, 1.0, %v12326_v58  ;;  %v733_v8 = vand.u32 3, %v12386_v5 }
 0x895   : > { %7929 = vmatprep.subr.msk.bf16.mxu0 %vm12542_vm14, %v3187_v57  ;;  %12555 = vst [vmem:[#allocation6_spill] sm:$0xff] %v10296_v61  ;;  %vm12556_vm2 = vmmov %vm12544_vm0 }
 0x896   : > { %7030 = vmatmul.mubr.msk.f32.gmra.mrb[90].mxu0 %vm12544_vm0, %v10256_v31  ;;  %vm12557_vm7 = vmmov %vm12544_vm0  ;;  %v12676_v31 = vld [vmem:[#allocation37_spill] sm:$0xff] }
 0x897   : > { %7032 = vmatprep.mubr.msk.f32.mxu0 %vm12546_vm1, %v10261_v59  ;;  %v3228_v18 = vsel %vm12557_vm7, %v3187_v57, 0  ;;  %vm792_vm14 = vmand %vm10278_vm10, %vm10273_vm9  ;;  %vm10314_vm1 = vcmp.eq.s32.totalorder %v730_v54, 3  ;;  %vm10325_vm9 = vcmp.eq.s32.totalorder %v731_v55, 3  ;;  %vm10330_vm10 = vcmp.eq.s32.totalorder %v763_v20, %v12285_v25  ;;  %v3199_v57 = vpop.permute.xlu1 %3198 }
 0x898   : > { %vm793_vm3 = vmand %vm10289_vm13, %vm10284_vm12  ;;  %v10338_v45 = vsel %vm792_vm14, 1.0, %v12326_v58 }
 0x899   : > { %vm12567_vm12 = vmmov %vm12544_vm0  ;;  %12568 = vst [vmem:[#allocation12_spill] sm:$0xff] %v10338_v45  ;;  %v10343_v54 = vsel %vm793_vm3, 1.0, %v12326_v58  ;;  %vm10360_vm3 = vcmp.eq.s32.totalorder %v764_v13, %v12285_v25 }
 0x89a   : > { %7033 = vmatmul.mubr.msk.f32.gmra.mrb[92].mxu0 %vm12556_vm2, %v10296_v61  ;;  %vm12569_vm13 = vmmov %vm12544_vm0  ;;  %12570 = vst [vmem:[#allocation16_spill] sm:$0xff] %v10343_v54 }
 0x89b   : > { %7035 = vmatprep.mubr.msk.f32.mxu0 %vm12544_vm0, %v10302_v3  ;;  %vm794_vm2 = vmand %vm10319_vm11, %vm10314_vm1  ;;  %vm10366_vm1 = vcmp.eq.s32.totalorder %v733_v8, 3  ;;  %vm10371_vm11 = vcmp.eq.s32.totalorder %v765_v24, %v12285_v25  ;;  %v3193_v8 = vpop.permute.xlu0 %3192 }
 0x89c   : > { %7061 = vmatpush3.bf16.xpose.msra.mxu0 %v3228_v18  ;;  %vm12571_vm7 = vmmov %vm12544_vm0  ;;  %vm10355_vm0 = vcmp.eq.s32.totalorder %v732_v33, 3  ;;  %v10376_v18 = vsel %vm794_vm2, 1.0, %v12326_v58 }
 0x89d   : > { %7930 = vmatprep.subr.msk.bf16.mxu0 %vm12567_vm12, %v3189_v28  ;;  %vm795_vm14 = vmand %vm10330_vm10, %vm10325_vm9  ;;  %12580 = vst [vmem:[#allocation20_spill] sm:$0xff] %v10376_v18 }
 0x89e   : > { %7036 = vmatmul.mubr.msk.f32.gmra.mrb[94].mxu0 %vm12569_vm13, %v10338_v45  ;;  %vm12581_vm9 = vmmov %vm12571_vm7  ;;  %v10381_v60 = vsel %vm795_vm14, 1.0, %v12326_v58 }
 0x89f   : > { %7038 = vmatprep.mubr.msk.f32.mxu0 %vm12571_vm7, %v10343_v54  ;;  %12582 = vst [vmem:[#allocation24_spill] sm:$0xff] %v10381_v60  ;;  %vm796_vm10 = vmand %vm10360_vm3, %vm10355_vm0 }
 0x8a0   : > { %vm12583_vm12 = vmmov %vm12571_vm7  ;;  %v10397_v33 = vsel %vm796_vm10, 1.0, %v12326_v58 }
 0x8a1   : > { %v3231_v22 = vsel %vm12583_vm12, %v3189_v28, 0  ;;  %vm12584_vm13 = vmmov %vm12571_vm7  ;;  %vm750_vm7 = vcmp.eq.s32.totalorder %v734_v1, 3  ;;  %12586 = vst [vmem:[#allocation28_spill] sm:$0xff] %v10397_v33 }
 0x8a2   : > { %7039 = vmatmul.mubr.msk.f32.gmra.mrb[96].mxu0 %vm12581_vm9, %v10376_v18  ;;  %vm797_vm2 = vmand %vm10371_vm11, %vm10366_vm1  ;;  %vm782_vm9 = vcmp.eq.s32.totalorder %v766_v36, %v12285_v25  ;;  %v3169_v25 = vpop.permute.xlu1 %3168 }
 0x8a3   : > { %7041 = vmatprep.mubr.msk.f32.mxu0 %vm12584_vm13, %v10381_v60  ;;  %vm12585_vm14 = vmmov %vm12583_vm12  ;;  %v10402_v13 = vsel %vm797_vm2, 1.0, %v12326_v58 }
 0x8a4   : > { %7063 = vmatpush3.bf16.xpose.msra.mxu0 %v3231_v22  ;;  %vm12587_vm0 = vmmov %vm12583_vm12  ;;  %12588 = vst [vmem:[#allocation32_spill] sm:$0xff] %v10402_v13 }
 0x8a5   : > { %7931 = vmatprep.subr.msk.bf16.mxu0 %vm12585_vm14, %v3191_v9  ;;  %vm798_vm3 = vmand %vm782_vm9, %vm750_vm7 }
 0x8a6   : > { %7042 = vmatmul.mubr.msk.f32.gmra.mrb[98].mxu0 %vm12587_vm0, %v10397_v33  ;;  %vm12589_vm12 = vmmov %vm12587_vm0  ;;  %v10407_v28 = vsel %vm798_vm3, 1.0, %v12326_v58 }
 0x8a7   : > { %7044 = vmatprep.mubr.msk.f32.mxu0 %vm12589_vm12, %v10402_v13  ;;  %12590 = vst [vmem:[#allocation10_spill] sm:$0xff] %v10407_v28  ;;  %vm12591_vm1 = vmmov %vm12587_vm0 }
 0x8a8   : > { %vm12592_vm11 = vmmov %vm12587_vm0 }
 0x8a9   : > { %vm12593_vm10 = vmmov %vm12587_vm0 }
 0x8aa   : > { %7045 = vmatmul.mubr.msk.f32.gmra.mrb[100].mxu0 %vm12591_vm1, %v10407_v28  ;;  %v3234_v47 = vsel %vm12593_vm10, %v3191_v9, 0  ;;  %vm12594_vm13 = vmmov %vm12587_vm0 }
 0x8ab   : > { %7074 = vmatprep.mubr.msk.bf16.mxu0 %vm12592_vm11, %v3169_v25  ;;  %v7124_v44 = vpop.f32.mrb[58].mxu1  ;;  %vm12595_vm2 = vmmov %vm12587_vm0  ;;  %v3197_v25 = vpop.permute.xlu0 %3196 }
 0x8ac   : > { %7065 = vmatpush3.bf16.xpose.msra.mxu0 %v3234_v47  ;;  %v3611_v24 = vpop.f32.mrb[59].mxu1  ;;  %vm12597_vm7 = vmmov %vm12587_vm0 }
 0x8ad   : > { %v10413_v5 = vpack.c.bf16 %v7124_v44, %v3611_v24  ;;  %7932 = vmatprep.subr.msk.bf16.mxu0 %vm12594_vm13, %v3193_v8  ;;  %v3237_v55 = vsel %vm12597_vm7, %v3193_v8, 0  ;;  %vm12598_vm9 = vmmov %vm12587_vm0 }
 0x8ae   : > { %vm12601_vm14 = vmmov %vm12587_vm0 }
 0x8af   : > { %7230 = vmatprep.mubr.msk.bf16.mxu1 %vm12595_vm2, %v10413_v5  ;;  %v7127_v19 = vpop.f32.mrb[60].mxu1  ;;  %v3240_v13 = vsel %vm12601_vm14, %v3195_v27, 0  ;;  %v8081_v28 = vpop.permute.xlu0 %8080  ;;  %vm12602_vm3 = vmmov %vm12587_vm0 }
 0x8b0   : > { %v3621_v1 = vpop.f32.mrb[61].mxu1  ;;  %vm12603_vm12 = vmmov %vm12587_vm0 }
 0x8b1   : > { %v10418_v36 = vpack.c.bf16 %v7127_v19, %v3621_v1  ;;  %v8086_v19 = vpop.permute.xlu1 %8085  ;;  %v3243_v1 = vsel %vm12602_vm3, %v3197_v25, 0  ;;  %vm12604_vm1 = vmmov %vm12587_vm0 }
 0x8b2   : > { %v8088_v3 = vunpack.i.h.bf16 %v8086_v19  ;;  %vm12605_vm11 = vmmov %vm12587_vm0 }
 0x8b3   : > { %12596 = vst [vmem:[#allocation9_spill] sm:$0xff] %v10418_v36  ;;  %v7130_v20 = vpop.f32.mrb[62].mxu1  ;;  %v3171_v8 = vpop.permute.xlu0 %3170  ;;  %vm12606_vm10 = vmmov %vm12587_vm0 }
 0x8b4   : > { %7067 = vmatpush3.bf16.xpose.msra.mxu0 %v3237_v55  ;;  %v3631_v22 = vpop.f32.mrb[63].mxu1  ;;  %vm12607_vm13 = vmmov %vm12587_vm0 }
 0x8b5   : > { %7933 = vmatprep.subr.msk.bf16.mxu0 %vm12598_vm9, %v3195_v27  ;;  %v10422_v9 = vpack.c.bf16 %v7130_v20, %v3631_v22  ;;  %v3173_v55 = vpop.permute.xlu1 %3172  ;;  %v8083_v20 = vunpack.i.h.bf16 %v8081_v28  ;;  %v8082_v22 = vunpack.i.l.bf16 %v8081_v28  ;;  %vm12608_vm2 = vmmov %vm12587_vm0 }
 0x8b6   : > { %vm12609_vm7 = vmmov %vm12587_vm0 }
 0x8b7   : > { %12599 = vst [vmem:[#allocation15_spill] sm:$0xff] %v10422_v9  ;;  %v7133_v44 = vpop.f32.mrb[64].mxu1  ;;  %v8091_v60 = vpop.permute.xlu0 %8090  ;;  %vm12610_vm9 = vmmov %vm12587_vm0 }
 0x8b8   : > { %v3641_v47 = vpop.f32.mrb[65].mxu1  ;;  %vm12611_vm14 = vmmov %vm12587_vm0 }
 0x8b9   : > { %v10424_v24 = vpack.c.bf16 %v7133_v44, %v3641_v47  ;;  %v3246_v44 = vsel %vm12604_vm1, %v3199_v57, 0  ;;  %v7766_v47 = vpack.c.bf16 %v8083_v20, %v8082_v22  ;;  %v8096_v27 = vpop.permute.xlu1 %8095  ;;  %v8093_v22 = vunpack.i.h.bf16 %v8091_v60  ;;  %vm12612_vm3 = vmmov %vm12587_vm0 }
 0x8ba   : > { %vm12614_vm1 = vmmov %vm12587_vm0 }
 0x8bb   : > { %12600 = vst [vmem:[#allocation14_spill] sm:$0xff] %v10424_v24  ;;  %v3175_v54 = vpop.permute.xlu0 %3174 }
 0x8bc   : > { %7069 = vmatpush3.bf16.xpose.msra.mxu0 %v3240_v13 }
 0x8bd   : > { %7934 = vmatprep.subr.msk.bf16.mxu0 %vm12587_vm0, %v3197_v25  ;;  %v8087_v25 = vunpack.i.l.bf16 %v8086_v19  ;;  %v3177_v20 = vpop.permute.xlu1 %3176 }
 0x8c4   : > { %7071 = vmatpush3.bf16.xpose.msra.mxu0 %v3243_v1 }
 0x8c5   : > { %7935 = vmatprep.subr.msk.bf16.mxu0 %vm12603_vm12, %v3199_v57  ;;  %vm12613_vm12 = vmmov %vm12587_vm0 }
 0x8cb   : > { %v7168_v33 = vpop.f32.mrb[66].mxu1 }
 0x8cc   : > { %7073 = vmatpush3.bf16.xpose.msra.mxu0 %v3246_v44  ;;  %v3764_v13 = vpop.f32.mrb[67].mxu1  ;;  %v8092_v44 = vunpack.i.l.bf16 %v8091_v60  ;;  %v8097_v60 = vunpack.i.l.bf16 %v8096_v27 }
 0x8cd   : > { %v10431_v39 = vpack.c.bf16 %v7168_v33, %v3764_v13  ;;  %7767 = vmatprep.subr.bf16.mxu0 %v7766_v47  ;;  %v7770_v33 = vpack.c.bf16 %v8088_v3, %v8087_v25  ;;  %v8101_v13 = vpop.permute.xlu0 %8100  ;;  %v8106_v3 = vpop.permute.xlu1 %8105 }
 0x8ce   : > { %v7774_v59 = vpack.c.bf16 %v8093_v22, %v8092_v44  ;;  %v8103_v14 = vunpack.i.h.bf16 %v8101_v13  ;;  %v8102_v61 = vunpack.i.l.bf16 %v8101_v13  ;;  %v8108_v44 = vunpack.i.h.bf16 %v8106_v3 }
 0x8cf   : > { %7936 = vmatprep.subr.msk.bf16.mxu1 %vm12605_vm11, %v10431_v39  ;;  %v3993_v28 = vsel %vm12606_vm10, %v10431_v39, 0  ;;  %v7171_v1 = vpop.f32.mrb[68].mxu1  ;;  %vm12615_vm11 = vmmov %vm12587_vm0 }
 0x8d0   : > { %7223 = vmatpush3.bf16.xpose.msra.mxu1 %v3993_v28  ;;  %v3774_v18 = vpop.f32.mrb[69].mxu1  ;;  %vm12616_vm10 = vmmov %vm12587_vm0 }
 0x8d1   : > { %v10437_v57 = vpack.c.bf16 %v7171_v1, %v3774_v18  ;;  %v8098_v1 = vunpack.i.h.bf16 %v8096_v27  ;;  %v3181_v22 = vpop.permute.xlu1 %3180 }
 0x8d3   : > { %7075 = vmatmul.mubr.msk.bf16.vlgmr.msra.gmra.mrb[104].mxu0 %vm12607_vm13, %v3171_v8  ;;  %7937 = vmatprep.subr.msk.bf16.mxu1 %vm12608_vm2, %v10437_v57  ;;  %v7174_v19 = vpop.f32.mrb[70].mxu1  ;;  %v3996_v18 = vsel %vm12610_vm9, %v10437_v57, 0  ;;  %vm12617_vm13 = vmmov %vm12587_vm0 }
 0x8d4   : > { %7078 = vmatprep.mubr.msk.bf16.mxu0 %vm12609_vm7, %v3173_v55  ;;  %7769 = vmatpush3.bf16.msra.mxu0 %v7766_v47  ;;  %v3784_v45 = vpop.f32.mrb[71].mxu1  ;;  %v3179_v47 = vpop.permute.xlu0 %3178  ;;  %vm12618_vm2 = vmmov %vm12587_vm0 }
 0x8d5   : > { %7771 = vmatprep.subr.bf16.mxu0 %v7770_v33  ;;  %v10445_v28 = vpack.c.bf16 %v7174_v19, %v3784_v45  ;;  %v7778_v45 = vpack.c.bf16 %v8098_v1, %v8097_v60  ;;  %v7782_v19 = vpack.c.bf16 %v8103_v14, %v8102_v61  ;;  %vm12619_vm7 = vmmov %vm12587_vm0 }
 0x8d6   : > { %vm12620_vm9 = vmmov %vm12587_vm0 }
 0x8d7   : > { %v7177_v8 = vpop.f32.mrb[72].mxu1  ;;  %v3999_v27 = vsel %vm12613_vm12, %v10445_v28, 0  ;;  %vm12647_vm12 = vnez %v12163_v29 }
 0x8d8   : > { %7773 = vmatpush3.bf16.msra.mxu0 %v7770_v33  ;;  %7225 = vmatpush3.bf16.xpose.msra.mxu1 %v3996_v18  ;;  %v3794_v25 = vpop.f32.mrb[73].mxu1  ;;  %v8107_v33 = vunpack.i.l.bf16 %v8106_v3  ;;  %v8111_v18 = vpop.permute.xlu0 %8110 }
 0x8d9   : > { %7775 = vmatprep.subr.bf16.mxu0 %v7774_v59  ;;  %7938 = vmatprep.subr.msk.bf16.mxu1 %vm12611_vm14, %v10445_v28  ;;  %v10449_v55 = vpack.c.bf16 %v7177_v8, %v3794_v25  ;;  %v8112_v13 = vunpack.i.l.bf16 %v8111_v18  ;;  %vm12621_vm14 = vmmov %vm12587_vm0 }
 0x8db   : > { %7079 = vmatmul.mubr.msk.bf16.gmra.mrb[108].mxu0 %vm12587_vm0, %v3175_v54  ;;  %v8113_v54 = vunpack.i.h.bf16 %v8111_v18  ;;  %v4002_v14 = vsel %vm12617_vm13, %v10449_v55, 0  ;;  %vm12625_vm0 = vnez %v12499_v30 }
 0x8dc   : > { %7082 = vmatprep.mubr.msk.bf16.mxu0 %vm12612_vm3, %v3177_v20  ;;  %7777 = vmatpush3.bf16.msra.mxu0 %v7774_v59  ;;  %v7786_v59 = vpack.c.bf16 %v8108_v44, %v8107_v33  ;;  %v8116_v20 = vpop.permute.xlu1 %8115  ;;  %v3183_v8 = vpop.permute.xlu0 %3182  ;;  %vm12646_vm3 = vnez %v12159_v26  ;;  %v12914_v26 = vld [vmem:[#allocation91_spill] sm:$0xff] }
 0x8dd   : > { %7779 = vmatprep.subr.bf16.mxu0 %v7778_v45  ;;  %v8118_v61 = vunpack.i.h.bf16 %v8116_v20  ;;  %v8117_v1 = vunpack.i.l.bf16 %v8116_v20  ;;  %v7790_v60 = vpack.c.bf16 %v8113_v54, %v8112_v13  ;;  %v12640_v20 = vld [vmem:[#allocation77_spill] sm:$0xff] }
 0x8df   : > { %v7794_v3 = vpack.c.bf16 %v8118_v61, %v8117_v1  ;;  %v12642_v61 = vld [vmem:[#allocation82_spill] sm:$0xff] }
 0x8e0   : > { %7781 = vmatpush3.bf16.msra.mxu0 %v7778_v45  ;;  %7227 = vmatpush3.bf16.xpose.msra.mxu1 %v3999_v27 }
 0x8e1   : > { %7783 = vmatprep.subr.bf16.mxu0 %v7782_v19  ;;  %7939 = vmatprep.subr.msk.bf16.mxu1 %vm12614_vm1, %v10449_v55 }
 0x8e3   : > { %7083 = vmatmul.mubr.msk.bf16.gmra.mrb[112].mxu0 %vm12615_vm11, %v3179_v47 }
 0x8e4   : > { %7086 = vmatprep.mubr.msk.bf16.mxu0 %vm12616_vm10, %v3181_v22  ;;  %7785 = vmatpush3.bf16.msra.mxu0 %v7782_v19  ;;  %vm12650_vm10 = vnez %v12166_v53 }
 0x8e5   : > { %7787 = vmatprep.subr.bf16.mxu0 %v7786_v59 }
 0x8e8   : > { %7789 = vmatpush3.bf16.msra.mxu0 %v7786_v59  ;;  %7229 = vmatpush3.bf16.xpose.msra.mxu1 %v4002_v14 }
 0x8e9   : > { %7791 = vmatprep.subr.bf16.mxu0 %v7790_v60 }
 0x8eb   : > { %7087 = vmatmul.mubr.msk.bf16.gmra.mrb[116].mxu0 %vm12618_vm2, %v3183_v8 }
 0x8ec   : > { %7793 = vmatpush3.bf16.msra.mxu0 %v7790_v60  ;;  %7210 = vmatprep.mubr.msk.f32.mxu0 %vm12289_vm8, %v12411_v4  ;;  %vm12622_vm8 = vcmask 523264  }
 0x8ed   : > { %7795 = vmatprep.subr.bf16.mxu0 %v7794_v3 }
 0x8ef   : > { %7231 = vmatmul.mubr.msk.bf16.vlgmr.msra.gmra.mrb[76].mxu1 %vm12619_vm7, %v10418_v36 }
 0x8f0   : > { %7797 = vmatpush3.bf16.msra.mxu0 %v7794_v3  ;;  %7234 = vmatprep.mubr.msk.bf16.mxu1 %vm12620_vm9, %v10422_v9 }
 0x8f3   : > { %7211 = vmatmul.mubr.msk.f32.vlgmr.msra.gmra.mrb[102].mxu0 %vm12292_vm4, %v12411_v4  ;;  %vm12623_vm4 = vnez %v12495_v16 }
 0x8f4   : > { %7213 = vmatprep.mubr.msk.f32.mxu0 %vm12297_vm15, %v12411_v4  ;;  %vm12624_vm15 = vnez %v12497_v41 }
 0x8f7   : > { %7235 = vmatmul.mubr.msk.bf16.gmra.mrb[80].mxu1 %vm12621_vm14, %v10424_v24  ;;  %7214 = vmatmul.mubr.msk.f32.gmra.mrb[120].mxu0 %vm12300_vm5, %v12411_v4  ;;  %vm12644_vm5 = vnez %v12157_v37  ;;  %v12697_v24 = vld [vmem:[#allocation45_spill] sm:$0xff] }
 0x8f8   : > { %7216 = vmatprep.mubr.msk.f32.mxu0 %vm12494_vm6, %v12411_v4  ;;  %7270 = vmatprep.mubr.msk.f32.mxu1 %vm12622_vm8, %v9450_v11  ;;  %vm12645_vm6 = vmmov %vm12622_vm8 }
 0x8f9   : > { %vm12648_vm1 = vmmov %vm12645_vm6 }
 0x8fa   : > { %vm12649_vm11 = vmmov %vm12648_vm1 }
 0x8fb   : > { %7217 = vmatmul.mubr.msk.f32.gmra.mrb[122].mxu0 %vm12623_vm4, %v12411_v4  ;;  %vm12653_vm2 = vmmov %vm12648_vm1 }
 0x8fc   : > { %7219 = vmatprep.mubr.msk.f32.mxu0 %vm12624_vm15, %v12411_v4  ;;  %vm12654_vm7 = vmmov %vm12648_vm1 }
 0x8fd   : > { %vm12659_vm8 = vmmov %vm12648_vm1 }
 0x8fe   : > { %vm12660_vm4 = vmmov %vm12648_vm1 }
 0x8ff   : > { %7220 = vmatmul.mubr.msk.f32.gmra.mrb[124].mxu0 %vm12625_vm0, %v12411_v4  ;;  %vm12663_vm0 = vmmov %vm12648_vm1 }
 0x961   : > { %v7025_v34 = vpop.f32.mrb[82].mxu0 }
 0x962   : > { %v10495_v56 = vadd.f32 %v7025_v34, %v9886_v2  ;;  %v2845_v50 = vpop.f32.mrb[83].mxu0 }
 0x963   : > { %v10498_v21 = vadd.f32 %v2845_v50, %v9889_v38 }
 0x964   : > { %12626 = vst [vmem:[#allocation19_spill] sm:$0xff] %v10495_v56 }
 0x965   : > { %12627 = vst [vmem:[#allocation18_spill] sm:$0xff] %v10498_v21  ;;  %v7028_v51 = vpop.f32.mrb[88].mxu0 }
 0x966   : > { %v10501_v16 = vadd.f32 %v7028_v51, %v9892_v62  ;;  %v2855_v25 = vpop.f32.mrb[89].mxu0 }
 0x967   : > { %v10504_v41 = vadd.f32 %v2855_v25, %v9895_v7 }
 0x968   : > { %12628 = vst [vmem:[#allocation23_spill] sm:$0xff] %v10501_v16 }
 0x969   : > { %12629 = vst [vmem:[#allocation22_spill] sm:$0xff] %v10504_v41  ;;  %v7031_v47 = vpop.f32.mrb[90].mxu0 }
 0x96a   : > { %v10507_v30 = vadd.f32 %v7031_v47, %v9898_v43  ;;  %v2865_v45 = vpop.f32.mrb[91].mxu0 }
 0x96b   : > { %v10510_v2 = vadd.f32 %v2865_v45, %v9901_v63 }
 0x96c   : > { %12630 = vst [vmem:[#allocation27_spill] sm:$0xff] %v10507_v30  ;;  %v12666_v30 = vld [vmem:[#allocation71_spill] sm:$0xff] }
 0x96d   : > { %12631 = vst [vmem:[#allocation26_spill] sm:$0xff] %v10510_v2  ;;  %v7034_v27 = vpop.f32.mrb[92].mxu0 }
 0x96e   : > { %v10513_v38 = vadd.f32 %v7034_v27, %v9904_v23  ;;  %v2875_v22 = vpop.f32.mrb[93].mxu0 }
 0x96f   : > { %v10516_v62 = vadd.f32 %v2875_v22, %v9907_v49 }
 0x970   : > { %12632 = vst [vmem:[#allocation31_spill] sm:$0xff] %v10513_v38  ;;  %v12664_v38 = vld [vmem:[#allocation69_spill] sm:$0xff] }
 0x971   : > { %12633 = vst [vmem:[#allocation30_spill] sm:$0xff] %v10516_v62  ;;  %v7037_v44 = vpop.f32.mrb[94].mxu0  ;;  %v12661_v62 = vld [vmem:[#allocation68_spill] sm:$0xff] }
 0x972   : > { %v10519_v7 = vadd.f32 %v7037_v44, %v9910_v12  ;;  %v2885_v33 = vpop.f32.mrb[95].mxu0  ;;  %vm12662_vm15 = vnez %v12661_v62  ;;  %v12707_v62 = vld [vmem:[#allocation95_spill] sm:$0xff] }
 0x973   : > { %v10522_v43 = vadd.f32 %v2885_v33, %v9913_v52 }
 0x974   : > { %12634 = vst [vmem:[#allocation36_spill] sm:$0xff] %v10519_v7 }
 0x975   : > { %12635 = vst [vmem:[#allocation35_spill] sm:$0xff] %v10522_v43  ;;  %v7040_v19 = vpop.f32.mrb[96].mxu0  ;;  %v12655_v43 = vld [vmem:[#allocation66_spill] sm:$0xff] }
 0x976   : > { %v10525_v63 = vadd.f32 %v7040_v19, %v9916_v46  ;;  %v2895_v18 = vpop.f32.mrb[97].mxu0  ;;  %vm12656_vm9 = vnez %v12655_v43 }
 0x977   : > { %v10528_v23 = vadd.f32 %v2895_v18, %v9919_v15 }
 0x978   : > { %12636 = vst [vmem:[#allocation41_spill] sm:$0xff] %v10525_v63 }
 0x979   : > { %12637 = vst [vmem:[#allocation40_spill] sm:$0xff] %v10528_v23  ;;  %v7043_v54 = vpop.f32.mrb[98].mxu0 }
 0x97a   : > { %v10531_v49 = vadd.f32 %v7043_v54, %v9922_v17  ;;  %v2905_v13 = vpop.f32.mrb[99].mxu0 }
 0x97b   : > { %v10534_v12 = vadd.f32 %v2905_v13, %v9925_v10 }
 0x97c   : > { %12638 = vst [vmem:[#allocation54_spill] sm:$0xff] %v10531_v49  ;;  %v12651_v49 = vld [vmem:[#allocation65_spill] sm:$0xff] }
 0x97d   : > { %12639 = vst [vmem:[#allocation55_spill] sm:$0xff] %v10534_v12  ;;  %v7046_v59 = vpop.f32.mrb[100].mxu0  ;;  %vm12652_vm13 = vnez %v12651_v49 }
 0x97e   : > { %v10537_v52 = vadd.f32 %v7046_v59, %v12640_v20  ;;  %v2915_v14 = vpop.f32.mrb[101].mxu0 }
 0x97f   : > { %v10540_v46 = vadd.f32 %v2915_v14, %v12642_v61 }
 0x980   : > { %12641 = vst [vmem:[#allocation58_spill] sm:$0xff] %v10537_v52 }
 0x981   : > { %12643 = vst [vmem:[#allocation59_spill] sm:$0xff] %v10540_v46 }
 0x9a6   : > { %v7076_v1 = vpop.f32.mrb[104].mxu0 }
 0x9a7   : > { %v3282_v60 = vpop.f32.mrb[105].mxu0 }
 0x9a8   : > { %v10542_v15 = vpop.f32.mrb[106].mxu0 }
 0x9a9   : > { %v3285_v8 = vpop.f32.mrb[107].mxu0 }
 0x9ae   : > { %v10544_v3 = vpop.f32.mrb[108].mxu0 }
 0x9af   : > { %v10546_v17 = vpop.f32.mrb[109].mxu0 }
 0x9b0   : > { %v10548_v34 = vpop.f32.mrb[110].mxu0 }
 0x9b1   : > { %v10550_v10 = vpop.f32.mrb[111].mxu0 }
 0x9b6   : > { %v10552_v50 = vpop.f32.mrb[112].mxu0 }
 0x9b7   : > { %v10554_v51 = vpop.f32.mrb[113].mxu0 }
 0x9b8   : > { %v10556_v25 = vpop.f32.mrb[114].mxu0 }
 0x9b9   : > { %v10558_v47 = vpop.f32.mrb[115].mxu0 }
 0x9be   : > { %v10560_v45 = vpop.f32.mrb[116].mxu0 }
 0x9bf   : > { %v10562_v27 = vpop.f32.mrb[117].mxu0 }
 0x9c0   : > { %v10564_v22 = vpop.f32.mrb[118].mxu0 }
 0x9c1   : > { %v10566_v44 = vpop.f32.mrb[119].mxu0 }
 0x9c2   : > { %v7232_v33 = vpop.f32.mrb[76].mxu1 }
 0x9c3   : > { %v4038_v19 = vpop.f32.mrb[77].mxu1  ;;  %v10576_v20 = vsel %vm12646_vm3, %v7232_v33, -3.4028235e+38 }
 0x9c4   : > { %v10570_v18 = vsel %vm12644_vm5, %v4038_v19, -3.4028235e+38  ;;  %v7233_v54 = vpop.f32.mrb[78].mxu1  ;;  %v4083_v19 = vsel %vm12649_vm11, %v10576_v20, -inf }
 0x9c5   : > { %v4041_v13 = vpop.f32.mrb[79].mxu1  ;;  %v4077_v59 = vsel %vm12645_vm6, %v10570_v18, -inf  ;;  %v10588_v52 = vsel %vm12650_vm10, %v7233_v54, -3.4028235e+38  ;;  %v12657_v54 = vld [vmem:[#allocation67_spill] sm:$0xff]  ;;  %vm12665_vm6 = vnez %v12664_v38 }
 0x9c6   : > { %v10580_v14 = vsel %vm12647_vm12, %v4041_v13, -3.4028235e+38  ;;  %4078 = vmax.xlane.f32.xlu0 %v4077_v59  ;;  %v4086_v23 = vsel %vm12653_vm2, %v10588_v52, -inf  ;;  %vm12658_vm14 = vnez %v12657_v54 }
 0x9c7   : > { %v4080_v61 = vsel %vm12648_vm1, %v10580_v14, -inf  ;;  %vm12667_vm1 = vnez %v12666_v30 }
 0x9c8   : > { %4081 = vmax.xlane.f32.xlu1 %v4080_v61  ;;  %v10623_v41 = vsel %vm12667_vm1, %v3285_v8, -3.4028235e+38 }
 0x9ca   : > { %4084 = vmax.xlane.f32.xlu0 %v4083_v19  ;;  %v7236_v46 = vpop.f32.mrb[80].mxu1 }
 0x9cb   : > { %v4054_v33 = vpop.f32.mrb[81].mxu1  ;;  %v10600_v63 = vsel %vm12656_vm9, %v7236_v46, -3.4028235e+38 }
 0x9cc   : > { %v10592_v12 = vsel %vm12652_vm13, %v4054_v33, -3.4028235e+38  ;;  %v7237_v13 = vpop.f32.mrb[82].mxu1  ;;  %v4095_v33 = vsel %vm12659_vm8, %v10600_v63, -inf }
 0x9cd   : > { %v4057_v59 = vpop.f32.mrb[83].mxu1  ;;  %v4089_v61 = vsel %vm12654_vm7, %v10592_v12, -inf  ;;  %v10612_v2 = vsel %vm12662_vm15, %v7237_v13, -3.4028235e+38 }
 0x9ce   : > { %v10604_v19 = vsel %vm12658_vm14, %v4057_v59, -3.4028235e+38  ;;  %4087 = vmax.xlane.f32.xlu0 %v4086_v23  ;;  %4090 = vmax.xlane.f32.xlu1 %v4089_v61  ;;  %v4098_v46 = vsel %vm12663_vm0, %v10612_v2, -inf  ;;  %v10618_v59 = vsel %vm12665_vm6, %v3282_v60, -3.4028235e+38  ;;  %v7212_v23 = vpop.f32.mrb[102].mxu0 }
 0x9cf   : > { %v4092_v7 = vsel %vm12660_vm4, %v10604_v19, -inf  ;;  %v3933_v61 = vpop.f32.mrb[103].mxu0  ;;  %v12669_v60 = vld [vmem:[#allocation70_spill] sm:$0xff] }
 0x9d0   : > { %v10625_v13 = vpack.c.bf16 %v7212_v23, %v3933_v61  ;;  %vm12670_vm11 = vnez %v12669_v60  ;;  %v12672_v61 = vld [vmem:[#allocation73_spill] sm:$0xff] }
 0x9d1   : > { %vm12673_vm2 = vnez %v12672_v61  ;;  %v12837_v61 = vld [vmem:[#allocation102_spill] sm:$0xff] }
 0x9d2   : > { %4096 = vmax.xlane.f32.xlu1 %v4095_v33  ;;  %4093 = vmax.xlane.f32.xlu0 %v4092_v7  ;;  %12668 = vst [vmem:[#allocation77_spill] sm:$0xff] %v10625_v13  ;;  %v7215_v7 = vpop.f32.mrb[120].mxu0  ;;  %v10642_v16 = vsel %vm12673_vm2, %v10542_v15, -3.4028235e+38  ;;  %v12677_v15 = vld [vmem:[#allocation39_spill] sm:$0xff] }
 0x9d3   : > { %7238 = vmatprep.subr.bf16.mxu0 %v10625_v13  ;;  %v3943_v33 = vpop.f32.mrb[121].mxu0 }
 0x9d4   : > { %7239 = vmatpush3.bf16.msra.mxu0 %v10625_v13  ;;  %v10634_v21 = vpack.c.bf16 %v7215_v7, %v3943_v33  ;;  %v7218_v8 = vpop.f32.mrb[122].mxu0 }
 0x9d5   : > { %v3953_v23 = vpop.f32.mrb[123].mxu0 }
 0x9d6   : > { %4099 = vmax.xlane.f32.xlu0 %v4098_v46  ;;  %3361 = vmax.xlane.f32.xlu1 %v10618_v59  ;;  %v10632_v46 = vsel %vm12670_vm11, %v7076_v1, -3.4028235e+38  ;;  %12671 = vst [vmem:[#allocation82_spill] sm:$0xff] %v10634_v21  ;;  %v10644_v56 = vpack.c.bf16 %v7218_v8, %v3953_v23  ;;  %v7221_v1 = vpop.f32.mrb[124].mxu0  ;;  %v12678_v8 = vld [vmem:[#allocation75_spill] sm:$0xff] }
 0x9d7   : > { %7240 = vmatprep.subr.bf16.mxu0 %v10634_v21  ;;  %v3963_v7 = vpop.f32.mrb[125].mxu0  ;;  %vm12679_vm7 = vnez %v12678_v8 }
 0x9d8   : > { %7241 = vmatpush3.bf16.msra.mxu0 %v10634_v21  ;;  %12674 = vst [vmem:[#allocation65_spill] sm:$0xff] %v10644_v56  ;;  %v10649_v33 = vpack.c.bf16 %v7221_v1, %v3963_v7  ;;  %v10660_v23 = vsel %vm12679_vm7, %v10546_v17, -3.4028235e+38  ;;  %v12680_v1 = vld [vmem:[#allocation79_spill] sm:$0xff]  ;;  %vm12689_vm7 = vnez %v12688_v48 }
 0x9d9   : > { %7242 = vmatprep.subr.bf16.mxu0 %v10644_v56  ;;  %vm12681_vm8 = vnez %v12680_v1  ;;  %v12685_v17 = vld [vmem:[#allocation83_spill] sm:$0xff] }
 0x9da   : > { %3363 = vmax.xlane.f32.xlu0 %v10623_v41  ;;  %12675 = vst [vmem:[#allocation66_spill] sm:$0xff] %v10649_v33  ;;  %v10666_v7 = vsel %vm12681_vm8, %v10550_v10, -3.4028235e+38  ;;  %vm12686_vm0 = vnez %v12685_v17  ;;  %v12687_v10 = vld [vmem:[#allocation43_spill] sm:$0xff] }
 0x9db   : > { %v10680_v11 = vsel %vm12686_vm0, %v10548_v34, -3.4028235e+38  ;;  %vm12694_vm0 = vnez %v12693_v6 }
 0x9dc   : > { %7243 = vmatpush3.bf16.msra.mxu0 %v10644_v56  ;;  %v12695_v56 = vld [vmem:[#allocation88_spill] sm:$0xff] }
 0x9dd   : > { %7244 = vmatprep.subr.bf16.mxu0 %v10649_v33 }
 0x9de   : > { %3365 = vmax.xlane.f32.xlu0 %v10632_v46 }
 0x9e0   : > { %7245 = vmatpush3.bf16.msra.mxu0 %v10649_v33 }
 0x9e2   : > { %3367 = vmax.xlane.f32.xlu0 %v10642_v16 }
 0x9e7   : > { %4371 = vrot.lane.b32.xlu1 %v12676_v31, %s8328_s30  ;;  %v12682_v31 = vld [vmem:[#allocation78_spill] sm:$0xff] }
 0x9e8   : > { %vm12683_vm4 = vnez %v12682_v31 }
 0x9e9   : > { %v10672_v40 = vsel %vm12683_vm4, %v10544_v3, -3.4028235e+38  ;;  %v10688_v3 = vsel %vm12689_vm7, %v10554_v51, -3.4028235e+38  ;;  %vm12696_vm7 = vnez %v12695_v56 }
 0x9f8   : > { %4373 = vrot.lane.b32.xlu0 %v12677_v15, %s8328_s30  ;;  %v12684_v15 = vld [vmem:[#allocation42_spill] sm:$0xff] }
 0xa0b   : > { %3369 = vmax.xlane.f32.xlu1 %v10660_v23 }
 0xa17   : > { %3371 = vmax.xlane.f32.xlu0 %v10666_v7 }
 0xa1b   : > { %3373 = vmax.xlane.f32.xlu0 %v10672_v40 }
 0xa1c   : > { %4375 = vrot.lane.b32.xlu1 %v12684_v15, %s8328_s30  ;;  %v12691_v15 = vld [vmem:[#allocation89_spill] sm:$0xff] }
 0xa1d   : > { %vm12692_vm4 = vnez %v12691_v15 }
 0xa1e   : > { %v10696_v34 = vsel %vm12692_vm4, %v10558_v47, -3.4028235e+38  ;;  %v10710_v47 = vsel %vm12696_vm7, %v10552_v50, -3.4028235e+38 }
 0xa1f   : > { %3375 = vmax.xlane.f32.xlu0 %v10680_v11 }
 0xa20   : > { %4377 = vrot.lane.b32.xlu1 %v12687_v10, %s8328_s30  ;;  %v10702_v10 = vsel %vm12694_vm0, %v10556_v25, -3.4028235e+38 }
 0xa23   : > { %3377 = vmax.xlane.f32.xlu0 %v10688_v3 }
 0xa39   : > { %4379 = vrot.lane.b32.xlu0 %v12690_v0, %s8328_s30 }
 0xa44   : > { %3379 = vmax.xlane.f32.xlu1 %v10696_v34 }
 0xa48   : > { %3383 = vmax.xlane.f32.xlu1 %v10702_v10 }
 0xa53   : > { %v4079_v51 = vpop.xlane.xlu0 %4078 }
 0xa54   : > { %v4101_v32 = vsub.f32 %v10570_v18, %v4079_v51 }
 0xa55   : > { %v4082_v42 = vpop.xlane.xlu1 %4081 }
 0xa56   : > { %v4109_v33 = vmul.f32 1.442695, %v4101_v32  ;;  %v4102_v0 = vsub.f32 %v10580_v14, %v4082_v42  ;;  %v12698_v32 = vld [vmem:[#allocation93_spill] sm:$0xff] }
 0xa57   : > { %v4085_v21 = vpop.xlane.xlu0 %4084  ;;  %vm12699_vm0 = vnez %v12698_v32 }
 0xa58   : > { %8193 = vpow2.f32 %v4109_v33  ;;  %v4111_v13 = vmul.f32 1.442695, %v4102_v0  ;;  %v4103_v25 = vsub.f32 %v10576_v20, %v4085_v21  ;;  %3381 = vmax.xlane.f32.xlu0 %v10710_v47  ;;  %v10719_v42 = vsel %vm12699_vm0, %v10562_v27, -3.4028235e+38 }
 0xa59   : > { %4381 = vrot.lane.b32.xlu1 %v12697_v24, %s8328_s30  ;;  %vm12700_vm0 = vcmask 523264  }
 0xa5a   : > { %8195 = vpow2.f32 %v4111_v13  ;;  %v4113_v18 = vmul.f32 1.442695, %v4103_v25 }
 0xa5b   : > { %v4088_v14 = vpop.xlane.xlu0 %4087  ;;  %v4091_v50 = vpop.xlane.xlu1 %4090 }
 0xa5c   : > { %v4104_v51 = vsub.f32 %v10588_v52, %v4088_v14  ;;  %v4105_v33 = vsub.f32 %v10592_v12, %v4091_v50  ;;  %3385 = vmax.xlane.f32.xlu0 %v10719_v42  ;;  %8197 = vpow2.f32 %v4113_v18 }
 0xa5e   : > { %v4115_v21 = vmul.f32 1.442695, %v4104_v51  ;;  %v4117_v20 = vmul.f32 1.442695, %v4105_v33 }
 0xa5f   : > { %v4097_v0 = vpop.xlane.xlu1 %4096  ;;  %v4094_v24 = vpop.xlane.xlu0 %4093 }
 0xa60   : > { %8199 = vpow2.f32 %v4115_v21  ;;  %v4107_v13 = vsub.f32 %v10600_v63, %v4097_v0  ;;  %v4106_v25 = vsub.f32 %v10604_v19, %v4094_v24 }
 0xa61   : > { %8201 = vpow2.f32 %v4117_v20 }
 0xa62   : > { %v8194_v27 = vpop.eup %8193  ;;  %v4121_v9 = vmul.f32 1.442695, %v4107_v13  ;;  %v4119_v36 = vmul.f32 1.442695, %v4106_v25 }
 0xa63   : > { %v4100_v4 = vpop.xlane.xlu0 %4099  ;;  %v3362_v52 = vpop.xlane.xlu1 %3361  ;;  %v4125_v50 = vsel %vm12644_vm5, %v8194_v27, 0.0 }
 0xa64   : > { %v8196_v14 = vpop.eup %8195  ;;  %v4108_v12 = vsub.f32 %v10612_v2, %v4100_v4  ;;  %v3393_v18 = vsub.f32 %v10618_v59, %v3362_v52  ;;  %8203 = vpow2.f32 %v4119_v36 }
 0xa65   : > { %v4126_v63 = vsel %vm12647_vm12, %v8196_v14, 0.0  ;;  %8205 = vpow2.f32 %v4121_v9  ;;  %vm12701_vm12 = vmmov %vm12700_vm0 }
 0xa66   : > { %v4123_v19 = vmul.f32 1.442695, %v4108_v12  ;;  %v10732_v51 = vpack.c.bf16 %v4126_v63, %v4125_v50  ;;  %v3409_v33 = vmul.f32 1.442695, %v3393_v18  ;;  %v8198_v0 = vpop.eup %8197  ;;  %v12702_v63 = vld [vmem:[#allocation46_spill] sm:$0xff] }
 0xa67   : > { %v4372_v21 = vpop.permute.xlu1 %4371  ;;  %v3364_v20 = vpop.xlane.xlu0 %3363  ;;  %v4127_v59 = vsel %vm12646_vm3, %v8198_v0, 0.0 }
 0xa68   : > { %8207 = vpow2.f32 %v4123_v19  ;;  %v3394_v4 = vsub.f32 %v10623_v41, %v3364_v20  ;;  %7246 = vmatprep.mubr.msk.bf16.mxu0 %vm12700_vm0, %v10732_v51  ;;  %7294 = vmatprep.subr.bf16.mxu0 %v4372_v21 }
 0xa69   : > { %8209 = vpow2.f32 %v3409_v33 }
 0xa6a   : > { %v8200_v36 = vpop.eup %8199  ;;  %v3411_v2 = vmul.f32 1.442695, %v3394_v4  ;;  %v12709_v4 = vld [vmem:[#allocation96_spill] sm:$0xff] }
 0xa6b   : > { %v4128_v9 = vsel %vm12650_vm10, %v8200_v36, 0.0  ;;  %v10741_v24 = vpop.xlane.xlu0 %3365  ;;  %v8202_v25 = vpop.eup %8201 }
 0xa6c   : > { %v10743_v13 = vpack.c.bf16 %v4128_v9, %v4127_v59  ;;  %8211 = vpow2.f32 %v3411_v2  ;;  %v4129_v14 = vsel %vm12652_vm13, %v8202_v25, 0.0  ;;  %vm12706_vm13 = vmpackc.low %vm12667_vm1, %vm12665_vm6  ;;  %v12711_v2 = vld [vmem:[#allocation94_spill] sm:$0xff]  ;;  %v12713_v9 = vld [vmem:[#allocation49_spill] sm:$0xff] }
 0xa6e   : > { %7247 = vmatmul.mubr.msk.bf16.vlgmr.msra.gmra.mrb[128].mxu0 %vm12701_vm12, %v10743_v13  ;;  %v8204_v41 = vpop.eup %8203  ;;  %vm12705_vm12 = vmmov %vm12700_vm0 }
 0xa6f   : > { %7295 = vmatpush3.bf16.msra.mxu0 %v4372_v21  ;;  %v3368_v27 = vpop.xlane.xlu0 %3367  ;;  %v8206_v52 = vpop.eup %8205  ;;  %v4130_v12 = vsel %vm12658_vm14, %v8204_v41, 0.0  ;;  %vm12710_vm14 = vnez %v12709_v4 }
 0xa70   : > { %v10751_v18 = vpack.c.bf16 %v4130_v12, %v4129_v14  ;;  %v4131_v33 = vsel %vm12656_vm9, %v8206_v52, 0.0  ;;  %vm12708_vm9 = vnez %v12707_v62  ;;  %v10785_v36 = vsel %vm12710_vm14, %v10564_v22, -3.4028235e+38  ;;  %v12902_v62 = vld [vmem:[#allocation112_spill] sm:$0xff] }
 0xa71   : > { %v10779_v43 = vsel %vm12708_vm9, %v10566_v44, -3.4028235e+38 }
 0xa72   : > { %v8208_v50 = vpop.eup %8207  ;;  %4383 = vrot.lane.b32.xlu0 %v12702_v63, %s8328_s30  ;;  %7250 = vmatprep.mubr.msk.bf16.mxu0 %vm12700_vm0, %v10751_v18  ;;  %vm12715_vm0 = vmpackc.low %vm12673_vm2, %vm12670_vm11 }
 0xa73   : > { %v4374_v19 = vpop.permute.xlu0 %4373  ;;  %v4132_v49 = vsel %vm12662_vm15, %v8208_v50, 0.0  ;;  %v10763_v54 = vpop.eup %8209  ;;  %vm12712_vm15 = vnez %v12711_v2 }
 0xa74   : > { %7296 = vmatprep.subr.bf16.mxu0 %v4374_v19  ;;  %v10761_v21 = vpack.c.bf16 %v4132_v49, %v4131_v33  ;;  %12703 = vst [vmem:[#allocation67_spill] sm:$0xff] %v10763_v54  ;;  %v10791_v59 = vsel %vm12712_vm15, %v10560_v45, -3.4028235e+38 }
 0xa75   : > { %7297 = vmatpush3.bf16.msra.mxu0 %v4374_v19 }
 0xa76   : > { %v10765_v20 = vpop.eup %8211  ;;  %7251 = vmatmul.mubr.msk.bf16.gmra.mrb[132].mxu0 %vm12705_vm12, %v10761_v21  ;;  %vm12716_vm12 = vnez %v12678_v8 }
 0xa77   : > { %12704 = vst [vmem:[#allocation68_spill] sm:$0xff] %v10765_v20  ;;  %v6088_v0 = vpack.c.bf16 %v10765_v20, %v10763_v54 }
 0xa79   : > { %7310 = vmatprep.mubr.msk.bf16.mxu0 %vm12706_vm13, %v6088_v0  ;;  %vm12717_vm13 = vmpackc.low %vm12681_vm8, %vm12716_vm12  ;;  %vm12724_vm8 = vnez %v12688_v48 }
 0xa7a   : > { %vm12725_vm11 = vmpackc.low %vm12692_vm4, %vm12724_vm8  ;;  %vm12730_vm8 = vnez %v12698_v32 }
 0xa7b   : > { %vm12731_vm4 = vmpackc.low %vm12708_vm9, %vm12730_vm8 }
 0xa7d   : > { %3387 = vmax.xlane.f32.xlu1 %v10779_v43 }
 0xa81   : > { %3391 = vmax.xlane.f32.xlu1 %v10785_v36 }
 0xa91   : > { %3389 = vmax.xlane.f32.xlu0 %v10791_v59 }
 0xa92   : > { %4385 = vrot.lane.b32.xlu1 %v12713_v9, %s8328_s30  ;;  %v3396_v9 = vsub.f32 %v10642_v16, %v3368_v27 }
 0xa98   : > { %v3370_v44 = vpop.xlane.xlu1 %3369 }
 0xa99   : > { %v3397_v54 = vsub.f32 %v10660_v23, %v3370_v44 }
 0xa9b   : > { %v3417_v30 = vmul.f32 1.442695, %v3397_v54 }
 0xa9c   : > { %v4376_v25 = vpop.permute.xlu1 %4375 }
 0xa9d   : > { %7298 = vmatprep.subr.bf16.mxu0 %v4376_v25 }
 0xa9e   : > { %7299 = vmatpush3.bf16.msra.mxu0 %v4376_v25 }
 0xaa0   : > { %v4378_v41 = vpop.permute.xlu1 %4377 }
 0xaa1   : > { %7300 = vmatprep.subr.bf16.mxu0 %v4378_v41 }
 0xaa2   : > { %7301 = vmatpush3.bf16.msra.mxu0 %v4378_v41  ;;  %v3395_v41 = vsub.f32 %v10632_v46, %v10741_v24 }
 0xaa4   : > { %v3372_v22 = vpop.xlane.xlu0 %3371  ;;  %v3413_v20 = vmul.f32 1.442695, %v3395_v41 }
 0xaa5   : > { %v3398_v25 = vsub.f32 %v10666_v7, %v3372_v22 }
 0xaa7   : > { %v3419_v38 = vmul.f32 1.442695, %v3398_v25 }
 0xaa8   : > { %v3374_v52 = vpop.xlane.xlu0 %3373 }
 0xaa9   : > { %v3399_v16 = vsub.f32 %v10672_v40, %v3374_v52 }
 0xaab   : > { %v3421_v23 = vmul.f32 1.442695, %v3399_v16 }
 0xaac   : > { %v3376_v14 = vpop.xlane.xlu0 %3375 }
 0xab0   : > { %v3378_v12 = vpop.xlane.xlu0 %3377 }
 0xab1   : > { %v3401_v7 = vsub.f32 %v10688_v3, %v3378_v12 }
 0xab3   : > { %v3425_v22 = vmul.f32 1.442695, %v3401_v7 }
 0xab4   : > { %v4380_v50 = vpop.permute.xlu0 %4379 }
 0xab5   : > { %7302 = vmatprep.subr.bf16.mxu0 %v4380_v50 }
 0xab6   : > { %7303 = vmatpush3.bf16.msra.mxu0 %v4380_v50  ;;  %v3415_v50 = vmul.f32 1.442695, %v3396_v9 }
 0xab8   : > { %8213 = vpow2.f32 %v3415_v50 }
 0xab9   : > { %8215 = vpow2.f32 %v3419_v38 }
 0xaba   : > { %8217 = vpow2.f32 %v3413_v20 }
 0xabb   : > { %8219 = vpow2.f32 %v3417_v30 }
 0xac2   : > { %v10807_v38 = vpop.eup %8213 }
 0xac3   : > { %v10810_v30 = vpop.eup %8215 }
 0xac4   : > { %v10813_v3 = vpop.eup %8217 }
 0xad1   : > { %v3380_v45 = vpop.xlane.xlu1 %3379 }
 0xad2   : > { %v3402_v53 = vsub.f32 %v10696_v34, %v3380_v45 }
 0xad4   : > { %v3427_v24 = vmul.f32 1.442695, %v3402_v53 }
 0xad5   : > { %v3384_v63 = vpop.xlane.xlu1 %3383 }
 0xad6   : > { %v3404_v40 = vsub.f32 %v10702_v10, %v3384_v63 }
 0xad8   : > { %v3431_v10 = vmul.f32 1.442695, %v3404_v40 }
 0xad9   : > { %v4382_v19 = vpop.permute.xlu1 %4381 }
 0xada   : > { %7304 = vmatprep.subr.bf16.mxu0 %v4382_v19 }
 0xadb   : > { %7305 = vmatpush3.bf16.msra.mxu0 %v4382_v19  ;;  %v3400_v19 = vsub.f32 %v10680_v11, %v3376_v14 }
 0xadd   : > { %v3423_v46 = vmul.f32 1.442695, %v3400_v19 }
 0xadf   : > { %8221 = vpow2.f32 %v3423_v46  ;;  %v12733_v46 = vld [vmem:[#allocation5_spill] sm:$0xff] }
 0xae0   : > { %8223 = vpow2.f32 %v3427_v24  ;;  %v12735_v24 = vld [vmem:[#allocation38_spill] sm:$0xff] }
 0xae1   : > { %8225 = vpow2.f32 %v3421_v23  ;;  %v12737_v23 = vld [vmem:[#allocation50_spill] sm:$0xff] }
 0xae2   : > { %8227 = vpow2.f32 %v3425_v22 }
 0xae5   : > { %v3382_v33 = vpop.xlane.xlu0 %3381 }
 0xae6   : > { %v3403_v54 = vsub.f32 %v10710_v47, %v3382_v33  ;;  %v10815_v47 = vpop.eup %8219 }
 0xae7   : > { %12714 = vst [vmem:[#allocation70_spill] sm:$0xff] %v10815_v47  ;;  %v6094_v14 = vpack.c.bf16 %v10810_v30, %v10815_v47 }
 0xae8   : > { %v3429_v20 = vmul.f32 1.442695, %v3403_v54 }
 0xae9   : > { %v3386_v49 = vpop.xlane.xlu0 %3385 }
 0xaea   : > { %v3405_v53 = vsub.f32 %v10719_v42, %v3386_v49  ;;  %8229 = vpow2.f32 %v3429_v20  ;;  %v10834_v42 = vpop.eup %8221 }
 0xaeb   : > { %v10837_v63 = vpop.eup %8223 }
 0xaec   : > { %v3433_v12 = vmul.f32 1.442695, %v3405_v53  ;;  %12718 = vst [vmem:[#allocation73_spill] sm:$0xff] %v10837_v63  ;;  %v10839_v33 = vpop.eup %8225 }
 0xaed   : > { %v4384_v0 = vpop.permute.xlu0 %4383  ;;  %12719 = vst [vmem:[#allocation37_spill] sm:$0xff] %v10839_v33  ;;  %v10842_v49 = vpop.eup %8227 }
 0xaee   : > { %7306 = vmatprep.subr.bf16.mxu0 %v4384_v0  ;;  %12720 = vst [vmem:[#allocation39_spill] sm:$0xff] %v10842_v49  ;;  %v6100_v25 = vpack.c.bf16 %v10837_v63, %v10842_v49 }
 0xaef   : > { %7307 = vmatpush3.bf16.msra.mxu0 %v4384_v0 }
 0xaf4   : > { %v10862_v41 = vpop.eup %8229 }
 0xaf5   : > { %12726 = vst [vmem:[#allocation75_spill] sm:$0xff] %v10862_v41 }
 0xb0a   : > { %v3388_v27 = vpop.xlane.xlu1 %3387 }
 0xb0b   : > { %v3406_v11 = vsub.f32 %v10779_v43, %v3388_v27  ;;  %v6091_v43 = vpack.c.bf16 %v10807_v38, %v10813_v3 }
 0xb0d   : > { %v3435_v52 = vmul.f32 1.442695, %v3406_v11 }
 0xb0e   : > { %v3392_v44 = vpop.xlane.xlu1 %3391 }
 0xb0f   : > { %8231 = vpow2.f32 %v3435_v52  ;;  %v3408_v45 = vsub.f32 %v10785_v36, %v3392_v44  ;;  %v12739_v44 = vld [vmem:[#allocation51_spill] sm:$0xff] }
 0xb10   : > { %8233 = vpow2.f32 %v3431_v10 }
 0xb11   : > { %8235 = vpow2.f32 %v3433_v12  ;;  %v3439_v0 = vmul.f32 1.442695, %v3408_v45  ;;  %v12741_v45 = vld [vmem:[#allocation33_spill] sm:$0xff] }
 0xb12   : > { %v4386_v34 = vpop.permute.xlu1 %4385 }
 0xb13   : > { %7308 = vmatprep.subr.bf16.mxu0 %v4386_v34  ;;  %8237 = vpow2.f32 %v3439_v0  ;;  %v12745_v0 = vld [vmem:[#allocation48_spill] sm:$0xff] }
 0xb14   : > { %7309 = vmatpush3.bf16.msra.mxu0 %v4386_v34 }
 0xb15   : > { %7847 = vmatprep.subr.bf16.mxu0 %v10431_v39 }
 0xb17   : > { %7311 = vmatmul.mubr.msk.bf16.vlgmr.msra.gmra.mrb[136].mxu0 %vm12715_vm0, %v6091_v43  ;;  %vm12721_vm0 = vnez %v12685_v17 }
 0xb18   : > { %7314 = vmatprep.mubr.msk.bf16.mxu0 %vm12717_vm13, %v6094_v14  ;;  %7849 = vmatpush3.bf16.msra.mxu0 %v10431_v39  ;;  %v6097_v39 = vpack.c.bf16 %v10834_v42, %v10839_v33  ;;  %vm12722_vm13 = vnez %v12682_v31 }
 0xb19   : > { %7851 = vmatprep.subr.bf16.mxu0 %v10437_v57  ;;  %vm12723_vm12 = vmpackc.low %vm12721_vm0, %vm12722_vm13 }
 0xb1a   : > { %vm12732_vm13 = vmpackc.low %vm12710_vm14, %vm12712_vm15 }
 0xb1c   : > { %7853 = vmatpush3.bf16.msra.mxu0 %v10437_v57 }
 0xb1d   : > { %7855 = vmatprep.subr.bf16.mxu0 %v10445_v28 }
 0xb1e   : > { %v3390_v9 = vpop.xlane.xlu0 %3389 }
 0xb1f   : > { %v3407_v36 = vsub.f32 %v10791_v59, %v3390_v9  ;;  %7315 = vmatmul.mubr.msk.bf16.gmra.mrb[140].mxu0 %vm12723_vm12, %v6097_v39  ;;  %v10864_v59 = vpop.eup %8231  ;;  %v12743_v39 = vld [vmem:[#allocation47_spill] sm:$0xff]  ;;  %v12747_v9 = vld [vmem:[#allocation53_spill] sm:$0xff] }
 0xb20   : > { %7318 = vmatprep.mubr.msk.bf16.mxu0 %vm12725_vm11, %v6100_v25  ;;  %7857 = vmatpush3.bf16.msra.mxu0 %v10445_v28  ;;  %v10866_v50 = vpop.eup %8233  ;;  %vm12728_vm11 = vnez %v12693_v6  ;;  %v12749_v25 = vld [vmem:[#allocation52_spill] sm:$0xff] }
 0xb21   : > { %v3437_v57 = vmul.f32 1.442695, %v3407_v36  ;;  %7859 = vmatprep.subr.bf16.mxu0 %v10449_v55  ;;  %12727 = vst [vmem:[#allocation79_spill] sm:$0xff] %v10866_v50  ;;  %v10869_v19 = vpop.eup %8235  ;;  %v6103_v16 = vpack.c.bf16 %v10866_v50, %v10862_v41  ;;  %vm12729_vm12 = vmpackc.low %vm12728_vm11, %vm12696_vm7  ;;  %v12751_v36 = vld [vmem:[#allocation56_spill] sm:$0xff] }
 0xb22   : > { %v6106_v28 = vpack.c.bf16 %v10864_v59, %v10869_v19 }
 0xb23   : > { %8239 = vpow2.f32 %v3437_v57  ;;  %v12753_v57 = vld [vmem:[#allocation57_spill] sm:$0xff] }
 0xb24   : > { %7861 = vmatpush3.bf16.msra.mxu0 %v10449_v55  ;;  %v10885_v55 = vpop.eup %8237 }
 0xb27   : > { %7319 = vmatmul.mubr.msk.bf16.gmra.mrb[144].mxu0 %vm12729_vm12, %v6103_v16  ;;  %vm12734_vm12 = vcmask 523264   ;;  %v12755_v16 = vld [vmem:[#allocation72_spill] sm:$0xff] }
 0xb28   : > { %7322 = vmatprep.mubr.msk.bf16.mxu0 %vm12731_vm4, %v6106_v28  ;;  %vm12736_vm7 = vmmov %vm12734_vm12  ;;  %v12757_v28 = vld [vmem:[#allocation76_spill] sm:$0xff] }
 0xb29   : > { %vm12738_vm4 = vmmov %vm12736_vm7 }
 0xb2a   : > { %vm12740_vm11 = vmmov %vm12738_vm4 }
 0xb2d   : > { %v10887_v27 = vpop.eup %8239 }
 0xb2e   : > { %v6109_v7 = vpack.c.bf16 %v10885_v55, %v10887_v27 }
 0xb30   : > { %7323 = vmatmul.mubr.msk.bf16.gmra.mrb[148].mxu0 %vm12732_vm13, %v6109_v7  ;;  %vm12744_vm13 = vmmov %vm12738_vm4  ;;  %v12761_v7 = vld [vmem:[#allocation80_spill] sm:$0xff] }
 0xb31   : > { %7383 = vmatprep.mubr.msk.f32.mxu0 %vm12734_vm12, %v12733_v46  ;;  %vm12748_vm12 = vmmov %vm12738_vm4 }
 0xb38   : > { %7384 = vmatmul.mubr.msk.f32.vlgmr.msra.gmra.mrb[126].mxu0 %vm12736_vm7, %v12735_v24  ;;  %vm12742_vm7 = vmmov %vm12738_vm4 }
 0xb39   : > { %7386 = vmatprep.mubr.msk.f32.mxu0 %vm12738_vm4, %v12737_v23  ;;  %vm12752_vm0 = vmmov %vm12742_vm7 }
 0xb3c   : > { %7387 = vmatmul.mubr.msk.f32.gmra.mrb[152].mxu0 %vm12740_vm11, %v12739_v44  ;;  %vm12746_vm11 = vmmov %vm12738_vm4  ;;  %vm12750_vm4 = vnez %v12749_v25 }
 0xb41   : > { %v7248_v22 = vpop.f32.mrb[128].mxu0 }
 0xb42   : > { %v4187_v54 = vpop.f32.mrb[129].mxu0 }
 0xb43   : > { %v7249_v11 = vpop.f32.mrb[130].mxu0 }
 0xb44   : > { %v7802_v40 = vpack.c.bf16 %v7249_v11, %v7248_v22  ;;  %v4190_v34 = vpop.f32.mrb[131].mxu0  ;;  %v12762_v22 = vld [vmem:[#allocation81_spill] sm:$0xff]  ;;  %v12768_v11 = vld [vmem:[#allocation90_spill] sm:$0xff] }
 0xb45   : > { %v7798_v53 = vpack.c.bf16 %v4190_v34, %v4187_v54  ;;  %v12764_v54 = vld [vmem:[#allocation86_spill] sm:$0xff]  ;;  %v12775_v34 = vld [vmem:[#allocation9_spill] sm:$0xff] }
 0xb47   : > { %7799 = vmatprep.subr.bf16.mxu1 %v7798_v53 }
 0xb48   : > { %7801 = vmatpush3.bf16.msra.mxu1 %v7798_v53  ;;  %v12776_v53 = vld [vmem:[#allocation15_spill] sm:$0xff] }
 0xb49   : > { %v7252_v20 = vpop.f32.mrb[132].mxu0  ;;  %7803 = vmatprep.subr.bf16.mxu1 %v7802_v40 }
 0xb4a   : > { %v4203_v43 = vpop.f32.mrb[133].mxu0 }
 0xb4b   : > { %v7253_v52 = vpop.f32.mrb[134].mxu0 }
 0xb4c   : > { %v7810_v10 = vpack.c.bf16 %v7253_v52, %v7252_v20  ;;  %v4206_v14 = vpop.f32.mrb[135].mxu0  ;;  %7805 = vmatpush3.bf16.msra.mxu1 %v7802_v40  ;;  %v12770_v40 = vld [vmem:[#allocation113_spill] sm:$0xff]  ;;  %v12777_v20 = vld [vmem:[#allocation14_spill] sm:$0xff] }
 0xb4d   : > { %v7806_v12 = vpack.c.bf16 %v4206_v14, %v4203_v43  ;;  %v12784_v43 = vld [vmem:[#allocation65_spill] sm:$0xff] }
 0xb4e   : > { %v12786_v52 = vld [vmem:[#allocation61_spill] sm:$0xff] }
 0xb4f   : > { %7807 = vmatprep.subr.bf16.mxu1 %v7806_v12 }
 0xb50   : > { %7809 = vmatpush3.bf16.msra.mxu1 %v7806_v12 }
 0xb51   : > { %7811 = vmatprep.subr.bf16.mxu1 %v7810_v10 }
 0xb54   : > { %7813 = vmatpush3.bf16.msra.mxu1 %v7810_v10 }
 0xb55   : > { %7814 = vmatprep.subr.bf16.mxu1 %v12361_v35 }
 0xb57   : > { %7271 = vmatmul.mubr.msk.f32.vlgmr.msra.gmra.mrb[74].mxu1 %vm12742_vm7, %v12741_v45  ;;  %vm12754_vm7 = vmmov %vm12752_vm0 }
 0xb58   : > { %7273 = vmatprep.mubr.msk.f32.mxu1 %vm12744_vm13, %v12743_v39  ;;  %vm12756_vm13 = vmmov %vm12752_vm0 }
 0xb5b   : > { %7274 = vmatmul.mubr.msk.f32.gmra.mrb[84].mxu1 %vm12746_vm11, %v12745_v0  ;;  %vm12758_vm11 = vmmov %vm12752_vm0 }
 0xb5c   : > { %7276 = vmatprep.mubr.msk.f32.mxu1 %vm12748_vm12, %v12747_v9  ;;  %vm12760_vm12 = vmmov %vm12752_vm0 }
 0xb5d   : > { %7817 = vmatpush3.bf16.xpose.msk.msra.mxu1 %vm12750_vm4, %v10732_v51  ;;  %v12759_v51 = vld [vmem:[#allocation74_spill] sm:$0xff] }
 0xb5e   : > { %7818 = vmatprep.subr.bf16.mxu1 %v12361_v35 }
 0xb5f   : > { %7277 = vmatmul.mubr.msk.f32.gmra.mrb[86].mxu1 %vm12752_vm0, %v12751_v36 }
 0xb60   : > { %7279 = vmatprep.mubr.msk.f32.mxu1 %vm12754_vm7, %v12753_v57  ;;  %vm12763_vm7 = vmmov %vm12752_vm0 }
 0xb63   : > { %7280 = vmatmul.mubr.msk.f32.gmra.mrb[88].mxu1 %vm12756_vm13, %v12755_v16  ;;  %vm12765_vm13 = vmmov %vm12752_vm0 }
 0xb64   : > { %7282 = vmatprep.mubr.msk.f32.mxu1 %vm12758_vm11, %v12757_v28  ;;  %vm12767_vm11 = vmmov %vm12752_vm0 }
 0xb65   : > { %7821 = vmatpush3.bf16.xpose.msk.msra.mxu1 %vm12750_vm4, %v10743_v13  ;;  %v12766_v13 = vld [vmem:[#allocation85_spill] sm:$0xff] }
 0xb66   : > { %7822 = vmatprep.subr.bf16.mxu1 %v12361_v35 }
 0xb67   : > { %7283 = vmatmul.mubr.msk.f32.gmra.mrb[90].mxu1 %vm12760_vm12, %v12759_v51  ;;  %vm12769_vm12 = vmmov %vm12752_vm0 }
 0xb68   : > { %7285 = vmatprep.mubr.msk.f32.mxu1 %vm12752_vm0, %v12761_v7 }
 0xb6b   : > { %7286 = vmatmul.mubr.msk.f32.gmra.mrb[92].mxu1 %vm12763_vm7, %v12762_v22  ;;  %vm12771_vm7 = vmmov 0  }
 0xb6c   : > { %7288 = vmatprep.mubr.msk.f32.mxu1 %vm12765_vm13, %v12764_v54  ;;  %vm12773_vm13 = vmmov %vm12752_vm0 }
 0xb6d   : > { %7825 = vmatpush3.bf16.xpose.msk.msra.mxu1 %vm12750_vm4, %v10751_v18  ;;  %v12772_v18 = vmov 1.0  }
 0xb6e   : > { %7826 = vmatprep.subr.bf16.mxu1 %v12361_v35 }
 0xb6f   : > { %7289 = vmatmul.mubr.msk.f32.gmra.mrb[94].mxu1 %vm12767_vm11, %v12766_v13  ;;  %vm12774_vm11 = vmmov %vm12752_vm0 }
 0xb70   : > { %7291 = vmatprep.mubr.msk.f32.mxu1 %vm12769_vm12, %v12768_v11  ;;  %vm12780_vm12 = vmmov %vm12752_vm0 }
 0xb73   : > { %7292 = vmatmul.mubr.msk.f32.gmra.mrb[96].mxu1 %vm12752_vm0, %v12770_v40 }
 0xb74   : > { %7342 = vmatprep.mubr.msk.f32.mxu1 %vm12771_vm7, %v12326_v58 }
 0xb75   : > { %7829 = vmatpush3.bf16.xpose.msk.msra.mxu1 %vm12750_vm4, %v10761_v21  ;;  %v12778_v21 = vld [vmem:[#allocation77_spill] sm:$0xff]  ;;  %vm12779_vm4 = vmmov %vm12752_vm0 }
 0xb76   : > { %7831 = vmatprep.subr.bf16.mxu1 %v10413_v5 }
 0xb7c   : > { %7343 = vmatmul.mubr.msk.f32.vlgmr.msra.gmra.mrb[98].mxu1 %vm12773_vm13, %v12772_v18  ;;  %vm12783_vm13 = vmmov %vm12752_vm0 }
 0xb7d   : > { %7833 = vmatpush3.bf16.msra.mxu1 %v10413_v5  ;;  %7361 = vmatprep.mubr.msk.f32.mxu1 %vm12774_vm11, %v12733_v46  ;;  %v12781_v5 = vld [vmem:[#allocation82_spill] sm:$0xff]  ;;  %v12782_v46 = vld [vmem:[#allocation60_spill] sm:$0xff]  ;;  %vm12787_vm11 = vmmov %vm12752_vm0 }
 0xb7e   : > { %7835 = vmatprep.subr.bf16.mxu1 %v12775_v34 }
 0xb81   : > { %7837 = vmatpush3.bf16.msra.mxu1 %v12775_v34 }
 0xb82   : > { %7839 = vmatprep.subr.bf16.mxu1 %v12776_v53 }
 0xb85   : > { %7841 = vmatpush3.bf16.msra.mxu1 %v12776_v53 }
 0xb86   : > { %7843 = vmatprep.subr.bf16.mxu1 %v12777_v20 }
 0xb89   : > { %7845 = vmatpush3.bf16.msra.mxu1 %v12777_v20 }
 0xb8a   : > { %7863 = vmatprep.subr.bf16.mxu1 %v12778_v21 }
 0xb8c   : > { %7362 = vmatmul.mubr.msk.f32.vlgmr.msra.gmra.mrb[100].mxu1 %vm12779_vm4, %v12735_v24  ;;  %v12785_v24 = vld [vmem:[#allocation66_spill] sm:$0xff]  ;;  %vm12789_vm4 = vmmov %vm12752_vm0 }
 0xb8d   : > { %7865 = vmatpush3.bf16.msra.mxu1 %v12778_v21  ;;  %7364 = vmatprep.mubr.msk.f32.mxu1 %vm12780_vm12, %v12737_v23  ;;  %v12788_v23 = vld [vmem:[#allocation62_spill] sm:$0xff]  ;;  %vm12791_vm12 = vmmov %vm12752_vm0 }
 0xb8e   : > { %7867 = vmatprep.subr.bf16.mxu1 %v12781_v5 }
 0xb90   : > { %7365 = vmatmul.mubr.msk.f32.gmra.mrb[102].mxu1 %vm12752_vm0, %v12739_v44  ;;  %v12790_v44 = vld [vmem:[#allocation63_spill] sm:$0xff]  ;;  %vm12792_vm0 = vcmask 261120  }
 0xb91   : > { %7869 = vmatpush3.bf16.msra.mxu1 %v12781_v5  ;;  %7405 = vmatprep.mubr.msk.f32.mxu1 %vm12783_vm13, %v12782_v46  ;;  %vm12793_vm13 = vmmov %vm12792_vm0 }
 0xb92   : > { %7871 = vmatprep.subr.bf16.mxu1 %v12784_v43 }
 0xb95   : > { %7873 = vmatpush3.bf16.msra.mxu1 %v12784_v43 }
 0xb96   : > { %7875 = vmatprep.subr.bf16.mxu1 %v12785_v24 }
 0xb99   : > { %7877 = vmatpush3.bf16.msra.mxu1 %v12785_v24 }
 0xb9c   : > { %7406 = vmatmul.mubr.msk.f32.vlgmr.msra.gmra.mrb[104].mxu1 %vm12787_vm11, %v12786_v52  ;;  %vm12794_vm11 = vmmov %vm12792_vm0 }
 0xb9d   : > { %7408 = vmatprep.mubr.msk.f32.mxu1 %vm12789_vm4, %v12788_v23  ;;  %vm12795_vm4 = vmmov %vm12792_vm0 }
 0xba0   : > { %7409 = vmatmul.mubr.msk.f32.gmra.mrb[106].mxu1 %vm12791_vm12, %v12790_v44  ;;  %vm12805_vm12 = vmmov %vm12792_vm0 }
 0xbea   : > { %v7312_v10 = vpop.f32.mrb[136].mxu0 }
 0xbeb   : > { %v4429_v14 = vpop.f32.mrb[137].mxu0 }
 0xbec   : > { %v7313_v12 = vpop.f32.mrb[138].mxu0 }
 0xbed   : > { %v4432_v25 = vpop.f32.mrb[139].mxu0 }
 0xbf2   : > { %v7316_v34 = vpop.f32.mrb[140].mxu0 }
 0xbf3   : > { %v4445_v53 = vpop.f32.mrb[141].mxu0 }
 0xbf4   : > { %v7317_v20 = vpop.f32.mrb[142].mxu0 }
 0xbf5   : > { %v4448_v21 = vpop.f32.mrb[143].mxu0 }
 0xbfa   : > { %v7320_v5 = vpop.f32.mrb[144].mxu0 }
 0xbfb   : > { %v4461_v46 = vpop.f32.mrb[145].mxu0 }
 0xbfc   : > { %v7321_v43 = vpop.f32.mrb[146].mxu0 }
 0xbfd   : > { %v4464_v24 = vpop.f32.mrb[147].mxu0 }
 0xc03   : > { %v7324_v18 = vpop.f32.mrb[148].mxu0 }
 0xc04   : > { %v4477_v52 = vpop.f32.mrb[149].mxu0 }
 0xc05   : > { %v7325_v58 = vpop.f32.mrb[150].mxu0 }
 0xc06   : > { %v4480_v41 = vpop.f32.mrb[151].mxu0 }
 0xc0b   : > { %v7385_v23 = vpop.f32.mrb[126].mxu0 }
 0xc0c   : > { %v4821_v49 = vpop.f32.mrb[127].mxu0 }
 0xc0d   : > { %v4927_v7 = vpack.c.bf16 %v7385_v23, %v4821_v49 }
 0xc0f   : > { %v4936_v44 = vsel %vm12792_vm0, %v4927_v7, 0  ;;  %7940 = vmatprep.subr.msk.bf16.mxu0 %vm12793_vm13, %v4927_v7  ;;  %v7388_v56 = vpop.f32.mrb[152].mxu0  ;;  %vm12807_vm13 = vmmov %vm12792_vm0 }
 0xc10   : > { %7412 = vmatpush3.bf16.xpose.msra.mxu0 %v4936_v44  ;;  %v4831_v50 = vpop.f32.mrb[153].mxu0 }
 0xc11   : > { %v4928_v28 = vpack.c.bf16 %v7388_v56, %v4831_v50 }
 0xc13   : > { %7941 = vmatprep.subr.msk.bf16.mxu0 %vm12794_vm11, %v4928_v28  ;;  %v4939_v48 = vsel %vm12795_vm4, %v4928_v28, 0  ;;  %vm12809_vm11 = vmmov %vm12792_vm0  ;;  %vm12810_vm4 = vnez %v12163_v29 }
 0xc18   : > { %7414 = vmatpush3.bf16.xpose.msra.mxu0 %v4939_v48 }
 0xc2a   : > { %v7272_v63 = vpop.f32.mrb[74].mxu1 }
 0xc2b   : > { %v10990_v33 = vadd.f32 %v7272_v63, %v4432_v25  ;;  %v4284_v47 = vpop.f32.mrb[75].mxu1 }
 0xc2c   : > { %v10992_v22 = vadd.f32 %v4429_v14, %v4284_v47 }
 0xc2e   : > { %v7275_v49 = vpop.f32.mrb[84].mxu1 }
 0xc2f   : > { %v10994_v23 = vadd.f32 %v7313_v12, %v7275_v49  ;;  %v4294_v6 = vpop.f32.mrb[85].mxu1 }
 0xc30   : > { %v10996_v7 = vadd.f32 %v7312_v10, %v4294_v6 }
 0xc32   : > { %v7278_v44 = vpop.f32.mrb[86].mxu1 }
 0xc33   : > { %v10998_v51 = vadd.f32 %v7278_v44, %v4448_v21  ;;  %v4304_v56 = vpop.f32.mrb[87].mxu1 }
 0xc34   : > { %v11000_v50 = vadd.f32 %v4445_v53, %v4304_v56 }
 0xc36   : > { %v7281_v28 = vpop.f32.mrb[88].mxu1 }
 0xc37   : > { %v11002_v48 = vadd.f32 %v7317_v20, %v7281_v28  ;;  %v4314_v63 = vpop.f32.mrb[89].mxu1 }
 0xc38   : > { %v11004_v25 = vadd.f32 %v7316_v34, %v4314_v63 }
 0xc3a   : > { %12796 = vst [vmem:[#allocation78_spill] sm:$0xff] %v11004_v25  ;;  %v7284_v47 = vpop.f32.mrb[90].mxu1 }
 0xc3b   : > { %v11006_v14 = vadd.f32 %v7284_v47, %v4464_v24  ;;  %v4324_v12 = vpop.f32.mrb[91].mxu1 }
 0xc3c   : > { %v11008_v49 = vadd.f32 %v4461_v46, %v4324_v12 }
 0xc3d   : > { %12797 = vst [vmem:[#allocation42_spill] sm:$0xff] %v11006_v14 }
 0xc3e   : > { %12798 = vst [vmem:[#allocation83_spill] sm:$0xff] %v11008_v49  ;;  %v7287_v6 = vpop.f32.mrb[92].mxu1 }
 0xc3f   : > { %v11010_v10 = vadd.f32 %v7321_v43, %v7287_v6  ;;  %v4334_v21 = vpop.f32.mrb[93].mxu1 }
 0xc40   : > { %v11012_v44 = vadd.f32 %v7320_v5, %v4334_v21 }
 0xc41   : > { %12799 = vst [vmem:[#allocation43_spill] sm:$0xff] %v11010_v10 }
 0xc42   : > { %12800 = vst [vmem:[#allocation44_spill] sm:$0xff] %v11012_v44  ;;  %v7290_v53 = vpop.f32.mrb[94].mxu1 }
 0xc43   : > { %v11014_v56 = vadd.f32 %v7290_v53, %v4480_v41  ;;  %v4344_v20 = vpop.f32.mrb[95].mxu1 }
 0xc44   : > { %v11016_v28 = vadd.f32 %v4477_v52, %v4344_v20  ;;  %v12806_v52 = vld [vmem:[#allocation7_spill] sm:$0xff] }
 0xc45   : > { %12801 = vst [vmem:[#allocation89_spill] sm:$0xff] %v11014_v56  ;;  %v12826_v56 = vld [vmem:[#allocation21_spill] sm:$0xff] }
 0xc46   : > { %12802 = vst [vmem:[#allocation45_spill] sm:$0xff] %v11016_v28  ;;  %v7293_v34 = vpop.f32.mrb[96].mxu1 }
 0xc47   : > { %v11018_v63 = vadd.f32 %v7325_v58, %v7293_v34  ;;  %v4354_v24 = vpop.f32.mrb[97].mxu1  ;;  %v12808_v58 = vld [vmem:[#allocation4_spill] sm:$0xff] }
 0xc48   : > { %v11020_v47 = vadd.f32 %v7324_v18, %v4354_v24  ;;  %v11027_v21 = vsub.s32 0, %v12808_v58 }
 0xc49   : > { %12803 = vst [vmem:[#allocation93_spill] sm:$0xff] %v11018_v63 }
 0xc4a   : > { %12804 = vst [vmem:[#allocation46_spill] sm:$0xff] %v11020_v47  ;;  %v12832_v47 = vld [vmem:[#allocation3_spill] sm:$0xff] }
 0xc4f   : > { %v4582_v46 = vpop.f32.mrb[98].mxu1 }
 0xc50   : > { %v7344_v12 = vpop.f32.mrb[99].mxu1  ;;  %v11030_v53 = vrot.slane %v4582_v46, %v11027_v21 }
 0xc5f   : > { %v7363_v49 = vpop.f32.mrb[100].mxu1 }
 0xc60   : > { %v4736_v43 = vpop.f32.mrb[101].mxu1 }
 0xc61   : > { %v4925_v6 = vpack.c.bf16 %v7363_v49, %v4736_v43 }
 0xc63   : > { %v7366_v10 = vpop.f32.mrb[102].mxu1  ;;  %7415 = vmatprep.mubr.msk.bf16.mxu0 %vm12805_vm12, %v4925_v6  ;;  %vm12811_vm12 = vmmov %vm12792_vm0  ;;  %v4605_v6 = vmul.f32 %v12770_v40, %v11030_v53 }
 0xc64   : > { %v4746_v5 = vpop.f32.mrb[103].mxu1 }
 0xc65   : > { %v4926_v41 = vpack.c.bf16 %v7366_v10, %v4746_v5 }
 0xc67   : > { %7416 = vmatmul.mubr.msk.bf16.vlgmr.msra.gmra.mrb[156].mxu0 %vm12792_vm0, %v4926_v41 }
 0xc68   : > { %7435 = vmatprep.mubr.msk.f32.mxu0 %vm12807_vm13, %v12806_v52  ;;  %vm12814_vm13 = vcmask 523264  }
 0xd3a   : > { %v7417_v18 = vpop.f32.mrb[156].mxu0 }
 0xd3b   : > { %v4975_v20 = vpop.f32.mrb[157].mxu0  ;;  %v11040_v12 = vsel %vm12646_vm3, %v7417_v18, -3.4028235e+38  ;;  %v12813_v18 = vld [vmem:[#allocation87_spill] sm:$0xff] }
 0xd3c   : > { %v11034_v49 = vsel %vm12644_vm5, %v4975_v20, -3.4028235e+38  ;;  %v7418_v34 = vpop.f32.mrb[158].mxu0  ;;  %v5000_v5 = vsel %vm12792_vm0, %v11040_v12, -inf  ;;  %v11058_v20 = vrot.slane %v12813_v18, %v11027_v21  ;;  %v3454_v18 = vsel %vm12708_vm9, %v10864_v59, 0.0 }
 0xd3d   : > { %v4994_v10 = vsel %vm12809_vm11, %v11034_v49, -inf  ;;  %v4978_v24 = vpop.f32.mrb[159].mxu0  ;;  %v11054_v58 = vsel %vm12650_vm10, %v7418_v34, -3.4028235e+38  ;;  %vm12815_vm11 = vmmov %vm12792_vm0  ;;  %v4603_v59 = vmul.f32 %v12766_v13, %v11030_v53 }
 0xd3e   : > { %v11044_v43 = vsel %vm12810_vm4, %v4978_v24, -3.4028235e+38  ;;  %4995 = vmax.xlane.f32.xlu0 %v4994_v10  ;;  %v4651_v10 = vsel %vm12814_vm13, %v4605_v6, 0.0  ;;  %v5003_v24 = vsel %vm12815_vm11, %v11054_v58, -inf  ;;  %v2217_v34 = vmul.f32 %v12741_v45, %v11058_v20 }
 0xd3f   : > { %v4997_v46 = vsel %vm12811_vm12, %v11044_v43, -inf  ;;  %vm12818_vm12 = vmmov %vm12814_vm13 }
 0xd40   : > { %4998 = vmax.xlane.f32.xlu1 %v4997_v46  ;;  %v12816_v46 = vld [vmem:[#allocation98_spill] sm:$0xff]  ;;  %v2235_v6 = vsel %vm12818_vm12, %v2217_v34, 0.0  ;;  %v2219_v34 = vmul.f32 %v12745_v0, %v11058_v20  ;;  %vm12821_vm0 = vmmov %vm12818_vm12  ;;  %vm12825_vm12 = vcmask 261120  }
 0xd41   : > { %v1137_v63 = vsel %vm12667_vm1, %v12816_v46, 0.0  ;;  %vm12822_vm13 = vmmov %vm12821_vm0 }
 0xd42   : > { %5001 = vmax.xlane.f32.xlu0 %v5000_v5  ;;  %v3453_v5 = vsel %vm12730_vm8, %v10869_v19, 0.0  ;;  %vm12824_vm11 = vmmov %vm12821_vm0 }
 0xd43   : > { %v4645_v28 = vsel %vm12824_vm11, %v4603_v59, 0.0  ;;  %v4604_v59 = vmul.f32 %v12768_v11, %v11030_v53 }
 0xd44   : > { %4652 = vadd.xlane.f32.xlu1 %v4651_v10  ;;  %v4602_v10 = vmul.f32 %v12764_v54, %v11030_v53 }
 0xd46   : > { %5004 = vmax.xlane.f32.xlu0 %v5003_v24  ;;  %v12819_v24 = vld [vmem:[#allocation11_spill] sm:$0xff] }
 0xd47   : > { %v11079_v46 = vrot.slane %v12819_v24, %v11027_v21 }
 0xd48   : > { %1170 = vadd.xlane.f32.xlu1 %v1137_v63  ;;  %v12820_v63 = vld [vmem:[#allocation100_spill] sm:$0xff] }
 0xd49   : > { %v1139_v19 = vsel %vm12673_vm2, %v12820_v63, 0.0 }
 0xd4a   : > { %3489 = vadd.xlane.f32.xlu0 %v3453_v5  ;;  %v4642_v5 = vsel %vm12821_vm0, %v4602_v10, 0.0  ;;  %v7407_v10 = vpop.f32.mrb[104].mxu1  ;;  %vm12827_vm0 = vmmov %vm12825_vm12 }
 0xd4b   : > { %v4906_v44 = vpop.f32.mrb[105].mxu1 }
 0xd4c   : > { %2236 = vadd.xlane.f32.xlu1 %v2235_v6  ;;  %v2241_v6 = vsel %vm12822_vm13, %v2219_v34, 0.0  ;;  %v5024_v34 = vpack.c.bf16 %v7407_v10, %v4906_v44  ;;  %vm12829_vm13 = vmmov %vm12824_vm11  ;;  %v12830_v10 = vld [vmem:[#allocation97_spill] sm:$0xff] }
 0xd4e   : > { %3491 = vadd.xlane.f32.xlu0 %v3454_v18  ;;  %v12823_v18 = vld [vmem:[#allocation13_spill] sm:$0xff]  ;;  %7419 = vmatprep.subr.bf16.mxu1 %v5024_v34 }
 0xd4f   : > { %v3029_v24 = vmul.f32 %v12823_v18, %v11079_v46  ;;  %7420 = vmatpush3.bf16.msra.mxu1 %v5024_v34  ;;  %v1136_v34 = vsel %vm12665_vm6, %v12830_v10, 0.0 }
 0xd50   : > { %1174 = vadd.xlane.f32.xlu1 %v1139_v19  ;;  %v3031_v19 = vmul.f32 %v12826_v56, %v11079_v46 }
 0xd51   : > { %v3047_v63 = vsel %vm12825_vm12, %v3029_v24, 0.0 }
 0xd52   : > { %4643 = vadd.xlane.f32.xlu0 %v4642_v5  ;;  %v3455_v5 = vsel %vm12712_vm15, %v10887_v27, 0.0  ;;  %v3053_v14 = vsel %vm12827_vm0, %v3031_v19, 0.0  ;;  %v12828_v27 = vld [vmem:[#allocation68_spill] sm:$0xff]  ;;  %v4648_v19 = vsel %vm12829_vm13, %v4604_v59, 0.0  ;;  %vm12836_vm0 = vnez %v12669_v60  ;;  %v12855_v60 = vld [vmem:[#allocation101_spill] sm:$0xff] }
 0xd53   : > { %v3442_v44 = vsel %vm12667_vm1, %v12828_v27, 0.0  ;;  %vm12833_vm1 = vmmov %vm12824_vm11 }
 0xd54   : > { %2242 = vadd.xlane.f32.xlu1 %v2241_v6  ;;  %v7410_v6 = vpop.f32.mrb[106].mxu1  ;;  %vm12834_vm12 = vmmov %vm12833_vm1 }
 0xd55   : > { %v4916_v24 = vpop.f32.mrb[107].mxu1  ;;  %vm12839_vm13 = vmmov %vm12833_vm1 }
 0xd56   : > { %4646 = vadd.xlane.f32.xlu0 %v4645_v28  ;;  %v3456_v28 = vsel %vm12710_vm14, %v10885_v55, 0.0 }
 0xd58   : > { %3048 = vadd.xlane.f32.xlu1 %v3047_v63  ;;  %v5025_v63 = vpack.c.bf16 %v7410_v6, %v4916_v24  ;;  %v2216_v6 = vmul.f32 %v12832_v47, %v11058_v20 }
 0xd5a   : > { %3493 = vadd.xlane.f32.xlu0 %v3455_v5  ;;  %7421 = vmatprep.subr.bf16.mxu1 %v5025_v63  ;;  %v2232_v59 = vsel %vm12833_vm1, %v2216_v6, 0.0  ;;  %v3443_v5 = vsel %vm12836_vm0, %v10813_v3, 0.0 }
 0xd5b   : > { %7422 = vmatpush3.bf16.msra.mxu1 %v5025_v63  ;;  %v12835_v63 = vld [vmem:[#allocation99_spill] sm:$0xff] }
 0xd5c   : > { %3054 = vadd.xlane.f32.xlu1 %v3053_v14  ;;  %v4591_v14 = vmul.f32 %v12741_v45, %v11030_v53  ;;  %7886 = vmatprep.subr.bf16.mxu1 %v12361_v35  ;;  %v3444_v45 = vsel %vm12673_vm2, %v10807_v38, 0.0  ;;  %v1138_v27 = vsel %vm12836_vm0, %v12835_v63, 0.0  ;;  %vm12838_vm2 = vnez %v12680_v1 }
 0xd5d   : > { %v1141_v38 = vsel %vm12838_vm2, %v12837_v61, 0.0  ;;  %v12848_v61 = vld [vmem:[#allocation67_spill] sm:$0xff]  ;;  %vm12856_vm0 = vnez %v12678_v8 }
 0xd5e   : > { %3495 = vadd.xlane.f32.xlu0 %v3456_v28  ;;  %v4609_v55 = vsel %vm12824_vm11, %v4591_v14, 0.0  ;;  %v4593_v28 = vmul.f32 %v12745_v0, %v11030_v53  ;;  %v2221_v0 = vmul.f32 %v12751_v36, %v11058_v20  ;;  %vm12840_vm11 = vmmov %vm12833_vm1  ;;  %vm12841_vm1 = vcmask 261120  }
 0xd5f   : > { %vm12846_vm7 = vmmov %vm12840_vm11  ;;  %v1140_v3 = vsel %vm12856_vm0, %v12855_v60, 0.0  ;;  %v12872_v60 = vld [vmem:[#allocation81_spill] sm:$0xff] }
 0xd60   : > { %3467 = vadd.xlane.f32.xlu1 %v3442_v44  ;;  %v4615_v24 = vsel %vm12834_vm12, %v4593_v28, 0.0  ;;  %v2218_v44 = vmul.f32 %v12743_v39, %v11058_v20  ;;  %vm12844_vm12 = vnez %v12685_v17  ;;  %v12861_v17 = vld [vmem:[#allocation106_spill] sm:$0xff] }
 0xd61   : > { %v3448_v1 = vsel %vm12844_vm12, %v10834_v42, 0.0 }
 0xd62   : > { %4649 = vadd.xlane.f32.xlu0 %v4648_v19  ;;  %v2238_v14 = vsel %vm12839_vm13, %v2218_v44, 0.0  ;;  %v3028_v19 = vmul.f32 %v12806_v52, %v11079_v46  ;;  %vm12845_vm13 = vmmov %vm12841_vm1 }
 0xd64   : > { %4610 = vadd.xlane.f32.xlu1 %v4609_v55  ;;  %v2247_v55 = vsel %vm12840_vm11, %v2221_v0, 0.0  ;;  %v3044_v10 = vsel %vm12841_vm1, %v3028_v19, 0.0  ;;  %v4590_v0 = vmul.f32 %v12832_v47, %v11030_v53  ;;  %vm12849_vm11 = vmmov %vm12841_vm1  ;;  %v12850_v19 = vld [vmem:[#allocation6_spill] sm:$0xff]  ;;  %v4592_v47 = vmul.f32 %v12743_v39, %v11030_v53 }
 0xd65   : > { %vm12851_vm1 = vmmov %vm12846_vm7  ;;  %v2220_v39 = vmul.f32 %v12747_v9, %v11058_v20 }
 0xd66   : > { %1168 = vadd.xlane.f32.xlu0 %v1136_v34  ;;  %v12842_v34 = vld [vmem:[#allocation17_spill] sm:$0xff] }
 0xd67   : > { %v3030_v6 = vmul.f32 %v12842_v34, %v11079_v46 }
 0xd68   : > { %3471 = vadd.xlane.f32.xlu1 %v3444_v45  ;;  %v12843_v45 = vld [vmem:[#allocation104_spill] sm:$0xff] }
 0xd69   : > { %v1143_v28 = vsel %vm12844_vm12, %v12843_v45, 0.0  ;;  %v3446_v45 = vsel %vm12838_vm2, %v10810_v30, 0.0  ;;  %v4597_v30 = vmul.f32 %v12755_v16, %v11030_v53  ;;  %vm12857_vm2 = vmmov %vm12851_vm1  ;;  %vm12862_vm12 = vnez %v12691_v15  ;;  %v12889_v15 = vld [vmem:[#allocation79_spill] sm:$0xff] }
 0xd6a   : > { %2233 = vadd.xlane.f32.xlu0 %v2232_v59  ;;  %v2223_v59 = vmul.f32 %v12755_v16, %v11058_v20  ;;  %v1145_v42 = vsel %vm12862_vm12, %v12861_v17, 0.0  ;;  %v12863_v16 = vld [vmem:[#allocation74_spill] sm:$0xff]  ;;  %v12878_v17 = vld [vmem:[#allocation20_spill] sm:$0xff] }
 0xd6c   : > { %4616 = vadd.xlane.f32.xlu1 %v4615_v24  ;;  %v3050_v24 = vsel %vm12845_vm13, %v3030_v6, 0.0  ;;  %v2253_v63 = vsel %vm12846_vm7, %v2223_v59, 0.0  ;;  %vm12852_vm7 = vmmov %vm12849_vm11 }
 0xd6d   : > { %vm12854_vm13 = vmmov %vm12851_vm1 }
 0xd6e   : > { %1172 = vadd.xlane.f32.xlu0 %v1138_v27  ;;  %v12847_v27 = vld [vmem:[#allocation29_spill] sm:$0xff] }
 0xd6f   : > { %v3033_v44 = vmul.f32 %v12847_v27, %v11079_v46 }
 0xd70   : > { %1178 = vadd.xlane.f32.xlu1 %v1141_v38  ;;  %v3441_v38 = vsel %vm12665_vm6, %v12848_v61, 0.0  ;;  %vm12853_vm6 = vmmov %vm12851_vm1 }
 0xd71   : > { %v4612_v59 = vsel %vm12853_vm6, %v4592_v47, 0.0  ;;  %vm12866_vm6 = vmmov %vm12857_vm2  ;;  %v12868_v47 = vld [vmem:[#allocation34_spill] sm:$0xff] }
 0xd72   : > { %2239 = vadd.xlane.f32.xlu0 %v2238_v14  ;;  %v3059_v14 = vsel %vm12849_vm11, %v3033_v44, 0.0  ;;  %vm12858_vm11 = vmmov %vm12851_vm1  ;;  %v12859_v44 = vld [vmem:[#allocation103_spill] sm:$0xff] }
 0xd74   : > { %2248 = vadd.xlane.f32.xlu1 %v2247_v55  ;;  %v3035_v55 = vmul.f32 %v12850_v19, %v11079_v46 }
 0xd76   : > { %3045 = vadd.xlane.f32.xlu0 %v3044_v10  ;;  %v4606_v10 = vsel %vm12851_vm1, %v4590_v0, 0.0  ;;  %v3065_v6 = vsel %vm12852_vm7, %v3035_v55, 0.0  ;;  %vm12860_vm1 = vnez %v12682_v31  ;;  %v2225_v0 = vmul.f32 %v12863_v16, %v11058_v20  ;;  %vm12864_vm7 = vmmov %vm12857_vm2  ;;  %v12865_v55 = vld [vmem:[#allocation25_spill] sm:$0xff] }
 0xd77   : > { %v1142_v61 = vsel %vm12860_vm1, %v12859_v44, 0.0  ;;  %v12885_v31 = vld [vmem:[#allocation105_spill] sm:$0xff] }
 0xd78   : > { %1182 = vadd.xlane.f32.xlu1 %v1143_v28  ;;  %v4595_v28 = vmul.f32 %v12751_v36, %v11030_v53  ;;  %v2244_v36 = vsel %vm12857_vm2, %v2220_v39, 0.0 }
 0xd7a   : > { %3051 = vadd.xlane.f32.xlu0 %v3050_v24  ;;  %v4621_v24 = vsel %vm12854_vm13, %v4595_v28, 0.0  ;;  %vm12867_vm13 = vcmask 261120   ;;  %v12869_v28 = vld [vmem:[#allocation108_spill] sm:$0xff] }
 0xd7c   : > { %2254 = vadd.xlane.f32.xlu1 %v2253_v63  ;;  %v4627_v63 = vsel %vm12858_vm11, %v4597_v30, 0.0  ;;  %vm12873_vm11 = vmmov %vm12867_vm13  ;;  %v12875_v30 = vld [vmem:[#allocation12_spill] sm:$0xff] }
 0xd7e   : > { %3465 = vadd.xlane.f32.xlu0 %v3441_v38  ;;  %v2222_v38 = vmul.f32 %v12753_v57, %v11058_v20 }
 0xd80   : > { %3060 = vadd.xlane.f32.xlu1 %v3059_v14  ;;  %v2250_v14 = vsel %vm12864_vm7, %v2222_v38, 0.0  ;;  %vm12874_vm7 = vmmov %vm12866_vm6 }
 0xd82   : > { %4607 = vadd.xlane.f32.xlu0 %v4606_v10  ;;  %v3032_v10 = vmul.f32 %v12865_v55, %v11079_v46 }
 0xd84   : > { %3066 = vadd.xlane.f32.xlu1 %v3065_v6  ;;  %v2259_v6 = vsel %vm12866_vm6, %v2225_v0, 0.0  ;;  %vm12877_vm6 = vmmov %vm12873_vm11 }
 0xd86   : > { %3469 = vadd.xlane.f32.xlu0 %v3443_v5  ;;  %v3056_v5 = vsel %vm12867_vm13, %v3032_v10, 0.0  ;;  %vm12879_vm13 = vmmov %vm12874_vm7  ;;  %v12881_v10 = vld [vmem:[#allocation37_spill] sm:$0xff] }
 0xd87   : > { %v3447_v8 = vsel %vm12860_vm1, %v12881_v10, 0.0 }
 0xd88   : > { %3475 = vadd.xlane.f32.xlu1 %v3446_v45  ;;  %v3034_v45 = vmul.f32 %v12868_v47, %v11079_v46 }
 0xd8a   : > { %4613 = vadd.xlane.f32.xlu0 %v4612_v59  ;;  %v12870_v59 = vld [vmem:[#allocation92_spill] sm:$0xff]  ;;  %v3062_v39 = vsel %vm12873_vm11, %v3034_v45, 0.0  ;;  %vm12880_vm11 = vmmov %vm12877_vm6  ;;  %v4599_v45 = vmul.f32 %v12863_v16, %v11030_v53  ;;  %v4601_v16 = vmul.f32 %v12872_v60, %v11030_v53 }
 0xd8b   : > { %vm12871_vm2 = vnez %v12870_v59  ;;  %v12896_v59 = vld [vmem:[#allocation110_spill] sm:$0xff] }
 0xd8c   : > { %4622 = vadd.xlane.f32.xlu1 %v4621_v24  ;;  %v1147_v24 = vsel %vm12871_vm2, %v12869_v28, 0.0  ;;  %v1149_v10 = vsel %vm12708_vm9, %v12896_v59, 0.0 }
 0xd8e   : > { %1176 = vadd.xlane.f32.xlu0 %v1140_v3  ;;  %v2227_v3 = vmul.f32 %v12872_v60, %v11058_v20  ;;  %v2229_v60 = vmul.f32 %v12766_v13, %v11058_v20  ;;  %v1151_v13 = vsel %vm12710_vm14, %v12902_v62, 0.0 }
 0xd90   : > { %3479 = vadd.xlane.f32.xlu1 %v3448_v1  ;;  %v2265_v1 = vsel %vm12874_vm7, %v2227_v3, 0.0  ;;  %v12886_v3 = vld [vmem:[#allocation84_spill] sm:$0xff] }
 0xd91   : > { %vm12887_vm1 = vnez %v12886_v3 }
 0xd92   : > { %2245 = vadd.xlane.f32.xlu0 %v2244_v36  ;;  %v3037_v36 = vmul.f32 %v12875_v30, %v11079_v46 }
 0xd94   : > { %4628 = vadd.xlane.f32.xlu1 %v4627_v63  ;;  %v12876_v63 = vld [vmem:[#allocation70_spill] sm:$0xff]  ;;  %v3071_v38 = vsel %vm12877_vm6, %v3037_v36, 0.0  ;;  %v3452_v36 = vsel %vm12871_vm2, %v12889_v15, 0.0 }
 0xd95   : > { %v3445_v44 = vsel %vm12856_vm0, %v12876_v63, 0.0  ;;  %vm12883_vm0 = vmmov %vm12874_vm7 }
 0xd96   : > { %1180 = vadd.xlane.f32.xlu0 %v1142_v61  ;;  %v4594_v61 = vmul.f32 %v12747_v9, %v11030_v53  ;;  %v4596_v9 = vmul.f32 %v12753_v57, %v11030_v53  ;;  %vm12884_vm7 = vmmov %vm12883_vm0  ;;  %v12888_v57 = vld [vmem:[#allocation76_spill] sm:$0xff] }
 0xd97   : > { %vm12891_vm6 = vmmov %vm12883_vm0  ;;  %v4598_v4 = vmul.f32 %v12888_v57, %v11030_v53 }
 0xd98   : > { %1186 = vadd.xlane.f32.xlu1 %v1145_v42  ;;  %v3039_v42 = vmul.f32 %v12878_v17, %v11079_v46  ;;  %v4618_v0 = vsel %vm12879_vm13, %v4594_v61, 0.0  ;;  %v4624_v28 = vsel %vm12883_vm0, %v4596_v9, 0.0  ;;  %v12892_v61 = vld [vmem:[#allocation107_spill] sm:$0xff]  ;;  %vm12897_vm2 = vmmov %vm12883_vm0  ;;  %v12898_v9 = vld [vmem:[#allocation8_spill] sm:$0xff] }
 0xd99   : > { %vm12906_vm14 = vmmov %vm12897_vm2 }
 0xd9a   : > { %2251 = vadd.xlane.f32.xlu0 %v2250_v14  ;;  %v3077_v14 = vsel %vm12880_vm11, %v3039_v42, 0.0  ;;  %vm12899_vm11 = vmmov %vm12883_vm0 }
 0xd9c   : > { %2260 = vadd.xlane.f32.xlu1 %v2259_v6  ;;  %v12882_v6 = vld [vmem:[#allocation73_spill] sm:$0xff] }
 0xd9e   : > { %3057 = vadd.xlane.f32.xlu0 %v3056_v5  ;;  %v3450_v5 = vsel %vm12862_vm12, %v12882_v6, 0.0  ;;  %vm12890_vm12 = vmmov %vm12883_vm0  ;;  %v3036_v6 = vmul.f32 %v12898_v9, %v11079_v46  ;;  %vm12900_vm0 = vcmask 261120  }
 0xd9f   : > { %vm12903_vm9 = vmmov %vm12900_vm0 }
 0xda0   : > { %1190 = vadd.xlane.f32.xlu1 %v1147_v24  ;;  %v4633_v24 = vsel %vm12884_vm7, %v4599_v45, 0.0  ;;  %v3068_v45 = vsel %vm12900_vm0, %v3036_v6, 0.0  ;;  %vm12904_vm7 = vmmov %vm12897_vm2 }
 0xda2   : > { %3063 = vadd.xlane.f32.xlu0 %v3062_v39  ;;  %v1144_v39 = vsel %vm12887_vm1, %v12885_v31, 0.0  ;;  %v2231_v31 = vmul.f32 %v12770_v40, %v11058_v20 }
 0xda4   : > { %2266 = vadd.xlane.f32.xlu1 %v2265_v1  ;;  %v2224_v1 = vmul.f32 %v12888_v57, %v11058_v20  ;;  %v2277_v15 = vsel %vm12904_vm7, %v2231_v31, 0.0  ;;  %v12907_v57 = vld [vmem:[#allocation75_spill] sm:$0xff]  ;;  %vm12954_vm7 = vmmov %vm12900_vm0 }
 0xda6   : > { %3473 = vadd.xlane.f32.xlu0 %v3445_v44  ;;  %v2256_v63 = vsel %vm12890_vm12, %v2224_v1, 0.0  ;;  %v4639_v44 = vsel %vm12891_vm6, %v4601_v16, 0.0  ;;  %vm12910_vm12 = vmmov %vm12900_vm0 }
 0xda8   : > { %3072 = vadd.xlane.f32.xlu1 %v3071_v38  ;;  %v12893_v38 = vld [vmem:[#allocation88_spill] sm:$0xff] }
 0xda9   : > { %vm12894_vm13 = vnez %v12893_v38 }
 0xdaa   : > { %4619 = vadd.xlane.f32.xlu0 %v4618_v0  ;;  %v1146_v42 = vsel %vm12894_vm13, %v12892_v61, 0.0  ;;  %v12895_v0 = vld [vmem:[#allocation80_spill] sm:$0xff] }
 0xdac   : > { %3078 = vadd.xlane.f32.xlu1 %v3077_v14  ;;  %v2226_v14 = vmul.f32 %v12895_v0, %v11058_v20 }
 0xdae   : > { %3477 = vadd.xlane.f32.xlu0 %v3447_v8  ;;  %v2262_v8 = vsel %vm12897_vm2, %v2226_v14, 0.0 }
 0xdb0   : > { %3483 = vadd.xlane.f32.xlu1 %v3450_v5  ;;  %v2271_v5 = vsel %vm12899_vm11, %v2229_v60, 0.0  ;;  %vm12950_vm11 = vmmov %vm12900_vm0 }
 0xdb2   : > { %4625 = vadd.xlane.f32.xlu0 %v4624_v28  ;;  %v12901_v28 = vld [vmem:[#allocation16_spill] sm:$0xff] }
 0xdb4   : > { %4634 = vadd.xlane.f32.xlu1 %v4633_v24  ;;  %v3038_v24 = vmul.f32 %v12901_v28, %v11079_v46 }
 0xdb6   : > { %1184 = vadd.xlane.f32.xlu0 %v1144_v39  ;;  %v3074_v39 = vsel %vm12903_vm9, %v3038_v24, 0.0  ;;  %vm12953_vm9 = vmmov %vm12900_vm0 }
 0xdb8   : > { %3487 = vadd.xlane.f32.xlu1 %v3452_v36 }
 0xdba   : > { %2257 = vadd.xlane.f32.xlu0 %v2256_v63  ;;  %v12905_v63 = vld [vmem:[#allocation39_spill] sm:$0xff] }
 0xdbc   : > { %4640 = vadd.xlane.f32.xlu1 %v4639_v44  ;;  %v3449_v44 = vsel %vm12887_vm1, %v12905_v63, 0.0  ;;  %vm12908_vm1 = vmmov %vm12897_vm2 }
 0xdbd   : > { %vm12911_vm6 = vmmov %vm12908_vm1 }
 0xdbe   : > { %1188 = vadd.xlane.f32.xlu0 %v1146_v42  ;;  %vm12947_vm2 = vmmov %vm12900_vm0 }
 0xdc0   : > { %1194 = vadd.xlane.f32.xlu1 %v1149_v10 }
 0xdc2   : > { %2263 = vadd.xlane.f32.xlu0 %v2262_v8 }
 0xdc4   : > { %2272 = vadd.xlane.f32.xlu1 %v2271_v5  ;;  %v4600_v5 = vmul.f32 %v12895_v0, %v11030_v53 }
 0xdc6   : > { %3069 = vadd.xlane.f32.xlu0 %v3068_v45  ;;  %v4636_v62 = vsel %vm12908_vm1, %v4600_v5, 0.0 }
 0xdc8   : > { %1198 = vadd.xlane.f32.xlu1 %v1151_v13 }
 0xdca   : > { %3075 = vadd.xlane.f32.xlu0 %v3074_v39 }
 0xdcb   : > { %v4996_v1 = vpop.xlane.xlu0 %4995 }
 0xdcc   : > { %v5006_v36 = vsub.f32 %v11034_v49, %v4996_v1  ;;  %2278 = vadd.xlane.f32.xlu1 %v2277_v15  ;;  %v4630_v49 = vsel %vm12906_vm14, %v4598_v4, 0.0  ;;  %v12909_v1 = vld [vmem:[#allocation109_spill] sm:$0xff]  ;;  %vm12955_vm14 = vmmov %vm12900_vm0 }
 0xdcd   : > { %v4999_v16 = vpop.xlane.xlu1 %4998  ;;  %v1148_v53 = vsel %vm12730_vm8, %v12909_v1, 0.0  ;;  %vm12918_vm8 = vmmov %vm12908_vm1  ;;  %v12919_v1 = vld [vmem:[#allocation19_spill] sm:$0xff] }
 0xdce   : > { %v5010_v61 = vmul.f32 1.442695, %v5006_v36  ;;  %v5007_v40 = vsub.f32 %v11044_v43, %v4999_v16  ;;  %3481 = vadd.xlane.f32.xlu0 %v3449_v44  ;;  %v3451_v43 = vsel %vm12894_vm13, %v12907_v57, 0.0  ;;  %v2228_v36 = vmul.f32 %v12764_v54, %v11058_v20  ;;  %vm12946_vm13 = vmmov %vm12900_vm0 }
 0xdcf   : > { %v5002_v42 = vpop.xlane.xlu0 %5001  ;;  %vm12956_vm1 = vmmov %vm12900_vm0 }
 0xdd0   : > { %8241 = vpow2.f32 %v5010_v61  ;;  %v5012_v14 = vmul.f32 1.442695, %v5007_v40  ;;  %v5008_v59 = vsub.f32 %v11040_v12, %v5002_v42  ;;  %v2268_v32 = vsel %vm12911_vm6, %v2228_v36, 0.0  ;;  %vm12958_vm6 = vmmov %vm12900_vm0 }
 0xdd1   : > { %v4653_v10 = vpop.xlane.xlu1 %4652 }
 0xdd2   : > { %8243 = vpow2.f32 %v5012_v14  ;;  %v5014_v60 = vmul.f32 1.442695, %v5008_v59  ;;  %4631 = vadd.xlane.f32.xlu0 %v4630_v49  ;;  %v12912_v59 = vld [vmem:[#allocation111_spill] sm:$0xff] }
 0xdd3   : > { %v5005_v3 = vpop.xlane.xlu0 %5004  ;;  %v1150_v49 = vsel %vm12712_vm15, %v12912_v59, 0.0  ;;  %vm12922_vm15 = vmmov %vm12900_vm0 }
 0xdd4   : > { %v5009_v8 = vsub.f32 %v11054_v58, %v5005_v3  ;;  %8245 = vpow2.f32 %v5014_v60  ;;  %v2230_v60 = vmul.f32 %v12768_v11, %v11058_v20 }
 0xdd5   : > { %v1171_v6 = vpop.xlane.xlu1 %1170 }
 0xdd6   : > { %v5016_v45 = vmul.f32 1.442695, %v5009_v8  ;;  %3485 = vadd.xlane.f32.xlu0 %v3451_v43  ;;  %v12916_v8 = vmov 0.0   ;;  %v2274_v2 = vsel %vm12918_vm8, %v2230_v60, 0.0  ;;  %vm12962_vm8 = vmmov %vm12900_vm0 }
 0xdd7   : > { %v11284_v12 = vpop.xlane.xlu0 %3489 }
 0xdd8   : > { %8247 = vpow2.f32 %v5016_v45 }
 0xdd9   : > { %v2237_v24 = vpop.xlane.xlu1 %2236 }
 0xdda   : > { %v8242_v13 = vpop.eup %8241  ;;  %v2281_v31 = vadd.f32 %v2237_v24, %v1171_v6  ;;  %4637 = vadd.xlane.f32.xlu0 %v4636_v62 }
 0xddb   : > { %v11287_v58 = vpop.xlane.xlu0 %3491  ;;  %v5018_v0 = vsel %vm12644_vm5, %v8242_v13, 0.0  ;;  %vm12913_vm5 = vmmov %vm12900_vm0 }
 0xddc   : > { %v8244_v39 = vpop.eup %8243 }
 0xddd   : > { %v1175_v38 = vpop.xlane.xlu1 %1174  ;;  %v5019_v15 = vsel %vm12810_vm4, %v8244_v39, 0.0  ;;  %vm12945_vm4 = vmmov %vm12900_vm0 }
 0xdde   : > { %1192 = vadd.xlane.f32.xlu0 %v1148_v53  ;;  %v5022_v16 = vpack.c.bf16 %v5019_v15, %v5018_v0  ;;  %v8246_v44 = vpop.eup %8245  ;;  %v12921_v0 = vmov 1.0  }
 0xddf   : > { %v11298_v63 = vpop.xlane.xlu0 %4643  ;;  %v5020_v29 = vsel %vm12646_vm3, %v8246_v44, 0.0  ;;  %vm12915_vm3 = vnez %v12914_v26 }
 0xde0   : > { %7423 = vmatprep.mubr.msk.bf16.mxu1 %vm12910_vm12, %v5022_v16  ;;  %vm12957_vm12 = vmmov %vm12900_vm0 }
 0xde1   : > { %v2243_v4 = vpop.xlane.xlu1 %2242 }
 0xde2   : > { %v8248_v61 = vpop.eup %8247  ;;  %v2283_v40 = vadd.f32 %v2243_v4, %v1175_v38  ;;  %2269 = vadd.xlane.f32.xlu0 %v2268_v32 }
 0xde3   : > { %v5021_v37 = vsel %vm12650_vm10, %v8248_v61, 0.0  ;;  %v11306_v54 = vpop.xlane.xlu0 %4646  ;;  %vm12917_vm10 = vmmov 0  }
 0xde4   : > { %v5023_v42 = vpack.c.bf16 %v5021_v37, %v5020_v29 }
 0xde5   : > { %v3049_v14 = vpop.xlane.xlu1 %3048 }
 0xde6   : > { %v3093_v3 = vadd.f32 %v3049_v14, %v2281_v31  ;;  %1196 = vadd.xlane.f32.xlu0 %v1150_v49  ;;  %7424 = vmatmul.mubr.msk.bf16.vlgmr.msra.gmra.mrb[108].mxu1 %vm12913_vm5, %v5023_v42  ;;  %vm12959_vm5 = vmmov %vm12900_vm0 }
 0xde7   : > { %7889 = vmatpush3.bf16.xpose.msk.msra.mxu1 %vm12915_vm3, %v5022_v16  ;;  %v3494_v41 = vpop.xlane.xlu0 %3493  ;;  %7467 = vmatprep.mubr.msk.f32.mxu1 %vm12917_vm10, %v12916_v8  ;;  %v12923_v16 = vld [vmem:[#allocation23_spill] sm:$0xff]  ;;  %vm12961_vm10 = vmmov %vm12900_vm0 }
 0xde8   : > { %v3109_v6 = vadd.f32 1e-08, %v3093_v3  ;;  %7890 = vmatprep.subr.bf16.mxu1 %v12361_v35 }
 0xde9   : > { %v3055_v57 = vpop.xlane.xlu1 %3054 }
 0xdea   : > { %8249 = vrcp.f32 %v3109_v6  ;;  %v3095_v43 = vadd.f32 %v3055_v57, %v2283_v40  ;;  %2275 = vadd.xlane.f32.xlu0 %v2274_v2 }
 0xdeb   : > { %v3496_v11 = vpop.xlane.xlu0 %3495 }
 0xdec   : > { %v3111_v20 = vadd.f32 1e-08, %v3095_v43  ;;  %v11320_v5 = vadd.f32 %v4653_v10, %v3496_v11 }
 0xded   : > { %v3468_v45 = vpop.xlane.xlu1 %3467 }
 0xdee   : > { %8251 = vrcp.f32 %v3111_v20 }
 0xdef   : > { %7893 = vmatpush3.bf16.xpose.msk.msra.mxu1 %vm12915_vm3, %v5023_v42  ;;  %v4650_v24 = vpop.xlane.xlu0 %4649  ;;  %vm12960_vm3 = vmmov %vm12900_vm0 }
 0xdf0   : > { %v11324_v62 = vadd.f32 %v4650_v24, %v3494_v41 }
 0xdf1   : > { %v4611_v13 = vpop.xlane.xlu1 %4610 }
 0xdf2   : > { %v11326_v35 = vadd.f32 %v4611_v13, %v3468_v45 }
 0xdf3   : > { %v1169_v31 = vpop.xlane.xlu0 %1168 }
 0xdf4   : > { %v8250_v39 = vpop.eup %8249 }
 0xdf5   : > { %v3472_v38 = vpop.xlane.xlu1 %3471  ;;  %v11329_v53 = vmul.f32 %v8250_v39, %v12919_v1  ;;  %v12925_v1 = vld [vmem:[#allocation18_spill] sm:$0xff] }
 0xdf6   : > { %7468 = vmatmul.mubr.msk.f32.vlgmr.msra.gmra.mrb[112].mxu1 %vm12922_vm15, %v12921_v0  ;;  %vm12963_vm15 = vmmov %vm12900_vm0 }
 0xdf7   : > { %12920 = vst [vmem:[#allocation95_spill] sm:$0xff] %v11329_v53  ;;  %v2234_v10 = vpop.xlane.xlu0 %2233 }
 0xdf8   : > { %v8252_v15 = vpop.eup %8251  ;;  %v2280_v36 = vadd.f32 %v2234_v10, %v1169_v31 }
 0xdf9   : > { %v11334_v44 = vmul.f32 %v8252_v15, %v12923_v16  ;;  %v4617_v4 = vpop.xlane.xlu1 %4616 }
 0xdfa   : > { %v11336_v32 = vadd.f32 %v4617_v4, %v3472_v38  ;;  %v12927_v4 = vld [vmem:[#allocation22_spill] sm:$0xff] }
 0xdfb   : > { %12924 = vst [vmem:[#allocation96_spill] sm:$0xff] %v11334_v44  ;;  %v1173_v61 = vpop.xlane.xlu0 %1172 }
 0xdfd   : > { %v1179_v40 = vpop.xlane.xlu1 %1178 }
 0xdff   : > { %v2240_v29 = vpop.xlane.xlu0 %2239 }
 0xe00   : > { %v2282_v37 = vadd.f32 %v2240_v29, %v1173_v61 }
 0xe01   : > { %v2249_v42 = vpop.xlane.xlu1 %2248 }
 0xe02   : > { %v2285_v14 = vadd.f32 %v2249_v42, %v1179_v40 }
 0xe03   : > { %v3046_v59 = vpop.xlane.xlu0 %3045 }
 0xe04   : > { %v3092_v49 = vadd.f32 %v3046_v59, %v2280_v36 }
 0xe05   : > { %v1183_v60 = vpop.xlane.xlu1 %1182 }
 0xe06   : > { %v3108_v3 = vadd.f32 1e-08, %v3092_v49 }
 0xe07   : > { %v3052_v26 = vpop.xlane.xlu0 %3051 }
 0xe08   : > { %8253 = vrcp.f32 %v3108_v3  ;;  %v3094_v41 = vadd.f32 %v3052_v26, %v2282_v37  ;;  %v12929_v3 = vld [vmem:[#allocation27_spill] sm:$0xff] }
 0xe09   : > { %v2255_v8 = vpop.xlane.xlu1 %2254 }
 0xe0a   : > { %v3110_v6 = vadd.f32 1e-08, %v3094_v41  ;;  %v2287_v57 = vadd.f32 %v2255_v8, %v1183_v60 }
 0xe0b   : > { %v3466_v2 = vpop.xlane.xlu0 %3465 }
 0xe0c   : > { %8255 = vrcp.f32 %v3110_v6 }
 0xe0d   : > { %v3061_v43 = vpop.xlane.xlu1 %3060 }
 0xe0e   : > { %v3097_v11 = vadd.f32 %v3061_v43, %v2285_v14 }
 0xe0f   : > { %v4608_v20 = vpop.xlane.xlu0 %4607 }
 0xe10   : > { %v3113_v45 = vadd.f32 1e-08, %v3097_v11  ;;  %v11338_v24 = vadd.f32 %v4608_v20, %v3466_v2  ;;  %v12931_v2 = vld [vmem:[#allocation31_spill] sm:$0xff] }
 0xe11   : > { %v3067_v13 = vpop.xlane.xlu1 %3066 }
 0xe12   : > { %v8254_v31 = vpop.eup %8253  ;;  %8257 = vrcp.f32 %v3113_v45  ;;  %v3099_v39 = vadd.f32 %v3067_v13, %v2287_v57 }
 0xe13   : > { %v3470_v38 = vpop.xlane.xlu0 %3469  ;;  %v11341_v0 = vmul.f32 %v8254_v31, %v12925_v1 }
 0xe14   : > { %v3115_v10 = vadd.f32 1e-08, %v3099_v39 }
 0xe15   : > { %12926 = vst [vmem:[#allocation94_spill] sm:$0xff] %v11341_v0  ;;  %v3476_v15 = vpop.xlane.xlu1 %3475 }
 0xe16   : > { %v8256_v16 = vpop.eup %8255  ;;  %8259 = vrcp.f32 %v3115_v10 }
 0xe17   : > { %v11346_v61 = vmul.f32 %v8256_v16, %v12927_v4  ;;  %v4614_v40 = vpop.xlane.xlu0 %4613 }
 0xe18   : > { %v11348_v29 = vadd.f32 %v4614_v40, %v3470_v38 }
 0xe19   : > { %12928 = vst [vmem:[#allocation49_spill] sm:$0xff] %v11346_v61  ;;  %v4623_v37 = vpop.xlane.xlu1 %4622 }
 0xe1a   : > { %v11352_v14 = vadd.f32 %v4623_v37, %v3476_v15 }
 0xe1b   : > { %v1177_v59 = vpop.xlane.xlu0 %1176 }
 0xe1c   : > { %v8258_v49 = vpop.eup %8257 }
 0xe1d   : > { %v3480_v60 = vpop.xlane.xlu1 %3479  ;;  %v11355_v26 = vmul.f32 %v8258_v49, %v12929_v3 }
 0xe1f   : > { %12930 = vst [vmem:[#allocation5_spill] sm:$0xff] %v11355_v26  ;;  %v2246_v41 = vpop.xlane.xlu0 %2245  ;;  %v12941_v26 = vld [vmem:[#allocation35_spill] sm:$0xff] }
 0xe20   : > { %v8260_v8 = vpop.eup %8259  ;;  %v2284_v6 = vadd.f32 %v2246_v41, %v1177_v59 }
 0xe21   : > { %v4629_v57 = vpop.xlane.xlu1 %4628  ;;  %v11358_v43 = vmul.f32 %v8260_v8, %v12931_v2 }
 0xe22   : > { %v11360_v11 = vadd.f32 %v4629_v57, %v3480_v60 }
 0xe23   : > { %12932 = vst [vmem:[#allocation38_spill] sm:$0xff] %v11358_v43  ;;  %v1181_v20 = vpop.xlane.xlu0 %1180 }
 0xe25   : > { %v1187_v45 = vpop.xlane.xlu1 %1186 }
 0xe27   : > { %v2252_v13 = vpop.xlane.xlu0 %2251 }
 0xe28   : > { %v2286_v31 = vadd.f32 %v2252_v13, %v1181_v20 }
 0xe29   : > { %v2261_v39 = vpop.xlane.xlu1 %2260 }
 0xe2a   : > { %v2289_v38 = vadd.f32 %v2261_v39, %v1187_v45  ;;  %v12933_v39 = vld [vmem:[#allocation26_spill] sm:$0xff] }
 0xe2b   : > { %v3058_v1 = vpop.xlane.xlu0 %3057 }
 0xe2c   : > { %v3096_v10 = vadd.f32 %v3058_v1, %v2284_v6 }
 0xe2d   : > { %v1191_v15 = vpop.xlane.xlu1 %1190 }
 0xe2e   : > { %v3112_v16 = vadd.f32 1e-08, %v3096_v10 }
 0xe2f   : > { %v3064_v4 = vpop.xlane.xlu0 %3063 }
 0xe30   : > { %8261 = vrcp.f32 %v3112_v16  ;;  %v3098_v40 = vadd.f32 %v3064_v4, %v2286_v31  ;;  %v12935_v4 = vld [vmem:[#allocation30_spill] sm:$0xff] }
 0xe31   : > { %v2267_v37 = vpop.xlane.xlu1 %2266 }
 0xe32   : > { %v3114_v59 = vadd.f32 1e-08, %v3098_v40  ;;  %v2291_v49 = vadd.f32 %v2267_v37, %v1191_v15 }
 0xe33   : > { %v3474_v3 = vpop.xlane.xlu0 %3473 }
 0xe34   : > { %8263 = vrcp.f32 %v3114_v59 }
 0xe35   : > { %v3073_v60 = vpop.xlane.xlu1 %3072 }
 0xe36   : > { %v3101_v41 = vadd.f32 %v3073_v60, %v2289_v38 }
 0xe37   : > { %v4620_v8 = vpop.xlane.xlu0 %4619 }
 0xe38   : > { %v3117_v57 = vadd.f32 1e-08, %v3101_v41  ;;  %v11362_v2 = vadd.f32 %v4620_v8, %v3474_v3  ;;  %v12937_v8 = vld [vmem:[#allocation36_spill] sm:$0xff] }
 0xe39   : > { %v3079_v20 = vpop.xlane.xlu1 %3078 }
 0xe3a   : > { %v8262_v45 = vpop.eup %8261  ;;  %8265 = vrcp.f32 %v3117_v57  ;;  %v3103_v6 = vadd.f32 %v3079_v20, %v2291_v49 }
 0xe3b   : > { %v3478_v13 = vpop.xlane.xlu0 %3477  ;;  %v11365_v1 = vmul.f32 %v8262_v45, %v12933_v39 }
 0xe3c   : > { %v3119_v31 = vadd.f32 1e-08, %v3103_v6 }
 0xe3d   : > { %12934 = vst [vmem:[#allocation50_spill] sm:$0xff] %v11365_v1  ;;  %v11367_v10 = vpop.xlane.xlu1 %3483 }
 0xe3e   : > { %v8264_v16 = vpop.eup %8263  ;;  %8267 = vrcp.f32 %v3119_v31  ;;  %v12939_v31 = vld [vmem:[#allocation41_spill] sm:$0xff] }
 0xe3f   : > { %v4626_v38 = vpop.xlane.xlu0 %4625  ;;  %v11372_v40 = vmul.f32 %v8264_v16, %v12935_v4 }
 0xe40   : > { %v11374_v37 = vadd.f32 %v4626_v38, %v3478_v13 }
 0xe41   : > { %12936 = vst [vmem:[#allocation51_spill] sm:$0xff] %v11372_v40  ;;  %v11376_v59 = vpop.xlane.xlu1 %4634 }
 0xe43   : > { %v1185_v3 = vpop.xlane.xlu0 %1184 }
 0xe44   : > { %v8266_v60 = vpop.eup %8265 }
 0xe45   : > { %v11380_v41 = vpop.xlane.xlu1 %3487  ;;  %v11383_v57 = vmul.f32 %v8266_v60, %v12937_v8 }
 0xe47   : > { %12938 = vst [vmem:[#allocation33_spill] sm:$0xff] %v11383_v57  ;;  %v2258_v20 = vpop.xlane.xlu0 %2257 }
 0xe48   : > { %v8268_v45 = vpop.eup %8267  ;;  %v2288_v6 = vadd.f32 %v2258_v20, %v1185_v3 }
 0xe49   : > { %v11385_v39 = vpop.xlane.xlu1 %4640  ;;  %v11388_v13 = vmul.f32 %v8268_v45, %v12939_v31 }
 0xe4b   : > { %12940 = vst [vmem:[#allocation47_spill] sm:$0xff] %v11388_v13  ;;  %v1189_v16 = vpop.xlane.xlu0 %1188 }
 0xe4d   : > { %v1195_v38 = vpop.xlane.xlu1 %1194 }
 0xe4f   : > { %v2264_v4 = vpop.xlane.xlu0 %2263 }
 0xe50   : > { %v2290_v15 = vadd.f32 %v2264_v4, %v1189_v16 }
 0xe51   : > { %v2273_v49 = vpop.xlane.xlu1 %2272 }
 0xe52   : > { %v11390_v42 = vadd.f32 %v2273_v49, %v1195_v38 }
 0xe53   : > { %v3070_v36 = vpop.xlane.xlu0 %3069 }
 0xe54   : > { %v3100_v40 = vadd.f32 %v3070_v36, %v2288_v6 }
 0xe56   : > { %v3116_v43 = vadd.f32 1e-08, %v3100_v40 }
 0xe57   : > { %v3076_v60 = vpop.xlane.xlu0 %3075 }
 0xe58   : > { %8269 = vrcp.f32 %v3116_v43  ;;  %v3102_v8 = vadd.f32 %v3076_v60, %v2290_v15  ;;  %v12943_v43 = vld [vmem:[#allocation40_spill] sm:$0xff] }
 0xe5a   : > { %v3118_v1 = vadd.f32 1e-08, %v3102_v8 }
 0xe5b   : > { %v11392_v3 = vpop.xlane.xlu0 %3481 }
 0xe5c   : > { %8271 = vrcp.f32 %v3118_v1 }
 0xe5f   : > { %v11394_v20 = vpop.xlane.xlu0 %4631 }
 0xe62   : > { %v8270_v45 = vpop.eup %8269 }
 0xe63   : > { %v11396_v31 = vpop.xlane.xlu0 %3485  ;;  %v11399_v16 = vmul.f32 %v8270_v45, %v12941_v26 }
 0xe65   : > { %12942 = vst [vmem:[#allocation48_spill] sm:$0xff] %v11399_v16 }
 0xe66   : > { %v8272_v36 = vpop.eup %8271 }
 0xe67   : > { %v11403_v40 = vpop.xlane.xlu0 %4637  ;;  %v11406_v15 = vmul.f32 %v8272_v36, %v12943_v43 }
 0xe69   : > { %12944 = vst [vmem:[#allocation53_spill] sm:$0xff] %v11406_v15 }
 0xe6b   : > { %v1193_v6 = vpop.xlane.xlu0 %1192 }
 0xe6f   : > { %v2270_v38 = vpop.xlane.xlu0 %2269 }
 0xe70   : > { %v11410_v4 = vadd.f32 %v2270_v38, %v1193_v6  ;;  %v12948_v38 = vld [vmem:[#allocation28_spill] sm:$0xff] }
 0xeb9   : > { %v7425_v60 = vpop.f32.mrb[108].mxu1 }
 0xeba   : > { %v5066_v8 = vpop.f32.mrb[109].mxu1 }
 0xebb   : > { %v7426_v26 = vpop.f32.mrb[110].mxu1 }
 0xebc   : > { %v7882_v45 = vpack.c.bf16 %v7426_v26, %v7425_v60  ;;  %v5069_v61 = vpop.f32.mrb[111].mxu1 }
 0xebd   : > { %v7878_v44 = vpack.c.bf16 %v5069_v61, %v5066_v8  ;;  %v12949_v61 = vld [vmem:[#allocation24_spill] sm:$0xff] }
 0xebf   : > { %7879 = vmatprep.subr.bf16.mxu0 %v7878_v44 }
 0xec0   : > { %7881 = vmatpush3.bf16.msra.mxu0 %v7878_v44  ;;  %v12951_v44 = vld [vmem:[#allocation10_spill] sm:$0xff] }
 0xec1   : > { %7883 = vmatprep.subr.bf16.mxu0 %v7882_v45 }
 0xec4   : > { %7885 = vmatpush3.bf16.msra.mxu0 %v7882_v45  ;;  %v12952_v45 = vld [vmem:[#allocation32_spill] sm:$0xff] }
 0xec7   : > { %7436 = vmatmul.mubr.msk.f32.vlgmr.msra.gmra.mrb[154].mxu0 %vm12945_vm4, %v12823_v18  ;;  %vm12964_vm4 = vmmov %vm12900_vm0 }
 0xec8   : > { %7438 = vmatprep.mubr.msk.f32.mxu0 %vm12946_vm13, %v12842_v34  ;;  %vm12965_vm13 = vmmov %vm12900_vm0 }
 0xec9   : > { %v5320_v36 = vpop.f32.mrb[112].mxu1 }
 0xeca   : > { %v5327_v43 = vrot.slane %v5320_v36, %v11027_v21  ;;  %v7469_v6 = vpop.f32.mrb[113].mxu1 }
 0xecb   : > { %7439 = vmatmul.mubr.msk.f32.gmra.mrb[160].mxu0 %vm12947_vm2, %v12826_v56  ;;  %v3041_v6 = vmul.f32 %v12948_v38, %v11079_v46  ;;  %vm12966_vm2 = vmmov %vm12900_vm0 }
 0xecc   : > { %v5341_v60 = vmul.f32 %v12948_v38, %v5327_v43  ;;  %v5340_v8 = vmul.f32 %v12949_v61, %v5327_v43  ;;  %7441 = vmatprep.mubr.msk.f32.mxu0 %vm12950_vm11, %v12865_v55  ;;  %v5343_v26 = vmul.f32 %v12951_v44, %v5327_v43  ;;  %v5342_v1 = vmul.f32 %v12952_v45, %v5327_v43  ;;  %vm12967_vm11 = vmmov %vm12900_vm0 }
 0xece   : > { %v5383_v49 = vsel %vm12900_vm0, %v5341_v60, 0.0  ;;  %v5380_v15 = vsel %vm12953_vm9, %v5340_v8, 0.0  ;;  %v5389_v21 = vsel %vm12955_vm14, %v5343_v26, 0.0  ;;  %v5386_v36 = vsel %vm12956_vm1, %v5342_v1, 0.0  ;;  %vm12968_vm9 = vmmov %vm12900_vm0 }
 0xecf   : > { %5384 = vadd.xlane.f32.xlu1 %v5383_v49  ;;  %5381 = vadd.xlane.f32.xlu0 %v5380_v15  ;;  %v3040_v60 = vmul.f32 %v12949_v61, %v11079_v46  ;;  %v5329_v49 = vmul.f32 %v12823_v18, %v5327_v43  ;;  %v5328_v15 = vmul.f32 %v12806_v52, %v5327_v43  ;;  %v3083_v1 = vsel %vm12960_vm3, %v3041_v6, 0.0  ;;  %vm12970_vm14 = vmmov %vm12900_vm0 }
 0xed0   : > { %7442 = vmatmul.mubr.msk.f32.gmra.mrb[162].mxu0 %vm12954_vm7, %v12847_v27  ;;  %v5331_v18 = vmul.f32 %v12826_v56, %v5327_v43  ;;  %v5330_v52 = vmul.f32 %v12842_v34, %v5327_v43  ;;  %vm12969_vm7 = vmmov %vm12900_vm0 }
 0xed1   : > { %7444 = vmatprep.mubr.msk.f32.mxu0 %vm12957_vm12, %v12868_v47  ;;  %v3080_v8 = vsel %vm12961_vm10, %v3040_v60, 0.0  ;;  %v5347_v26 = vsel %vm12963_vm15, %v5329_v49, 0.0  ;;  %v5333_v60 = vmul.f32 %v12847_v27, %v5327_v43  ;;  %v5332_v49 = vmul.f32 %v12865_v55, %v5327_v43  ;;  %vm12971_vm1 = vmmov %vm12900_vm0 }
 0xed2   : > { %v5350_v6 = vsel %vm12900_vm0, %v5330_v52, 0.0  ;;  %vm12972_vm12 = vmmov %vm12900_vm0 }
 0xed3   : > { %5390 = vadd.xlane.f32.xlu1 %v5389_v21  ;;  %5387 = vadd.xlane.f32.xlu0 %v5386_v36  ;;  %v5344_v21 = vsel %vm12964_vm4, %v5328_v15, 0.0  ;;  %v5353_v36 = vsel %vm12967_vm11, %v5331_v18, 0.0  ;;  %v5359_v56 = vsel %vm12970_vm14, %v5333_v60, 0.0  ;;  %v5356_v34 = vsel %vm12971_vm1, %v5332_v49, 0.0  ;;  %vm12975_vm3 = vmmov %vm12900_vm0 }
 0xed4   : > { %7445 = vmatmul.mubr.msk.f32.gmra.mrb[164].mxu0 %vm12958_vm6, %v12850_v19  ;;  %v5335_v15 = vmul.f32 %v12850_v19, %v5327_v43  ;;  %vm12973_vm6 = vmmov %vm12900_vm0 }
 0xed5   : > { %7447 = vmatprep.mubr.msk.f32.mxu0 %vm12959_vm5, %v12898_v9  ;;  %vm12974_vm5 = vmmov %vm12900_vm0 }
 0xed6   : > { %v5365_v27 = vsel %vm12974_vm5, %v5335_v15, 0.0  ;;  %vm12976_vm10 = vmmov %vm12900_vm0 }
 0xed7   : > { %3084 = vadd.xlane.f32.xlu1 %v3083_v1  ;;  %3081 = vadd.xlane.f32.xlu0 %v3080_v8  ;;  %v5334_v1 = vmul.f32 %v12868_v47, %v5327_v43  ;;  %v5339_v8 = vmul.f32 %v12878_v17, %v5327_v43  ;;  %vm12978_vm15 = vmmov %vm12900_vm0 }
 0xed8   : > { %7448 = vmatmul.mubr.msk.f32.gmra.mrb[166].mxu0 %vm12962_vm8, %v12875_v30  ;;  %vm12977_vm8 = vmmov %vm12900_vm0 }
 0xed9   : > { %7450 = vmatprep.mubr.msk.f32.mxu0 %vm12965_vm13, %v12901_v28  ;;  %v5362_v55 = vsel %vm12975_vm3, %v5334_v1, 0.0  ;;  %vm12979_vm4 = vmmov %vm12900_vm0 }
 0xeda   : > { %vm12980_vm13 = vmmov %vm12900_vm0 }
 0xedb   : > { %5348 = vadd.xlane.f32.xlu1 %v5347_v26  ;;  %5345 = vadd.xlane.f32.xlu0 %v5344_v21  ;;  %v5338_v26 = vmul.f32 %v12901_v28, %v5327_v43  ;;  %v5377_v21 = vsel %vm12978_vm15, %v5339_v8, 0.0  ;;  %v8133_v28 = vld [vmem:[%s11657_s2 + $0x10] sm:$0xff]   ;;  %vm12988_vm11 = vmmov %vm12900_vm0 }
 0xedc   : > { %7451 = vmatmul.mubr.msk.f32.gmra.mrb[168].mxu0 %vm12966_vm2, %v12878_v17  ;;  %vm12981_vm2 = vmmov %vm12900_vm0  ;;  %7470 = vmatprep.subr.bf16.mxu0 %v8133_v28 }
 0xedd   : > { %7453 = vmatprep.mubr.msk.f32.mxu0 %vm12968_vm9, %v12949_v61  ;;  %v5336_v61 = vmul.f32 %v12898_v9, %v5327_v43  ;;  %v5374_v18 = vsel %vm12979_vm4, %v5338_v26, 0.0  ;;  %v3042_v9 = vmul.f32 %v12952_v45, %v11079_v46  ;;  %7894 = vmatprep.subr.bf16.mxu1 %v8133_v28  ;;  %vm12990_vm9 = vmmov %vm12900_vm0 }
 0xede   : > { %7471 = vmatpush3.bf16.msra.mxu0 %v8133_v28  ;;  %7896 = vmatpush3.bf16.msra.mxu1 %v8133_v28  ;;  %v12983_v28 = vld [vmem:[#allocation55_spill] sm:$0xff]  ;;  %vm12996_vm14 = vmmov %vm12900_vm0 }
 0xedf   : > { %5354 = vadd.xlane.f32.xlu1 %v5353_v36  ;;  %5351 = vadd.xlane.f32.xlu0 %v5350_v6  ;;  %v5368_v47 = vsel %vm12977_vm8, %v5336_v61, 0.0  ;;  %v3086_v17 = vsel %vm12981_vm2, %v3042_v9, 0.0  ;;  %vm12999_vm1 = vmmov %vm12900_vm0 }
 0xee0   : > { %7454 = vmatmul.mubr.msk.f32.gmra.mrb[170].mxu0 %vm12969_vm7, %v12948_v38  ;;  %v5337_v38 = vmul.f32 %v12875_v30, %v5327_v43  ;;  %v3043_v30 = vmul.f32 %v12951_v44, %v11079_v46  ;;  %v8134_v46 = vld [vmem:[%s11657_s2 + $0x18] sm:$0xff]   ;;  %v11496_v43 = vld [vmem:[%s11657_s2] sm:$0xff]   ;;  %vm12993_vm7 = vmmov %vm12900_vm0 }
 0xee1   : > { %7456 = vmatprep.mubr.msk.f32.mxu0 %vm12972_vm12, %v12952_v45  ;;  %7472 = vmatprep.subr.bf16.mxu0 %v8134_v46  ;;  %12982 = vst [vmem:[#allocation52_spill] sm:$0xff] %v11496_v43  ;;  %v1197_v45 = vpop.xlane.xlu0 %1196  ;;  %vm13002_vm12 = vmmov %vm12900_vm0 }
 0xee2   : > { %v5371_v19 = vsel %vm12976_vm10, %v5337_v38, 0.0  ;;  %v3089_v52 = vsel %vm12980_vm13, %v3043_v30, 0.0  ;;  %7895 = vmatprep.subr.bf16.mxu1 %v8134_v46  ;;  %7473 = vmatpush3.bf16.msra.mxu0 %v8134_v46  ;;  %vm13008_vm5 = vmmov %vm12900_vm0 }
 0xee3   : > { %5360 = vadd.xlane.f32.xlu1 %v5359_v56  ;;  %5357 = vadd.xlane.f32.xlu0 %v5356_v34  ;;  %vm13012_vm3 = vmmov %vm12900_vm0 }
 0xee4   : > { %7457 = vmatmul.mubr.msk.f32.gmra.mrb[172].mxu0 %vm12973_vm6, %v12951_v44  ;;  %7897 = vmatpush3.bf16.msra.mxu1 %v8134_v46  ;;  %v1199_v44 = vpop.xlane.xlu1 %1198  ;;  %vm13003_vm6 = vmmov %vm12900_vm0 }
 0xee5   : > { %7490 = vmatprep.subr.bf16.mxu1 %v11496_v43  ;;  %v2276_v6 = vpop.xlane.xlu0 %2275  ;;  %vm13016_vm10 = vmmov %vm12900_vm0 }
 0xee6   : > { %v2294_v13 = vadd.f32 %v2276_v6, %v1197_v45  ;;  %vm13020_vm8 = vmmov %vm12900_vm0 }
 0xee7   : > { %5366 = vadd.xlane.f32.xlu1 %v5365_v27  ;;  %5363 = vadd.xlane.f32.xlu0 %v5362_v55  ;;  %vm13024_vm15 = vmmov %vm12900_vm0 }
 0xee8   : > { %v2279_v36 = vpop.xlane.xlu1 %2278  ;;  %vm13028_vm4 = vmmov %vm12900_vm0 }
 0xee9   : > { %vm13031_vm13 = vmmov %vm12900_vm0 }
 0xeea   : > { %vm13032_vm2 = vmmov %vm12900_vm0 }
 0xeeb   : > { %5372 = vadd.xlane.f32.xlu1 %v5371_v19  ;;  %5369 = vadd.xlane.f32.xlu0 %v5368_v47 }
 0xeef   : > { %5378 = vadd.xlane.f32.xlu1 %v5377_v21  ;;  %5375 = vadd.xlane.f32.xlu0 %v5374_v18 }
 0xef3   : > { %3090 = vadd.xlane.f32.xlu1 %v3089_v52  ;;  %3087 = vadd.xlane.f32.xlu0 %v3086_v17 }
 0xf5c   : > { %v11499_v60 = vpop.xlane.xlu0 %5381  ;;  %v11501_v49 = vpop.xlane.xlu1 %5384 }
 0xf60   : > { %v11503_v56 = vpop.xlane.xlu0 %5387  ;;  %v11505_v34 = vpop.xlane.xlu1 %5390 }
 0xf64   : > { %v3082_v15 = vpop.xlane.xlu0 %3081  ;;  %v3085_v1 = vpop.xlane.xlu1 %3084 }
 0xf65   : > { %v3104_v27 = vadd.f32 %v3082_v15, %v11410_v4  ;;  %v3105_v55 = vadd.f32 %v3085_v1, %v11390_v42  ;;  %v12985_v4 = vld [vmem:[#allocation54_spill] sm:$0xff] }
 0xf67   : > { %v3120_v38 = vadd.f32 1e-08, %v3104_v27  ;;  %v3121_v61 = vadd.f32 1e-08, %v3105_v55 }
 0xf68   : > { %v5346_v19 = vpop.xlane.xlu0 %5345  ;;  %v5349_v47 = vpop.xlane.xlu1 %5348 }
 0xf69   : > { %8273 = vrcp.f32 %v3120_v38 }
 0xf6a   : > { %8275 = vrcp.f32 %v3121_v61  ;;  %v2295_v61 = vadd.f32 %v2279_v36, %v1199_v44  ;;  %v12986_v36 = vld [vmem:[#allocation59_spill] sm:$0xff] }
 0xf6c   : > { %v5352_v8 = vpop.xlane.xlu0 %5351  ;;  %v5355_v26 = vpop.xlane.xlu1 %5354 }
 0xf6d   : > { %v5394_v44 = vadd.f32 %v5352_v8, %v11348_v29 }
 0xf70   : > { %v5358_v21 = vpop.xlane.xlu0 %5357  ;;  %v5361_v18 = vpop.xlane.xlu1 %5360 }
 0xf73   : > { %v8274_v30 = vpop.eup %8273 }
 0xf74   : > { %v8276_v9 = vpop.eup %8275  ;;  %v5364_v52 = vpop.xlane.xlu0 %5363  ;;  %v11510_v46 = vmul.f32 %v8274_v30, %v12983_v28  ;;  %v5393_v30 = vadd.f32 %v5349_v47, %v11326_v35  ;;  %v5410_v35 = vadd.f32 1e-08, %v5394_v44  ;;  %v4662_v47 = vadd.f32 %v11394_v20, %v11392_v3 }
 0xf75   : > { %v5367_v17 = vpop.xlane.xlu1 %5366  ;;  %v11513_v15 = vmul.f32 %v8276_v9, %v12985_v4  ;;  %v5392_v9 = vadd.f32 %v5346_v19, %v11338_v24  ;;  %v5395_v4 = vadd.f32 %v5355_v26, %v11336_v32  ;;  %v5396_v24 = vadd.f32 %v5358_v21, %v11362_v2 }
 0xf76   : > { %12984 = vst [vmem:[#allocation56_spill] sm:$0xff] %v11510_v46  ;;  %v5409_v28 = vadd.f32 1e-08, %v5393_v30  ;;  %v5398_v29 = vadd.f32 %v5364_v52, %v11374_v37  ;;  %v4663_v19 = vadd.f32 %v11376_v59, %v11367_v10  ;;  %v4665_v10 = vadd.f32 %v11385_v39, %v11380_v41 }
 0xf77   : > { %v5408_v46 = vadd.f32 1e-08, %v5392_v9  ;;  %v4664_v3 = vadd.f32 %v11403_v40, %v11396_v31  ;;  %v4666_v39 = vadd.f32 %v11298_v63, %v11284_v12  ;;  %v4667_v31 = vadd.f32 %v11306_v54, %v11287_v58 }
 0xf78   : > { %v5370_v1 = vpop.xlane.xlu0 %5369 }
 0xf79   : > { %v5373_v27 = vpop.xlane.xlu1 %5372  ;;  %v5400_v52 = vadd.f32 %v5370_v1, %v4662_v47 }
 0xf7b   : > { %v5416_v30 = vadd.f32 1e-08, %v5400_v52 }
 0xf7c   : > { %v5376_v55 = vpop.xlane.xlu0 %5375 }
 0xf7d   : > { %v5379_v38 = vpop.xlane.xlu1 %5378 }
 0xf80   : > { %v3088_v16 = vpop.xlane.xlu0 %3087 }
 0xf81   : > { %v3091_v57 = vpop.xlane.xlu1 %3090  ;;  %v3106_v0 = vadd.f32 %v3088_v16, %v2294_v13  ;;  %v5399_v16 = vadd.f32 %v5367_v17, %v11360_v11 }
 0xf82   : > { %v3107_v53 = vadd.f32 %v3091_v57, %v2295_v61  ;;  %v12987_v57 = vld [vmem:[#allocation58_spill] sm:$0xff] }
 0xf83   : > { %v3122_v43 = vadd.f32 1e-08, %v3106_v0  ;;  %v5415_v26 = vadd.f32 1e-08, %v5399_v16 }
 0xf84   : > { %v3123_v25 = vadd.f32 1e-08, %v3107_v53  ;;  %v5397_v53 = vadd.f32 %v5361_v18, %v11352_v14  ;;  %v5414_v14 = vadd.f32 1e-08, %v5398_v29  ;;  %v5401_v18 = vadd.f32 %v5373_v27, %v4663_v19 }
 0xf85   : > { %8277 = vrcp.f32 %v3122_v43  ;;  %v5412_v43 = vadd.f32 1e-08, %v5396_v24 }
 0xf86   : > { %8279 = vrcp.f32 %v3123_v25  ;;  %v5411_v25 = vadd.f32 1e-08, %v5395_v4  ;;  %v5413_v13 = vadd.f32 1e-08, %v5397_v53 }
 0xf87   : > { %8281 = vrcp.f32 %v5409_v28 }
 0xf88   : > { %8283 = vrcp.f32 %v5408_v46 }
 0xf89   : > { %8285 = vrcp.f32 %v5411_v25 }
 0xf8a   : > { %8287 = vrcp.f32 %v5410_v35 }
 0xf8b   : > { %8289 = vrcp.f32 %v5413_v13 }
 0xf8c   : > { %8291 = vrcp.f32 %v5412_v43  ;;  %v12989_v43 = vld [vmem:[#allocation78_spill] sm:$0xff] }
 0xf8d   : > { %8293 = vrcp.f32 %v5414_v14 }
 0xf8e   : > { %8295 = vrcp.f32 %v5415_v26  ;;  %v12991_v26 = vld [vmem:[#allocation42_spill] sm:$0xff] }
 0xf8f   : > { %v8278_v42 = vpop.eup %8277 }
 0xf90   : > { %v8280_v45 = vpop.eup %8279  ;;  %v11522_v6 = vmul.f32 %v8278_v42, %v12986_v36  ;;  %v5417_v42 = vadd.f32 1e-08, %v5401_v18 }
 0xf91   : > { %v11525_v0 = vmul.f32 %v8280_v45, %v12987_v57  ;;  %v8282_v37 = vpop.eup %8281 }
 0xf92   : > { %v8284_v17 = vpop.eup %8283  ;;  %8297 = vrcp.f32 %v5417_v42  ;;  %v12995_v42 = vld [vmem:[#allocation44_spill] sm:$0xff] }
 0xf93   : > { %v3163_v32 = vpack.c.bf16 %v11525_v0, %v11522_v6  ;;  %v8286_v1 = vpop.eup %8285  ;;  %8299 = vrcp.f32 %v5416_v30  ;;  %v6177_v6 = vld [vmem:[%s11658_s3] ss:$0 sm:$0xff] }
 0xf94   : > { %v8288_v41 = vpop.eup %8287 }
 0xf95   : > { %v8290_v63 = vpop.eup %8289 }
 0xf96   : > { %v8292_v54 = vpop.eup %8291 }
 0xf97   : > { %v8294_v53 = vpop.eup %8293 }
 0xf98   : > { %v8296_v13 = vpop.eup %8295 }
 0xf9a   : > { %v7437_v8 = vpop.f32.mrb[154].mxu0 }
 0xf9b   : > { %v5227_v2 = vadd.f32 %v7437_v8, %v10990_v33  ;;  %v5147_v21 = vpop.f32.mrb[155].mxu0  ;;  %v5403_v33 = vadd.f32 %v5379_v38, %v4665_v10  ;;  %v5405_v38 = vadd.f32 %v11501_v49, %v4667_v31  ;;  %v12994_v10 = vld [vmem:[#allocation43_spill] sm:$0xff]  ;;  %v12998_v31 = vld [vmem:[#allocation45_spill] sm:$0xff] }
 0xf9c   : > { %v5226_v11 = vadd.f32 %v5147_v21, %v10992_v22  ;;  %v5402_v22 = vadd.f32 %v5376_v55, %v4664_v3 }
 0xf9d   : > { %v5441_v59 = vmul.f32 %v8282_v37, %v5227_v2  ;;  %v5419_v55 = vadd.f32 1e-08, %v5403_v33  ;;  %v5421_v25 = vadd.f32 1e-08, %v5405_v38 }
 0xf9e   : > { %v5440_v20 = vmul.f32 %v8284_v17, %v5226_v11  ;;  %v7440_v46 = vpop.f32.mrb[160].mxu0 }
 0xf9f   : > { %v5229_v27 = vadd.f32 %v7440_v46, %v10994_v23  ;;  %v5157_v61 = vpop.f32.mrb[161].mxu0  ;;  %v5404_v23 = vadd.f32 %v11499_v60, %v4666_v39  ;;  %v5407_v60 = vadd.f32 %v11505_v34, %v11320_v5  ;;  %8301 = vrcp.f32 %v5419_v55 }
 0xfa0   : > { %v5456_v9 = vpack.c.bf16 %v5441_v59, %v5440_v20  ;;  %v5228_v28 = vadd.f32 %v5157_v61, %v10996_v7  ;;  %v5418_v7 = vadd.f32 1e-08, %v5402_v22  ;;  %v12997_v22 = vld [vmem:[#allocation89_spill] sm:$0xff] }
 0xfa1   : > { %v5443_v40 = vmul.f32 %v8286_v1, %v5229_v27  ;;  %v5420_v24 = vadd.f32 1e-08, %v5404_v23  ;;  %v5423_v14 = vadd.f32 1e-08, %v5407_v60 }
 0xfa2   : > { %v5442_v4 = vmul.f32 %v8288_v41, %v5228_v28  ;;  %7474 = vmatprep.mubr.msk.bf16.mxu0 %vm12988_vm11, %v5456_v9  ;;  %8303 = vrcp.f32 %v5418_v7  ;;  %vm13033_vm11 = vmmov %vm12900_vm0 }
 0xfa3   : > { %v7443_v44 = vpop.f32.mrb[162].mxu0  ;;  %8305 = vrcp.f32 %v5421_v25 }
 0xfa4   : > { %v5457_v45 = vpack.c.bf16 %v5443_v40, %v5442_v4  ;;  %v5231_v36 = vadd.f32 %v7443_v44, %v10998_v51  ;;  %v5167_v12 = vpop.f32.mrb[163].mxu0  ;;  %v5406_v51 = vadd.f32 %v11503_v56, %v11324_v62  ;;  %8307 = vrcp.f32 %v5420_v24  ;;  %v8298_v56 = vpop.eup %8297  ;;  %v13000_v44 = vld [vmem:[#allocation93_spill] sm:$0xff]  ;;  %v13006_v24 = vld [vmem:[#allocation94_spill] sm:$0xff] }
 0xfa5   : > { %v5230_v58 = vadd.f32 %v5167_v12, %v11000_v50  ;;  %v8300_v37 = vpop.eup %8299  ;;  %8309 = vrcp.f32 %v5423_v14  ;;  %v13018_v14 = vld [vmem:[#allocation51_spill] sm:$0xff] }
 0xfa6   : > { %v5445_v57 = vmul.f32 %v8290_v63, %v5231_v36  ;;  %7475 = vmatmul.mubr.msk.bf16.vlgmr.msra.gmra.mrb[176].mxu0 %vm12900_vm0, %v5457_v45  ;;  %v5422_v8 = vadd.f32 1e-08, %v5406_v51  ;;  %v13001_v63 = vld [vmem:[#allocation46_spill] sm:$0xff] }
 0xfa7   : > { %v5444_v49 = vmul.f32 %v8292_v54, %v5230_v58  ;;  %v7446_v35 = vpop.f32.mrb[164].mxu0 }
 0xfa8   : > { %v5233_v29 = vadd.f32 %v7446_v35, %v11002_v48  ;;  %v5177_v50 = vpop.f32.mrb[165].mxu0  ;;  %v12992_v48 = vld [vmem:[#allocation83_spill] sm:$0xff]  ;;  %8311 = vrcp.f32 %v5422_v8  ;;  %v13004_v35 = vld [vmem:[#allocation52_spill] sm:$0xff] }
 0xfa9   : > { %v5458_v16 = vpack.c.bf16 %v5445_v57, %v5444_v49  ;;  %v5232_v19 = vadd.f32 %v5177_v50, %v12989_v43  ;;  %v8302_v20 = vpop.eup %8301  ;;  %v8136_v49 = vld [vmem:[%s11657_s2 + $0x8] sm:$0xff]   ;;  %v13010_v50 = vld [vmem:[#allocation49_spill] sm:$0xff]  ;;  %v13014_v43 = vld [vmem:[#allocation50_spill] sm:$0xff] }
 0xfaa   : > { %v5447_v47 = vmul.f32 %v8296_v13, %v5233_v29  ;;  %v13009_v29 = vld [vmem:[#allocation96_spill] sm:$0xff] }
 0xfab   : > { %v5446_v5 = vmul.f32 %v8294_v53, %v5232_v19  ;;  %v7449_v34 = vpop.f32.mrb[166].mxu0  ;;  %7478 = vmatprep.mubr.msk.bf16.mxu0 %vm12990_vm9, %v5458_v16  ;;  %v13005_v53 = vld [vmem:[#allocation95_spill] sm:$0xff]  ;;  %v13011_v13 = vpack.c.bf16 %v13009_v29, %v13010_v50  ;;  %v13013_v16 = vld [vmem:[#allocation5_spill] sm:$0xff]  ;;  %v13022_v8 = vld [vmem:[#allocation48_spill] sm:$0xff] }
 0xfac   : > { %v5235_v18 = vadd.f32 %v7449_v34, %v12991_v26  ;;  %v5187_v62 = vpop.f32.mrb[167].mxu0  ;;  %v8304_v27 = vpop.eup %8303  ;;  %v13007_v51 = vpack.c.bf16 %v13005_v53, %v13006_v24  ;;  %v13015_v19 = vpack.c.bf16 %v13013_v16, %v13014_v43  ;;  %v13021_v34 = vld [vmem:[#allocation33_spill] sm:$0xff]  ;;  %vm13034_vm9 = vmmov %vm12900_vm0 }
 0xfad   : > { %v5459_v2 = vpack.c.bf16 %v5447_v47, %v5446_v5  ;;  %v5234_v21 = vadd.f32 %v5187_v62, %v12992_v48  ;;  %v8306_v41 = vpop.eup %8305  ;;  %v13017_v47 = vld [vmem:[#allocation38_spill] sm:$0xff]  ;;  %v13023_v26 = vpack.c.bf16 %v13021_v34, %v13022_v8  ;;  %v13026_v62 = vld [vmem:[#allocation53_spill] sm:$0xff] }
 0xfae   : > { %v5449_v52 = vmul.f32 %v8298_v56, %v5235_v18  ;;  %v8308_v4 = vpop.eup %8307  ;;  %v13019_v5 = vpack.c.bf16 %v13017_v47, %v13018_v14  ;;  %v13025_v18 = vld [vmem:[#allocation47_spill] sm:$0xff] }
 0xfaf   : > { %v5448_v11 = vmul.f32 %v8300_v37, %v5234_v21  ;;  %v7452_v17 = vpop.f32.mrb[168].mxu0  ;;  %7479 = vmatmul.mubr.msk.bf16.gmra.mrb[180].mxu0 %vm12993_vm7, %v5459_v2  ;;  %v8310_v36 = vpop.eup %8309  ;;  %v13027_v56 = vpack.c.bf16 %v13025_v18, %v13026_v62  ;;  %v13029_v2 = vld [vmem:[#allocation56_spill] sm:$0xff]  ;;  %vm13035_vm7 = vmmov %vm12900_vm0 }
 0xfb0   : > { %v5237_v59 = vadd.f32 %v7452_v17, %v12994_v10  ;;  %v5197_v3 = vpop.f32.mrb[169].mxu0  ;;  %v13030_v48 = vpack.c.bf16 %v11513_v15, %v13029_v2 }
 0xfb1   : > { %v5460_v46 = vpack.c.bf16 %v5449_v52, %v5448_v11  ;;  %v5236_v33 = vadd.f32 %v5197_v3, %v12995_v42 }
 0xfb2   : > { %v5451_v61 = vmul.f32 %v8302_v20, %v5237_v59  ;;  %v8312_v54 = vpop.eup %8311 }
 0xfb3   : > { %v5450_v1 = vmul.f32 %v8304_v27, %v5236_v33  ;;  %v7455_v30 = vpop.f32.mrb[170].mxu0  ;;  %7482 = vmatprep.mubr.msk.bf16.mxu0 %vm12996_vm14, %v5460_v46  ;;  %vm13036_vm14 = vmmov %vm12900_vm0 }
 0xfb4   : > { %v5239_v9 = vadd.f32 %v7455_v30, %v12997_v22  ;;  %v5207_v28 = vpop.f32.mrb[171].mxu0 }
 0xfb5   : > { %v5461_v39 = vpack.c.bf16 %v5451_v61, %v5450_v1  ;;  %v5238_v40 = vadd.f32 %v5207_v28, %v12998_v31 }
 0xfb6   : > { %v5453_v23 = vmul.f32 %v8306_v41, %v5239_v9 }
 0xfb7   : > { %v5452_v38 = vmul.f32 %v8308_v4, %v5238_v40  ;;  %v7458_v55 = vpop.f32.mrb[172].mxu0  ;;  %7483 = vmatmul.mubr.msk.bf16.gmra.mrb[184].mxu0 %vm12999_vm1, %v5461_v39  ;;  %vm13037_vm1 = vmmov %vm12900_vm0 }
 0xfb8   : > { %v5241_v7 = vadd.f32 %v7458_v55, %v13000_v44  ;;  %v5217_v45 = vpop.f32.mrb[173].mxu0 }
 0xfb9   : > { %v5462_v12 = vpack.c.bf16 %v5453_v23, %v5452_v38  ;;  %v5240_v58 = vadd.f32 %v5217_v45, %v13001_v63 }
 0xfba   : > { %v5455_v57 = vmul.f32 %v8310_v36, %v5241_v7 }
 0xfbb   : > { %v5454_v25 = vmul.f32 %v8312_v54, %v5240_v58  ;;  %7486 = vmatprep.mubr.msk.bf16.mxu1 %vm13002_vm12, %v5462_v12  ;;  %vm13038_vm12 = vmmov %vm12900_vm0 }
 0xfbd   : > { %v5463_v60 = vpack.c.bf16 %v5455_v57, %v5454_v25 }
 0xfbf   : > { %7487 = vmatmul.mubr.msk.bf16.vlgmr.msra.gmra.mrb[116].mxu1 %vm13003_vm6, %v5463_v60  ;;  %vm13039_vm6 = vmmov %vm12900_vm0 }
 0xfc0   : > { %7491 = vmatpush3.bf16.msra.mxu1 %v13004_v35  ;;  %7494 = vmatprep.mubr.msk.bf16.mxu1 %vm13008_vm5, %v13007_v51  ;;  %vm13040_vm5 = vmmov %vm12900_vm0 }
 0xfc1   : > { %7492 = vmatprep.subr.bf16.mxu1 %v8136_v49 }
 0xfc4   : > { %7493 = vmatpush3.bf16.msra.mxu1 %v8136_v49 }
 0xfc7   : > { %7495 = vmatmul.mubr.msk.bf16.vlgmr.msra.gmra.mrb[120].mxu1 %vm13012_vm3, %v13011_v13  ;;  %vm13041_vm3 = vmmov %vm12900_vm0 }
 0xfc8   : > { %7498 = vmatprep.mubr.msk.bf16.mxu1 %vm13016_vm10, %v13015_v19  ;;  %vm13042_vm10 = vmmov %vm12900_vm0 }
 0xfcf   : > { %7499 = vmatmul.mubr.msk.bf16.gmra.mrb[124].mxu1 %vm13020_vm8, %v13019_v5  ;;  %vm13043_vm8 = vmmov %vm12900_vm0 }
 0xfd0   : > { %7502 = vmatprep.mubr.msk.bf16.mxu1 %vm13024_vm15, %v13023_v26  ;;  %vm13044_vm15 = vmmov %vm12900_vm0 }
 0xfd7   : > { %7503 = vmatmul.mubr.msk.bf16.gmra.mrb[128].mxu1 %vm13028_vm4, %v13027_v56  ;;  %vm13045_vm4 = vmmov %vm12900_vm0 }
 0xfd8   : > { %7506 = vmatprep.mubr.msk.bf16.mxu1 %vm13031_vm13, %v13030_v48  ;;  %vm13046_vm13 = vmmov %vm12900_vm0 }
 0xfdf   : > { %7507 = vmatmul.mubr.msk.bf16.gmra.mrb[116].mxu1 %vm13032_vm2, %v3163_v32  ;;  %vm13047_vm2 = vmmov %vm12900_vm0 }
0x1079   : > { %v7476_v21 = vpop.f32.mrb[176].mxu0 }
0x107a   : > { %v5538_v37 = vpop.f32.mrb[177].mxu0 }
0x107b   : > { %v7477_v52 = vpop.f32.mrb[178].mxu0 }
0x107c   : > { %v5541_v11 = vpop.f32.mrb[179].mxu0 }
0x1082   : > { %v7480_v17 = vpop.f32.mrb[180].mxu0 }
0x1083   : > { %v5554_v10 = vpop.f32.mrb[181].mxu0 }
0x1084   : > { %v7481_v59 = vpop.f32.mrb[182].mxu0 }
0x1085   : > { %v5557_v3 = vpop.f32.mrb[183].mxu0 }
0x108a   : > { %v7484_v20 = vpop.f32.mrb[184].mxu0 }
0x108b   : > { %v5570_v46 = vpop.f32.mrb[185].mxu0 }
0x108c   : > { %v7485_v42 = vpop.f32.mrb[186].mxu0 }
0x108d   : > { %v5573_v33 = vpop.f32.mrb[187].mxu0 }
0x109a   : > { %v7496_v15 = vpop.f32.mrb[120].mxu1 }
0x109b   : > { %v5680_v0 = vadd.f32 %v7496_v15, %v7476_v21  ;;  %v5671_v32 = vpop.f32.mrb[121].mxu1 }
0x109c   : > { %v5672_v27 = vadd.f32 %v5671_v32, %v5538_v37  ;;  %v7497_v61 = vpop.f32.mrb[122].mxu1 }
0x109d   : > { %v5743_v1 = vadd.f32 %v6177_v6, %v5680_v0  ;;  %v5683_v30 = vadd.f32 %v7497_v61, %v7477_v52  ;;  %v5674_v22 = vpop.f32.mrb[123].mxu1 }
0x109e   : > { %v5741_v9 = vadd.f32 %v6177_v6, %v5672_v27  ;;  %v5675_v28 = vadd.f32 %v5674_v22, %v5541_v11 }
0x109f   : > { %5759 = vst.msk [vmem:[%s11618_s21 + $0x10] sm:$0xff] %vm13033_vm11, %v5743_v1  ;;  %v5744_v41 = vadd.f32 %v6177_v6, %v5683_v30 }
0x10a0   : > { %5757 = vst.msk [vmem:[%s11618_s21] sm:$0xff] %vm12900_vm0, %v5741_v9  ;;  %v5742_v39 = vadd.f32 %v6177_v6, %v5675_v28 }
0x10a1   : > { %5760 = vst.msk [vmem:[%s11618_s21 + $0x18] sm:$0xff] %vm13034_vm9, %v5744_v41 }
0x10a2   : > { %5758 = vst.msk [vmem:[%s11618_s21 + $0x8] sm:$0xff] %vm13035_vm7, %v5742_v39  ;;  %v7500_v31 = vpop.f32.mrb[124].mxu1 }
0x10a3   : > { %v5696_v40 = vadd.f32 %v7500_v31, %v7480_v17  ;;  %v5687_v4 = vpop.f32.mrb[125].mxu1 }
0x10a4   : > { %v5688_v23 = vadd.f32 %v5687_v4, %v5554_v10  ;;  %v7501_v38 = vpop.f32.mrb[126].mxu1 }
0x10a5   : > { %v5747_v55 = vadd.f32 %v6177_v6, %v5696_v40  ;;  %v5699_v44 = vadd.f32 %v7501_v38, %v7481_v59  ;;  %v5690_v7 = vpop.f32.mrb[127].mxu1 }
0x10a6   : > { %v5745_v45 = vadd.f32 %v6177_v6, %v5688_v23  ;;  %v5691_v36 = vadd.f32 %v5690_v7, %v5557_v3 }
0x10a7   : > { %5763 = vst.msk [vmem:[%s11618_s21 + $0x30] sm:$0xff] %vm13036_vm14, %v5747_v55  ;;  %v5748_v12 = vadd.f32 %v6177_v6, %v5699_v44 }
0x10a8   : > { %5761 = vst.msk [vmem:[%s11618_s21 + $0x20] sm:$0xff] %vm13037_vm1, %v5745_v45  ;;  %v5746_v63 = vadd.f32 %v6177_v6, %v5691_v36 }
0x10a9   : > { %5764 = vst.msk [vmem:[%s11618_s21 + $0x38] sm:$0xff] %vm13038_vm12, %v5748_v12 }
0x10aa   : > { %5762 = vst.msk [vmem:[%s11618_s21 + $0x28] sm:$0xff] %vm13039_vm6, %v5746_v63  ;;  %v7504_v58 = vpop.f32.mrb[128].mxu1 }
0x10ab   : > { %v5712_v54 = vadd.f32 %v7504_v58, %v7484_v20  ;;  %v5703_v57 = vpop.f32.mrb[129].mxu1 }
0x10ac   : > { %v5704_v25 = vadd.f32 %v5703_v57, %v5570_v46  ;;  %v7505_v60 = vpop.f32.mrb[130].mxu1 }
0x10ad   : > { %v5751_v49 = vadd.f32 %v6177_v6, %v5712_v54  ;;  %v5715_v35 = vadd.f32 %v7505_v60, %v7485_v42  ;;  %v5706_v53 = vpop.f32.mrb[131].mxu1 }
0x10ae   : > { %v5749_v24 = vadd.f32 %v6177_v6, %v5704_v25  ;;  %v5707_v51 = vadd.f32 %v5706_v53, %v5573_v33 }
0x10af   : > { %5767 = vst.msk [vmem:[%s11618_s21 + $0x50] sm:$0xff] %vm13040_vm5, %v5751_v49  ;;  %v5752_v29 = vadd.f32 %v6177_v6, %v5715_v35 }
0x10b0   : > { %5765 = vst.msk [vmem:[%s11618_s21 + $0x40] sm:$0xff] %vm13041_vm3, %v5749_v24  ;;  %v5750_v50 = vadd.f32 %v6177_v6, %v5707_v51 }
0x10b1   : > { %5768 = vst.msk [vmem:[%s11618_s21 + $0x58] sm:$0xff] %vm13042_vm10, %v5752_v29 }
0x10b2   : > { %5766 = vst.msk [vmem:[%s11618_s21 + $0x48] sm:$0xff] %vm13043_vm8, %v5750_v50  ;;  %v7508_v13 = vpop.f32.mrb[116].mxu1 }
0x10b3   : > { %v5755_v16 = vadd.f32 %v7508_v13, %v6177_v6  ;;  %v5719_v43 = vpop.f32.mrb[117].mxu1 }
0x10b4   : > { %v5753_v19 = vadd.f32 %v6177_v6, %v5719_v43  ;;  %v7509_v47 = vpop.f32.mrb[118].mxu1 }
0x10b5   : > { %5771 = vst.msk [vmem:[%s11618_s21 + $0x70] sm:$0xff] %vm13044_vm15, %v5755_v16  ;;  %v5756_v14 = vadd.f32 %v7509_v47, %v6177_v6  ;;  %v5722_v5 = vpop.f32.mrb[119].mxu1 }
0x10b6   : > { %5769 = vst.msk [vmem:[%s11618_s21 + $0x60] sm:$0xff] %vm13045_vm4, %v5753_v19  ;;  %v5754_v34 = vadd.f32 %v6177_v6, %v5722_v5 }
0x10b7   : > { %5772 = vst.msk [vmem:[%s11618_s21 + $0x78] sm:$0xff] %vm13046_vm13, %v5756_v14 }
0x10b8   : > { %5770 = vst.msk [vmem:[%s11618_s21 + $0x68] sm:$0xff] %vm13047_vm2, %v5754_v34 }
0x10b9 PF: > { %s14_s15 = sadd.s32 1, %s8319_s15  }
0x10ba   : > { %p11_p4 = scmp.ge.s32.totalorder %s14_s15, 4  }
0x10bc   :  { %13 = sbr.rel (!%p11_p4) target bundleno = 1 (0x1), region = 66 }

</bundles_post_ra>
